<compile_context>
chip_gen: v7x
topology: tpu7x:2x2x1
jax: 0.10.0
libtpu: 0.0.40
codegen_flags: <defaults>
</compile_context>

<pallas_src>
import jax
import jax.numpy as jnp
import numpy as np
from jax import lax
from jax.experimental import pallas as pl
from jax.experimental.pallas import tpu as pltpu

# ---- static model sizes (mirror the PyTorch module) -------------------------
B = 2
INPUT_SHAPE = (2, 25, 95)          # C,H,W with C*H*W == 4750 == encoder in_features
D_IN = 4750
Z = 32                             # latent_features
H1, H2 = 256, 128                  # encoder hidden sizes (decoder mirrors them)
D_OUT = 2 * D_IN                   # 9500 decoder output features

LANE = 128
D_IN_PAD = ((D_IN + LANE - 1) // LANE) * LANE      # 4864
D_OUT_PAD = ((D_OUT + LANE - 1) // LANE) * LANE    # 9600 = 75*128
N_TILES = 3                                        # small grid: ~0.35us/step overhead
N_TILE = D_OUT_PAD // N_TILES                      # 3200 = 25*128 (lane-dense tile)
assert 4 * Z == LANE and N_TILE % LANE == 0


def vae_fwd_kernel(x_ref, eps_ref,
                   w1_ref, s1_ref, b1_ref, w2_ref, b2_ref, w3_ref, b3_ref,
                   v1_ref, c1_ref, v2_ref, c2_ref,
                   v3_ref, s3_ref, c3_ref,
                   qz_ref, hz_ref,
                   d_sc):
    """VAE forward. Grid axis j tiles the decoder output columns (v3 / c3 / hz)."""
    j = pl.program_id(0)

    @pl.when(j == 0)
    def _():
        # ---- encoder / posterior q(z|x), decoder front: run once -----------
        # int8 weight, per-column scale applied on the small output: (x@wq)*s + b
        h = jnp.dot(x_ref[...], w1_ref[...].astype(jnp.bfloat16),
                    preferred_element_type=jnp.float32) * s1_ref[...] + b1_ref[...]
        h = jnp.maximum(h, 0.0)                                     # (B, 256)
        h = jnp.dot(h.astype(jnp.bfloat16), w2_ref[...],
                    preferred_element_type=jnp.float32) + b2_ref[...]
        h = jnp.maximum(h, 0.0)                                     # (B, 128)
        h_x = jnp.dot(h.astype(jnp.bfloat16), w3_ref[...],
                      preferred_element_type=jnp.float32) + b3_ref[...]  # (B, 2Z)

        mu = h_x[:, :Z]
        log_sigma = h_x[:, Z:]
        sigma = jnp.exp(log_sigma)
        z = mu + sigma * eps_ref[...]                               # rsample

        # single unmasked lane-dense (B, 128) store: [mu | log_sigma | sigma | z]
        qz_ref[...] = jnp.concatenate([h_x, sigma, z], axis=-1)

        # decoder front, cached (bf16) for every column tile
        d = jnp.dot(z.astype(jnp.bfloat16), v1_ref[...],
                    preferred_element_type=jnp.float32) + c1_ref[...]
        d = jnp.maximum(d, 0.0)                                     # (B, 128)
        d = jnp.dot(d.astype(jnp.bfloat16), v2_ref[...],
                    preferred_element_type=jnp.float32) + c2_ref[...]
        d = jnp.maximum(d, 0.0)                                     # (B, 256)
        d_sc[...] = d.astype(jnp.bfloat16)

    # ---- decoder output column tile (every grid step) -----------------------
    hz = jnp.dot(d_sc[...], v3_ref[...].astype(jnp.bfloat16),
                 preferred_element_type=jnp.float32) * s3_ref[...] + c3_ref[...]
    # observation model: rows >= B//2 hold log_sigma -> fuse the exp here
    row = lax.broadcasted_iota(jnp.int32, hz.shape, 0)
    hz = jnp.where(row >= (B // 2), jnp.exp(hz), hz)
    hz_ref[...] = hz.astype(jnp.bfloat16)                           # (B, N_TILE) bf16 store


def vae_forward(x_nchw, eps, params):
    """Runs VariationalAutoencoder.forward; returns dict with z, qz, pz, px params."""
    # x.view(B, -1), lane-dense pad, bf16 (halves x DMA)
    x_pad = jnp.pad(x_nchw.reshape(B, -1),
                    ((0, 0), (0, D_IN_PAD - D_IN))).astype(jnp.bfloat16)

    grid_spec = pltpu.PrefetchScalarGridSpec(
        num_scalar_prefetch=0,
        grid=(N_TILES,),
        in_specs=[
            pl.BlockSpec((B, D_IN_PAD), lambda j: (0, 0)),    # x       (fetched once)
            pl.BlockSpec((B, Z), lambda j: (0, 0)),           # eps
            pl.BlockSpec((D_IN_PAD, H1), lambda j: (0, 0)),   # w1 int8
            pl.BlockSpec((1, H1), lambda j: (0, 0)),          # s1
            pl.BlockSpec((1, H1), lambda j: (0, 0)),          # b1
            pl.BlockSpec((H1, H2), lambda j: (0, 0)),         # w2 bf16
            pl.BlockSpec((1, H2), lambda j: (0, 0)),          # b2
            pl.BlockSpec((H2, 2 * Z), lambda j: (0, 0)),      # w3 bf16
            pl.BlockSpec((1, 2 * Z), lambda j: (0, 0)),       # b3
            pl.BlockSpec((Z, H2), lambda j: (0, 0)),          # v1 bf16
            pl.BlockSpec((1, H2), lambda j: (0, 0)),          # c1
            pl.BlockSpec((H2, H1), lambda j: (0, 0)),         # v2 bf16
            pl.BlockSpec((1, H1), lambda j: (0, 0)),          # c2
            pl.BlockSpec((H1, N_TILE), lambda j: (0, j)),     # v3 int8  (column tiled)
            pl.BlockSpec((1, N_TILE), lambda j: (0, j)),      # s3       (column tiled)
            pl.BlockSpec((1, N_TILE), lambda j: (0, j)),      # c3       (column tiled)
        ],
        out_specs=(
            pl.BlockSpec((B, 4 * Z), lambda j: (0, 0)),       # packed qz (resident)
            pl.BlockSpec((B, N_TILE), lambda j: (0, j)),      # hz column tile
        ),
        scratch_shapes=[pltpu.VMEM((B, H1), jnp.bfloat16)],   # decoder-front activation
    )

    qz_packed, hz_pad = pl.pallas_call(
        vae_fwd_kernel,
        out_shape=(jax.ShapeDtypeStruct((B, 4 * Z), jnp.float32),
                   jax.ShapeDtypeStruct((B, D_OUT_PAD), jnp.bfloat16)),
        grid_spec=grid_spec,
        compiler_params=pltpu.CompilerParams(
            dimension_semantics=("arbitrary",),               # step 0 feeds later steps
            vmem_limit_bytes=32 * 1024 * 1024),
        cost_estimate=pl.CostEstimate(flops=31_000_000,
                                      transcendentals=B * D_OUT_PAD + 2 * Z,
                                      bytes_accessed=4_300_000),
    )(x_pad, eps,
      params["w1q"], params["s1"], params["b1"],
      params["w2"], params["b2"], params["w3"], params["b3"],
      params["v1"], params["c1"], params["v2"], params["c2"],
      params["v3q"], params["s3"], params["c3"])

    qz_mu = qz_packed[:, 0:Z]
    qz_log_sigma = qz_packed[:, Z:2 * Z]
    qz_sigma = qz_packed[:, 2 * Z:3 * Z]
    z = qz_packed[:, 3 * Z:4 * Z]

    # observation_model: h_z.view(-1, *input_shape).chunk(2, dim=0); exp already fused.
    h_z = hz_pad[:, :D_OUT].astype(jnp.float32).reshape(-1, *INPUT_SHAPE)  # (2B,C,H,W)
    px_mu, px_sigma = jnp.split(h_z, 2, axis=0)

    # prior p(z) = N(0, I)  (prior_params buffer is all zeros -> constant, no kernel work)
    pz = {"mu": jnp.zeros((B, Z), jnp.float32), "sigma": jnp.ones((B, Z), jnp.float32)}

    return {
        "z": z,
        "qz": {"mu": qz_mu, "log_sigma": qz_log_sigma, "sigma": qz_sigma},
        "pz": pz,
        "px": {"mu": px_mu, "sigma": px_sigma},
    }


def reference(x_nchw, eps, params):
    """Pure-JAX reference of the same forward pass (same int8/bf16 numerics)."""
    x = jnp.pad(x_nchw.reshape(B, -1),
                ((0, 0), (0, D_IN_PAD - D_IN))).astype(jnp.bfloat16)

    def dq(a, wq, s, b):      # int8 weight with per-column scale
        return jnp.dot(a.astype(jnp.bfloat16), wq.astype(jnp.bfloat16),
                       preferred_element_type=jnp.float32) * s + b

    def d(a, w, b):           # bf16 weight
        return jnp.dot(a.astype(jnp.bfloat16), w, preferred_element_type=jnp.float32) + b

    h = jnp.maximum(dq(x, params["w1q"], params["s1"], params["b1"]), 0.0)
    h = jnp.maximum(d(h, params["w2"], params["b2"]), 0.0)
    h_x = d(h, params["w3"], params["b3"])
    mu, log_sigma = h_x[:, :Z], h_x[:, Z:]
    sigma = jnp.exp(log_sigma)
    z = mu + sigma * eps
    t = jnp.maximum(d(z, params["v1"], params["c1"]), 0.0)
    t = jnp.maximum(d(t, params["v2"], params["c2"]), 0.0)
    t = t.astype(jnp.bfloat16)
    hz = dq(t, params["v3q"], params["s3"], params["c3"])
    row = jnp.arange(B)[:, None]
    hz = jnp.where(row >= (B // 2), jnp.exp(hz), hz)
    hz = hz.astype(jnp.bfloat16).astype(jnp.float32)[:, :D_OUT]
    h_zr = hz.reshape(-1, *INPUT_SHAPE)
    px_mu, px_sigma = jnp.split(h_zr, 2, axis=0)
    return {"z": z, "qz_mu": mu, "qz_log_sigma": log_sigma, "qz_sigma": sigma,
            "px_mu": px_mu, "px_sigma": px_sigma}


def _linear(key, fan_in, fan_out):
    """torch.nn.Linear-style init (fp32)."""
    k = 1.0 / np.sqrt(fan_in)
    kw, kb = jax.random.split(key)
    w = jax.random.uniform(kw, (fan_in, fan_out), jnp.float32, -k, k)
    b = jax.random.uniform(kb, (1, fan_out), jnp.float32, -k, k)
    return w, b


def _quantize_int8(w):
    """Symmetric per-output-column int8 quantization; returns (int8 weights, f32 scale)."""
    amax = jnp.max(jnp.abs(w), axis=0, keepdims=True)
    scale = jnp.where(amax > 0, amax / 127.0, 1.0).astype(jnp.float32)
    wq = jnp.clip(jnp.round(w / scale), -127, 127).astype(jnp.int8)
    return wq, scale


if __name__ == "__main__":
    key = jax.random.PRNGKey(0)
    kx, keps, k1, k2, k3, k4, k5, k6 = jax.random.split(key, 8)

    x = jax.random.uniform(kx, (B,) + INPUT_SHAPE, jnp.float32)      # observations
    eps = jax.random.normal(keps, (B, Z), jnp.float32)               # eps ~ N(0, 1)

    # ---- parameters (encoder / decoder); w1, v3 int8 + scale, rest bf16 -----
    w1, b1 = _linear(k1, D_IN, H1)
    w1 = jnp.pad(w1, ((0, D_IN_PAD - D_IN), (0, 0)))                 # lane-dense K
    w1q, s1 = _quantize_int8(w1)

    w2, b2 = _linear(k2, H1, H2)
    w3, b3 = _linear(k3, H2, 2 * Z)                                  # -> [mu | log_sigma]
    v1, c1 = _linear(k4, Z, H2)
    v2, c2 = _linear(k5, H2, H1)

    v3, c3 = _linear(k6, H1, D_OUT)
    v3 = jnp.pad(v3, ((0, 0), (0, D_OUT_PAD - D_OUT)))               # lane-dense N
    c3 = jnp.pad(c3, ((0, 0), (0, D_OUT_PAD - D_OUT)))
    v3q, s3 = _quantize_int8(v3)

    params = dict(
        w1q=w1q, s1=s1, b1=b1,
        w2=w2.astype(jnp.bfloat16), b2=b2,
        w3=w3.astype(jnp.bfloat16), b3=b3,
        v1=v1.astype(jnp.bfloat16), c1=c1,
        v2=v2.astype(jnp.bfloat16), c2=c2,
        v3q=v3q, s3=s3, c3=c3,
    )

    out = vae_forward(x, eps, params)
    jax.block_until_ready(out)

    ref = reference(x, eps, params)
    tol_q = dict(rtol=5e-3, atol=5e-3)     # f32 outputs
    tol_p = dict(rtol=1e-2, atol=1e-2)     # bf16-stored decoder outputs
    np.testing.assert_allclose(np.asarray(out["z"]), np.asarray(ref["z"]), **tol_q)
    np.testing.assert_allclose(np.asarray(out["qz"]["mu"]), np.asarray(ref["qz_mu"]), **tol_q)
    np.testing.assert_allclose(np.asarray(out["qz"]["log_sigma"]),
                               np.asarray(ref["qz_log_sigma"]), **tol_q)
    np.testing.assert_allclose(np.asarray(out["qz"]["sigma"]),
                               np.asarray(ref["qz_sigma"]), **tol_q)
    np.testing.assert_allclose(np.asarray(out["px"]["mu"]), np.asarray(ref["px_mu"]), **tol_p)
    np.testing.assert_allclose(np.asarray(out["px"]["sigma"]), np.asarray(ref["px_sigma"]), **tol_p)

    print("KERNEL_OK")
</pallas_src>

<mosaic_0001>
module attributes {stable_mosaic.version = 11 : i64} {
  func.func @vae_fwd_kernel(%arg0: i32, %arg1: memref<2x4864xbf16, #tpu.memory_space<vmem>>, %arg2: memref<2x32xf32, #tpu.memory_space<vmem>>, %arg3: memref<4864x256xi8, #tpu.memory_space<vmem>>, %arg4: memref<1x256xf32, #tpu.memory_space<vmem>>, %arg5: memref<1x256xf32, #tpu.memory_space<vmem>>, %arg6: memref<256x128xbf16, #tpu.memory_space<vmem>>, %arg7: memref<1x128xf32, #tpu.memory_space<vmem>>, %arg8: memref<128x64xbf16, #tpu.memory_space<vmem>>, %arg9: memref<1x64xf32, #tpu.memory_space<vmem>>, %arg10: memref<32x128xbf16, #tpu.memory_space<vmem>>, %arg11: memref<1x128xf32, #tpu.memory_space<vmem>>, %arg12: memref<128x256xbf16, #tpu.memory_space<vmem>>, %arg13: memref<1x256xf32, #tpu.memory_space<vmem>>, %arg14: memref<256x3200xi8, #tpu.memory_space<vmem>>, %arg15: memref<1x3200xf32, #tpu.memory_space<vmem>>, %arg16: memref<1x3200xf32, #tpu.memory_space<vmem>>, %arg17: memref<2x128xf32, #tpu.memory_space<vmem>>, %arg18: memref<2x3200xbf16, #tpu.memory_space<vmem>>, %arg19: memref<2x256xbf16, #tpu.memory_space<vmem>>) attributes {dimension_semantics = [#tpu.dimension_semantics<arbitrary>], iteration_bounds = array<i64: 3>, scalar_prefetch = 0 : i64, scratch_operands = 1 : i64, tpu.core_type = #tpu.core_type<tc>, window_params = [{pipeline_mode = #tpu.pipeline_mode<synchronous>, transform_indices = @transform_0, window_bounds = array<i64: 2, 4864>}, {pipeline_mode = #tpu.pipeline_mode<synchronous>, transform_indices = @transform_1, window_bounds = array<i64: 2, 32>}, {pipeline_mode = #tpu.pipeline_mode<synchronous>, transform_indices = @transform_2, window_bounds = array<i64: 4864, 256>}, {pipeline_mode = #tpu.pipeline_mode<synchronous>, transform_indices = @transform_3, window_bounds = array<i64: 1, 256>}, {pipeline_mode = #tpu.pipeline_mode<synchronous>, transform_indices = @transform_4, window_bounds = array<i64: 1, 256>}, {pipeline_mode = #tpu.pipeline_mode<synchronous>, transform_indices = @transform_5, window_bounds = array<i64: 256, 128>}, {pipeline_mode = #tpu.pipeline_mode<synchronous>, transform_indices = @transform_6, window_bounds = array<i64: 1, 128>}, {pipeline_mode = #tpu.pipeline_mode<synchronous>, transform_indices = @transform_7, window_bounds = array<i64: 128, 64>}, {pipeline_mode = #tpu.pipeline_mode<synchronous>, transform_indices = @transform_8, window_bounds = array<i64: 1, 64>}, {pipeline_mode = #tpu.pipeline_mode<synchronous>, transform_indices = @transform_9, window_bounds = array<i64: 32, 128>}, {pipeline_mode = #tpu.pipeline_mode<synchronous>, transform_indices = @transform_10, window_bounds = array<i64: 1, 128>}, {pipeline_mode = #tpu.pipeline_mode<synchronous>, transform_indices = @transform_11, window_bounds = array<i64: 128, 256>}, {pipeline_mode = #tpu.pipeline_mode<synchronous>, transform_indices = @transform_12, window_bounds = array<i64: 1, 256>}, {transform_indices = @transform_13, window_bounds = array<i64: 256, 3200>}, {transform_indices = @transform_14, window_bounds = array<i64: 1, 3200>}, {transform_indices = @transform_15, window_bounds = array<i64: 1, 3200>}, {pipeline_mode = #tpu.pipeline_mode<synchronous>, transform_indices = @transform_16, window_bounds = array<i64: 2, 128>}, {transform_indices = @transform_17, window_bounds = array<i64: 2, 3200>}]} {
    %c0_i32 = arith.constant 0 : i32
    %0 = arith.cmpi eq, %arg0, %c0_i32 : i32
    %1 = arith.extui %0 : i1 to i32
    %c0_i32_0 = arith.constant 0 : i32
    %2 = arith.cmpi ne, %1, %c0_i32_0 : i32
    scf.if %2 {
      %c0_10 = arith.constant 0 : index
      %c0_11 = arith.constant 0 : index
      %20 = vector.load %arg1[%c0_10, %c0_11] : memref<2x4864xbf16, #tpu.memory_space<vmem>>, vector<2x4864xbf16>
      %c0_12 = arith.constant 0 : index
      %c0_13 = arith.constant 0 : index
      %21 = vector.load %arg3[%c0_12, %c0_13] : memref<4864x256xi8, #tpu.memory_space<vmem>>, vector<4864x256xi8>
      %22 = arith.sitofp %21 : vector<4864x256xi8> to vector<4864x256xbf16>
      %cst_14 = arith.constant dense<0.000000e+00> : vector<2x256xf32>
      %23 = tpu.matmul %20, %22, %cst_14 {dimension_numbers = #tpu.dot_dimension_numbers<[1], [0], [0], [1], [0, 0, 1, 1], [], []>} : vector<2x4864xbf16>, vector<4864x256xbf16>, vector<2x256xf32> -> vector<2x256xf32>
      %c0_15 = arith.constant 0 : index
      %c0_16 = arith.constant 0 : index
      %24 = vector.load %arg4[%c0_15, %c0_16] : memref<1x256xf32, #tpu.memory_space<vmem>>, vector<1x256xf32>
      %25 = vector.broadcast %24 : vector<1x256xf32> to vector<2x256xf32>
      %26 = arith.mulf %23, %25 : vector<2x256xf32>
      %c0_17 = arith.constant 0 : index
      %c0_18 = arith.constant 0 : index
      %27 = vector.load %arg5[%c0_17, %c0_18] : memref<1x256xf32, #tpu.memory_space<vmem>>, vector<1x256xf32>
      %28 = vector.broadcast %27 : vector<1x256xf32> to vector<2x256xf32>
      %29 = arith.addf %26, %28 : vector<2x256xf32>
      %cst_19 = arith.constant 0.000000e+00 : f32
      %30 = vector.broadcast %cst_19 : f32 to vector<2x256xf32>
      %31 = arith.maximumf %29, %30 : vector<2x256xf32>
      %32 = arith.truncf %31 : vector<2x256xf32> to vector<2x256xbf16>
      %c0_20 = arith.constant 0 : index
      %c0_21 = arith.constant 0 : index
      %33 = vector.load %arg6[%c0_20, %c0_21] : memref<256x128xbf16, #tpu.memory_space<vmem>>, vector<256x128xbf16>
      %cst_22 = arith.constant dense<0.000000e+00> : vector<2x128xf32>
      %34 = tpu.matmul %32, %33, %cst_22 {dimension_numbers = #tpu.dot_dimension_numbers<[1], [0], [0], [1], [0, 0, 1, 1], [], []>} : vector<2x256xbf16>, vector<256x128xbf16>, vector<2x128xf32> -> vector<2x128xf32>
      %c0_23 = arith.constant 0 : index
      %c0_24 = arith.constant 0 : index
      %35 = vector.load %arg7[%c0_23, %c0_24] : memref<1x128xf32, #tpu.memory_space<vmem>>, vector<1x128xf32>
      %36 = vector.broadcast %35 : vector<1x128xf32> to vector<2x128xf32>
      %37 = arith.addf %34, %36 : vector<2x128xf32>
      %cst_25 = arith.constant 0.000000e+00 : f32
      %38 = vector.broadcast %cst_25 : f32 to vector<2x128xf32>
      %39 = arith.maximumf %37, %38 : vector<2x128xf32>
      %40 = arith.truncf %39 : vector<2x128xf32> to vector<2x128xbf16>
      %c0_26 = arith.constant 0 : index
      %c0_27 = arith.constant 0 : index
      %41 = vector.load %arg8[%c0_26, %c0_27] : memref<128x64xbf16, #tpu.memory_space<vmem>>, vector<128x64xbf16>
      %cst_28 = arith.constant dense<0.000000e+00> : vector<2x64xf32>
      %42 = tpu.matmul %40, %41, %cst_28 {dimension_numbers = #tpu.dot_dimension_numbers<[1], [0], [0], [1], [0, 0, 1, 1], [], []>} : vector<2x128xbf16>, vector<128x64xbf16>, vector<2x64xf32> -> vector<2x64xf32>
      %c0_29 = arith.constant 0 : index
      %c0_30 = arith.constant 0 : index
      %43 = vector.load %arg9[%c0_29, %c0_30] : memref<1x64xf32, #tpu.memory_space<vmem>>, vector<1x64xf32>
      %44 = vector.broadcast %43 : vector<1x64xf32> to vector<2x64xf32>
      %45 = arith.addf %42, %44 : vector<2x64xf32>
      %46 = vector.extract_strided_slice %45 {offsets = [0, 0], sizes = [2, 32], strides = [1, 1]} : vector<2x64xf32> to vector<2x32xf32>
      %47 = vector.extract_strided_slice %45 {offsets = [0, 32], sizes = [2, 32], strides = [1, 1]} : vector<2x64xf32> to vector<2x32xf32>
      %48 = math.exp %47 : vector<2x32xf32>
      %c0_31 = arith.constant 0 : index
      %c0_32 = arith.constant 0 : index
      %49 = vector.load %arg2[%c0_31, %c0_32] : memref<2x32xf32, #tpu.memory_space<vmem>>, vector<2x32xf32>
      %50 = arith.mulf %48, %49 : vector<2x32xf32>
      %51 = arith.addf %46, %50 : vector<2x32xf32>
      %52 = tpu.concatenate %45, %48, %51 in 1 : vector<2x64xf32>, vector<2x32xf32>, vector<2x32xf32> -> vector<2x128xf32>
      %c0_33 = arith.constant 0 : index
      %c0_34 = arith.constant 0 : index
      %53 = vector.load %arg17[%c0_33, %c0_34] : memref<2x128xf32, #tpu.memory_space<vmem>>, vector<2x128xf32>
      tpu.vector_store %arg17[%c0_33, %c0_34], %52 {strides = array<i32>} : memref<2x128xf32, #tpu.memory_space<vmem>>, vector<2x128xf32>,
      %54 = arith.truncf %51 : vector<2x32xf32> to vector<2x32xbf16>
      %c0_35 = arith.constant 0 : index
      %c0_36 = arith.constant 0 : index
      %55 = vector.load %arg10[%c0_35, %c0_36] : memref<32x128xbf16, #tpu.memory_space<vmem>>, vector<32x128xbf16>
      %cst_37 = arith.constant dense<0.000000e+00> : vector<2x128xf32>
      %56 = tpu.matmul %54, %55, %cst_37 {dimension_numbers = #tpu.dot_dimension_numbers<[1], [0], [0], [1], [0, 0, 1, 1], [], []>} : vector<2x32xbf16>, vector<32x128xbf16>, vector<2x128xf32> -> vector<2x128xf32>
      %c0_38 = arith.constant 0 : index
      %c0_39 = arith.constant 0 : index
      %57 = vector.load %arg11[%c0_38, %c0_39] : memref<1x128xf32, #tpu.memory_space<vmem>>, vector<1x128xf32>
      %58 = vector.broadcast %57 : vector<1x128xf32> to vector<2x128xf32>
      %59 = arith.addf %56, %58 : vector<2x128xf32>
      %cst_40 = arith.constant 0.000000e+00 : f32
      %60 = vector.broadcast %cst_40 : f32 to vector<2x128xf32>
      %61 = arith.maximumf %59, %60 : vector<2x128xf32>
      %62 = arith.truncf %61 : vector<2x128xf32> to vector<2x128xbf16>
      %c0_41 = arith.constant 0 : index
      %c0_42 = arith.constant 0 : index
      %63 = vector.load %arg12[%c0_41, %c0_42] : memref<128x256xbf16, #tpu.memory_space<vmem>>, vector<128x256xbf16>
      %cst_43 = arith.constant dense<0.000000e+00> : vector<2x256xf32>
      %64 = tpu.matmul %62, %63, %cst_43 {dimension_numbers = #tpu.dot_dimension_numbers<[1], [0], [0], [1], [0, 0, 1, 1], [], []>} : vector<2x128xbf16>, vector<128x256xbf16>, vector<2x256xf32> -> vector<2x256xf32>
      %c0_44 = arith.constant 0 : index
      %c0_45 = arith.constant 0 : index
      %65 = vector.load %arg13[%c0_44, %c0_45] : memref<1x256xf32, #tpu.memory_space<vmem>>, vector<1x256xf32>
      %66 = vector.broadcast %65 : vector<1x256xf32> to vector<2x256xf32>
      %67 = arith.addf %64, %66 : vector<2x256xf32>
      %cst_46 = arith.constant 0.000000e+00 : f32
      %68 = vector.broadcast %cst_46 : f32 to vector<2x256xf32>
      %69 = arith.maximumf %67, %68 : vector<2x256xf32>
      %70 = arith.truncf %69 : vector<2x256xf32> to vector<2x256xbf16>
      %c0_47 = arith.constant 0 : index
      %c0_48 = arith.constant 0 : index
      %71 = vector.load %arg19[%c0_47, %c0_48] : memref<2x256xbf16, #tpu.memory_space<vmem>>, vector<2x256xbf16>
      tpu.vector_store %arg19[%c0_47, %c0_48], %70 {strides = array<i32>} : memref<2x256xbf16, #tpu.memory_space<vmem>>, vector<2x256xbf16>,
    } else {
    }
    %c0 = arith.constant 0 : index
    %c0_1 = arith.constant 0 : index
    %3 = vector.load %arg19[%c0, %c0_1] : memref<2x256xbf16, #tpu.memory_space<vmem>>, vector<2x256xbf16>
    %c0_2 = arith.constant 0 : index
    %c0_3 = arith.constant 0 : index
    %4 = vector.load %arg14[%c0_2, %c0_3] : memref<256x3200xi8, #tpu.memory_space<vmem>>, vector<256x3200xi8>
    %5 = arith.sitofp %4 : vector<256x3200xi8> to vector<256x3200xbf16>
    %cst = arith.constant dense<0.000000e+00> : vector<2x3200xf32>
    %6 = tpu.matmul %3, %5, %cst {dimension_numbers = #tpu.dot_dimension_numbers<[1], [0], [0], [1], [0, 0, 1, 1], [], []>} : vector<2x256xbf16>, vector<256x3200xbf16>, vector<2x3200xf32> -> vector<2x3200xf32>
    %c0_4 = arith.constant 0 : index
    %c0_5 = arith.constant 0 : index
    %7 = vector.load %arg15[%c0_4, %c0_5] : memref<1x3200xf32, #tpu.memory_space<vmem>>, vector<1x3200xf32>
    %8 = vector.broadcast %7 : vector<1x3200xf32> to vector<2x3200xf32>
    %9 = arith.mulf %6, %8 : vector<2x3200xf32>
    %c0_6 = arith.constant 0 : index
    %c0_7 = arith.constant 0 : index
    %10 = vector.load %arg16[%c0_6, %c0_7] : memref<1x3200xf32, #tpu.memory_space<vmem>>, vector<1x3200xf32>
    %11 = vector.broadcast %10 : vector<1x3200xf32> to vector<2x3200xf32>
    %12 = arith.addf %9, %11 : vector<2x3200xf32>
    %13 = tpu.iota {dimensions = array<i32: 0>} : vector<2x3200xi32>
    %c1_i32 = arith.constant 1 : i32
    %14 = vector.broadcast %c1_i32 : i32 to vector<2x3200xi32>
    %15 = arith.cmpi sge, %13, %14 : vector<2x3200xi32>
    %16 = math.exp %12 : vector<2x3200xf32>
    %17 = arith.select %15, %16, %12 : vector<2x3200xi1>, vector<2x3200xf32>
    %18 = arith.truncf %17 : vector<2x3200xf32> to vector<2x3200xbf16>
    %c0_8 = arith.constant 0 : index
    %c0_9 = arith.constant 0 : index
    %19 = vector.load %arg18[%c0_8, %c0_9] : memref<2x3200xbf16, #tpu.memory_space<vmem>>, vector<2x3200xbf16>
    tpu.vector_store %arg18[%c0_8, %c0_9], %18 {strides = array<i32>} : memref<2x3200xbf16, #tpu.memory_space<vmem>>, vector<2x3200xbf16>,
    return
  }
  func.func @transform_0(%arg0: i32) -> (i32, i32) {
    %c0_i32 = arith.constant 0 : i32
    %c0_i32_0 = arith.constant 0 : i32
    %c0_i32_1 = arith.constant 0 : i32
    return %c0_i32, %c0_i32_0 : i32, i32
  }
  func.func @transform_1(%arg0: i32) -> (i32, i32) {
    %c0_i32 = arith.constant 0 : i32
    %c0_i32_0 = arith.constant 0 : i32
    %c0_i32_1 = arith.constant 0 : i32
    return %c0_i32, %c0_i32_0 : i32, i32
  }
  func.func @transform_2(%arg0: i32) -> (i32, i32) {
    %c0_i32 = arith.constant 0 : i32
    %c0_i32_0 = arith.constant 0 : i32
    %c0_i32_1 = arith.constant 0 : i32
    return %c0_i32, %c0_i32_0 : i32, i32
  }
  func.func @transform_3(%arg0: i32) -> (i32, i32) {
    %c0_i32 = arith.constant 0 : i32
    %c0_i32_0 = arith.constant 0 : i32
    %c0_i32_1 = arith.constant 0 : i32
    return %c0_i32, %c0_i32_0 : i32, i32
  }
  func.func @transform_4(%arg0: i32) -> (i32, i32) {
    %c0_i32 = arith.constant 0 : i32
    %c0_i32_0 = arith.constant 0 : i32
    %c0_i32_1 = arith.constant 0 : i32
    return %c0_i32, %c0_i32_0 : i32, i32
  }
  func.func @transform_5(%arg0: i32) -> (i32, i32) {
    %c0_i32 = arith.constant 0 : i32
    %c0_i32_0 = arith.constant 0 : i32
    %c0_i32_1 = arith.constant 0 : i32
    return %c0_i32, %c0_i32_0 : i32, i32
  }
  func.func @transform_6(%arg0: i32) -> (i32, i32) {
    %c0_i32 = arith.constant 0 : i32
    %c0_i32_0 = arith.constant 0 : i32
    %c0_i32_1 = arith.constant 0 : i32
    return %c0_i32, %c0_i32_0 : i32, i32
  }
  func.func @transform_7(%arg0: i32) -> (i32, i32) {
    %c0_i32 = arith.constant 0 : i32
    %c0_i32_0 = arith.constant 0 : i32
    %c0_i32_1 = arith.constant 0 : i32
    return %c0_i32, %c0_i32_0 : i32, i32
  }
  func.func @transform_8(%arg0: i32) -> (i32, i32) {
    %c0_i32 = arith.constant 0 : i32
    %c0_i32_0 = arith.constant 0 : i32
    %c0_i32_1 = arith.constant 0 : i32
    return %c0_i32, %c0_i32_0 : i32, i32
  }
  func.func @transform_9(%arg0: i32) -> (i32, i32) {
    %c0_i32 = arith.constant 0 : i32
    %c0_i32_0 = arith.constant 0 : i32
    %c0_i32_1 = arith.constant 0 : i32
    return %c0_i32, %c0_i32_0 : i32, i32
  }
  func.func @transform_10(%arg0: i32) -> (i32, i32) {
    %c0_i32 = arith.constant 0 : i32
    %c0_i32_0 = arith.constant 0 : i32
    %c0_i32_1 = arith.constant 0 : i32
    return %c0_i32, %c0_i32_0 : i32, i32
  }
  func.func @transform_11(%arg0: i32) -> (i32, i32) {
    %c0_i32 = arith.constant 0 : i32
    %c0_i32_0 = arith.constant 0 : i32
    %c0_i32_1 = arith.constant 0 : i32
    return %c0_i32, %c0_i32_0 : i32, i32
  }
  func.func @transform_12(%arg0: i32) -> (i32, i32) {
    %c0_i32 = arith.constant 0 : i32
    %c0_i32_0 = arith.constant 0 : i32
    %c0_i32_1 = arith.constant 0 : i32
    return %c0_i32, %c0_i32_0 : i32, i32
  }
  func.func @transform_13(%arg0: i32) -> (i32, i32) {
    %c0_i32 = arith.constant 0 : i32
    %c0_i32_0 = arith.constant 0 : i32
    return %c0_i32, %arg0 : i32, i32
  }
  func.func @transform_14(%arg0: i32) -> (i32, i32) {
    %c0_i32 = arith.constant 0 : i32
    %c0_i32_0 = arith.constant 0 : i32
    return %c0_i32, %arg0 : i32, i32
  }
  func.func @transform_15(%arg0: i32) -> (i32, i32) {
    %c0_i32 = arith.constant 0 : i32
    %c0_i32_0 = arith.constant 0 : i32
    return %c0_i32, %arg0 : i32, i32
  }
  func.func @transform_16(%arg0: i32) -> (i32, i32) {
    %c0_i32 = arith.constant 0 : i32
    %c0_i32_0 = arith.constant 0 : i32
    %c0_i32_1 = arith.constant 0 : i32
    return %c0_i32, %c0_i32_0 : i32, i32
  }
  func.func @transform_17(%arg0: i32) -> (i32, i32) {
    %c0_i32 = arith.constant 0 : i32
    %c0_i32_0 = arith.constant 0 : i32
    return %c0_i32, %arg0 : i32, i32
  }
}

</mosaic_0001>

<bundles_post_ra>
// kernel: tpu_custom_call.1
= control target key start
LH: loop header
LB: loop body
LE: loop exit
PB: predicated region body
PF: predicated region fallthrough
CT: control target
= control target key end

     0   :  { %s7903_s0 = inlined_call_operand.hbm [shape: bf16[2,4864], index: 0, kind: input, shape index: {}]   ;;  %s7904_s1 = inlined_call_operand.hbm [shape: f32[2,32], index: 1, kind: input, shape index: {}]   ;;  %s7905_s2 = inlined_call_operand.hbm [shape: s8[4864,256], index: 2, kind: input, shape index: {}]   ;;  %s7906_s3 = inlined_call_operand.hbm [shape: f32[1,256], index: 3, kind: input, shape index: {}]   ;;  %s7907_s4 = inlined_call_operand.hbm [shape: f32[1,256], index: 4, kind: input, shape index: {}]   ;;  %s7908_s5 = inlined_call_operand.hbm [shape: bf16[256,128], index: 5, kind: input, shape index: {}]   ;;  %s7909_s6 = inlined_call_operand.hbm [shape: f32[1,128], index: 6, kind: input, shape index: {}]   ;;  %s7910_s7 = inlined_call_operand.vmem [shape: bf16[128,64], index: 7, kind: input, shape index: {}]   ;;  %s7911_s8 = inlined_call_operand.hbm [shape: f32[1,64], index: 8, kind: input, shape index: {}]   ;;  %s7912_s9 = inlined_call_operand.hbm [shape: bf16[32,128], index: 9, kind: input, shape index: {}]   ;;  %s7913_s10 = inlined_call_operand.hbm [shape: f32[1,128], index: 10, kind: input, shape index: {}]   ;;  %s7914_s11 = inlined_call_operand.hbm [shape: bf16[128,256], index: 11, kind: input, shape index: {}]   ;;  %s7915_s12 = inlined_call_operand.hbm [shape: f32[1,256], index: 12, kind: input, shape index: {}]   ;;  %s7916_s13 = inlined_call_operand.hbm [shape: s8[256,9600], index: 13, kind: input, shape index: {}]   ;;  %s7917_s14 = inlined_call_operand.hbm [shape: f32[1,9600], index: 14, kind: input, shape index: {}]   ;;  %s7918_s15 = inlined_call_operand.hbm [shape: f32[1,9600], index: 15, kind: input, shape index: {}]   ;;  %s7919_s16 = inlined_call_operand.hbm [shape: f32[2,128], index: 16, kind: output, shape index: {0}]   ;;  %s7920_s17 = inlined_call_operand.hbm [shape: bf16[2,9600], index: 17, kind: output, shape index: {1}]  }
   0x1   :  { %7964 = sst [smem:[#allocation48_spill]] %s7903_s0 }
   0x2   :  { %7965 = sst [smem:[#allocation49_spill]] %s7904_s1 }
   0x3   :  { %7966 = sst [smem:[#allocation50_spill]] %s7905_s2 }
   0x4   :  { %7967 = sst [smem:[#allocation51_spill]] %s7906_s3 }
   0x5   :  { %7968 = sst [smem:[#allocation52_spill]] %s7907_s4 }
   0x6   :  { %7969 = sst [smem:[#allocation53_spill]] %s7908_s5 }
   0x7   :  { %7970 = sst [smem:[#allocation54_spill]] %s7909_s6 }
   0x8   :  { %7971 = sst [smem:[#allocation55_spill]] %s7910_s7 }
   0x9   :  { %7972 = sst [smem:[#allocation56_spill]] %s7911_s8 }
   0xa   :  { %7973 = sst [smem:[#allocation57_spill]] %s7912_s9 }
   0xb   :  { %7974 = sst [smem:[#allocation58_spill]] %s7913_s10 }
   0xc   :  { %7975 = sst [smem:[#allocation59_spill]] %s7914_s11 }
   0xd   :  { %7976 = sst [smem:[#allocation60_spill]] %s7915_s12 }
   0xe   :  { %7977 = sst [smem:[#allocation61_spill]] %s7916_s13 }
   0xf   :  { %7978 = sst [smem:[#allocation62_spill]] %s7918_s15 }
  0x10   :  { %7979 = sst [smem:[#allocation63_spill]] %s7919_s16 }
  0x11   :  { %7980 = sst [smem:[#allocation64_spill]] %s7920_s17 }
  0x12   :  { %23 = vsyncpa [#allocation4], 0 }
  0x13   :  { %24 = vsyncpa [#allocation7], 0 }
  0x14   :  { %25 = vsyncpa [#allocation10], 0 }
  0x15   :  { %26 = vsyncpa [#allocation13], 0 }
  0x16   :  { %27 = vsyncpa [#allocation16], 0 }
  0x17   :  { %28 = vsyncpa [#allocation19], 0 }
  0x18   :  { %29 = vsyncpa [#allocation22], 0 }
  0x19   :  { %30 = vsyncpa [#allocation5], 0 }
  0x1a   :  { %31 = vsyncpa [#allocation28], 0 }
  0x1b   :  { %33 = vsyncpa [#allocation28 + $0x1], 0  ;;  %s6651_s24 = smov 0   ;;  %s6653_s25 = smov 0  }
  0x1c   :  { %s6655_s26 = smov 0   ;;  %s6657_s27 = smov 0  }
  0x1d LB: > { %7981 = sst [smem:[#allocation39_spill]] %s6514_s24  ;;  %s6528_s28 = smov [#allocation3]   ;;  %s6526_s27 = sphi %s6657_s27, %s8059_s27   ;;  %s6522_s26 = sphi %s6655_s26, %s8063_s26   ;;  %s6518_s25 = sphi %s6653_s25, %s8062_s25   ;;  %s6514_s24 = sphi %s6651_s24, %s8060_s24  }
  0x1e   : > { %7982 = sst [smem:[#allocation40_spill]] %s6518_s25  ;;  %s455_s29 = sshll.u32 %s6528_s28, 4  ;;  %s456_s29 = int_to_ptr.vmem [resolvable:$true] %s455_s29 }
  0x1f   : > { %s6672_s0 = sadd.s32 4294967295, %s6526_s27   ;;  %p5406_p0 = scmp.ge.s32.totalorder %s6526_s27, 1 }
  0x20   : > { %7983 = sst [smem:[#allocation41_spill]] %s6672_s0  ;;  %p7928_p1 = scmp.eq.s32.totalorder %s6672_s0, 0 }
  0x21   : > { %p442_p2 = scmp.lt.s32.totalorder %s6526_s27, 4  ;;  %s5405_s19 = sadd.s32 4294967294, %s6526_s27  }
  0x22   : > { %s6692_s1 = sadd.s32 1, %s6526_s27   ;;  %s7988_s23 = sld [smem:[#allocation48_spill]] }
  0x23   : > { %p6678_p4 = pnand %p5406_p0, %p442_p2  ;;  %7987 = sst [smem:[#allocation43_spill]] %s6692_s1 }
  0x24   : > { %s316_s20 = ssub.s32 %s6526_s27, %s6692_s1 }
  0x25   : > { %s7984_s30 = scalar_select %p6678_p4, 1, 0 }
  0x26   : > { %p5729_p5 = pneg %p6678_p4 }
  0x27   : > { %7985 = sst [smem:[#allocation42_spill]] %s7984_s30 }
  0x28   : > { %p6686_p6 = pnand %p5729_p5, %p7928_p1  ;;  %s5976_s28 = scalar_lea.hbm %s7988_s23, 608 }
  0x29   : > { %p5977_p7 = scmp.ne.s32.totalorder %s7988_s23, %s5976_s28  ;;  %p5983_p11 = scmp.lt.u32.totalorder %s5976_s28, %s7988_s23 }
  0x2a   : > { %s7986_s18 = scalar_select %p6686_p6, 1, 0 }
  0x2b   : > { %p6704_p8 = pneg %p6686_p6 }
  0x2d   : > { %s7989_s7 = scalar_select %p6704_p8, 1, 0 }
  0x2e   : > { %p5979_p9 = pnand %p6704_p8, %p5977_p7 }
  0x30   : > { %p5980_p10 = pneg %p5979_p9 }
  0x32   : > { %p5985_p12 = pnand %p5983_p11, %p5980_p10 }
  0x34   : > { %5988 = shalt.err (!%p5985_p12)
}
  0x35   : > { %s5989_s21 = scalar_lea.vmem %s456_s29, 608  ;;  %p5997_p5 = scmp.lt.s32.totalorder %s456_s29, %s456_s29 }
  0x36   : > { %p5990_p13 = scmp.ne.s32.totalorder %s456_s29, %s5989_s21  ;;  %p5998_p3 = scmp.lt.s32.totalorder %s5989_s21, %s5989_s21 }
  0x38   : > { %p5992_p0 = pnand %p5990_p13, %p6704_p8  ;;  %p5999_p1 = por %p5998_p3, %p5997_p5 }
  0x3a   : > { %p5993_p2 = pneg %p5992_p0 }
  0x3c   : > { %p6000_p4 = pnand %p5999_p1, %p5993_p2 }
  0x3e   : > { %6003 = shalt.err (!%p6000_p4)
}
  0x3f   : > { %5732 = dma.hbm_to_vmem [thread:$0]  (!%p6686_p6), %s7988_s23, 608, %s456_s29, [#allocation4]  }
  0x40   : > { %p317_p1 = scmp.eq.s32.totalorder %s316_s20, 0  ;;  %s319_s12 = sadd.s32 1, %s6522_s26 }
  0x41   : > { %p326_p3 = scmp.ne.s32.totalorder %s6522_s26, %s6518_s25  ;;  %p327_p4 = scmp.eq.s32.totalorder %s6526_s27, 0 }
  0x42   : > { %s6725_s30 = scalar_select %p317_p1, %s6522_s26, %s319_s12  }
  0x43   : > { %p328_p7 = por %p327_p4, %p326_p3  ;;  %p332_p9 = scmp.ne.s32.totalorder %s6518_s25, %s6514_s24 }
  0x44   : > { %7990 = sst [smem:[#allocation44_spill]] %s6725_s30  ;;  %p7938_p10 = scmp.eq.s32.totalorder %s6672_s0, 2 }
  0x45   : > { %p435_p11 = scmp.eq.s32.totalorder %s5405_s19, 2  ;;  %p7991_p12 = scmp.eq.s32.totalorder %s6672_s0, 0 }
  0x46   : > { %p5792_p0 = scmp.lt.s32.totalorder %s6526_s27, 3  ;;  %p6739_p2 = por %p7938_p10, %p326_p3 }
  0x47   : > { %p6732_p13 = por %p7991_p12, %p332_p9  ;;  %p6743_p5 = por %p435_p11, %p332_p9 }
  0x48   : > { %s7994_s29 = scalar_select %p6739_p2, 1, 0 }
  0x49   : > { %s7992_s22 = scalar_select %p6732_p13, 1, 0 }
  0x4a   : > { %7995 = sst [smem:[#allocation46_spill]] %s7994_s29  ;;  %s598_s28 = sand.u32 1, %s6526_s27  }
  0x4b   : > { %7993 = sst [smem:[#allocation45_spill]] %s7992_s22  ;;  %s7934_s21 = sand.u32 1, %s6522_s26  }
  0x4c   : > { %s7996_s20 = scalar_select %p6743_p5, 1, 0 }
  0x4d   : > { %s5664_s16 = smul.u32 1600, %s7934_s21  ;;  %p6752_p1 = pnand %p5792_p0, %p328_p7 }
  0x4e   : > { %7997 = sst [smem:[#allocation47_spill]] %s7996_s20  ;;  %s5506_s19 = smul.u32 3200, %s6526_s27 }
  0x4f   : > { %s7998_s17 = scalar_select %p6752_p1, 1, 0 }
  0x50   : > { %s7999_s13 = sld [smem:[#allocation61_spill]]  ;;  %s602_s1 = scalar_lea.vmem [#allocation23], %s5664_s16 }
  0x51   : > { %s609_s20 = sshll.u32 %s602_s1, 4  ;;  %s6763_s21 = scalar_lea.sflag [#allocation4], %s598_s28  ;;  %s6761_s20 = int_to_ptr.vmem [resolvable:$true] %s609_s20 }
  0x52   : > { %p6769_p4 = pneg %p6752_p1 }
  0x54   : > { %s8000_s29 = scalar_select %p6769_p4, 1, 0 }
  0x56   : > { %s6759_s30 = scalar_lea.hbm %s7999_s13, %s5506_s19  ;;  %s6009_s16 = scalar_lea.hbm %s7999_s13, 76800 }
  0x57   : > { %s6004_s24 = scalar_lea.hbm %s6759_s30, 25600  ;;  %p6010_p11 = scmp.lt.u32.totalorder %s6759_s30, %s7999_s13 }
  0x58   : > { %p6005_p3 = scmp.ne.s32.totalorder %s6759_s30, %s6004_s24  ;;  %p6011_p12 = scmp.lt.u32.totalorder %s6009_s16, %s6004_s24 }
  0x59   : > { %p6013_p10 = scmp.lt.u32.totalorder %s6004_s24, %s6759_s30 }
  0x5a   : > { %p6007_p7 = pnand %p6769_p4, %p6005_p3  ;;  %p6012_p0 = por %p6011_p12, %p6010_p11 }
  0x5c   : > { %p6008_p9 = pneg %p6007_p7  ;;  %p6014_p5 = por %p6013_p10, %p6012_p0 }
  0x5e   : > { %p6015_p2 = pnand %p6014_p5, %p6008_p9 }
  0x60   : > { %6018 = shalt.err (!%p6015_p2)
}
  0x61   : > { %s6019_s28 = scalar_lea.vmem %s6761_s20, 25600  ;;  %s6529_s23 = smov [#allocation23]  }
  0x62   : > { %p6020_p3 = scmp.ne.s32.totalorder %s6761_s20, %s6019_s28  ;;  %s6024_s19 = sshll.u32 %s6529_s23, 4  ;;  %s6025_s19 = int_to_ptr.vmem [resolvable:$false] %s6024_s19 }
  0x63   : > { %s6026_s1 = scalar_lea.vmem %s6025_s19, 51200  ;;  %p6027_p6 = scmp.lt.s32.totalorder %s6761_s20, %s6025_s19 }
  0x64   : > { %p6022_p7 = pnand %p6020_p3, %p6769_p4  ;;  %p6028_p8 = scmp.lt.s32.totalorder %s6026_s1, %s6019_s28 }
  0x66   : > { %p6023_p13 = pneg %p6022_p7  ;;  %p6029_p11 = por %p6028_p8, %p6027_p6 }
  0x68   : > { %p6030_p12 = pnand %p6029_p11, %p6023_p13 }
  0x6a   : > { %6033 = shalt.err (!%p6030_p12)
}
  0x6b   : > { %s6530_s24 = smov 9600   ;;  %s6531_s16 = smov 3200  }
  0x6c   : > { %s6532_s12 = smov 200   ;;  %s6533_s13 = smov [#allocation6]  }
  0x6d   : > { %5769 = dma.hbm_to_vmem [thread:$0]  (!%p6752_p1), %s6759_s30, 25600, %s6761_s20, %s6763_s21, %s6530_s24, %s6531_s16, %s6532_s12  }
  0x6e   : > { %s466_s22 = sshll.u32 %s6533_s13, 4  ;;  %s6534_s23 = smov [#allocation9]   ;;  %s467_s22 = int_to_ptr.vmem [resolvable:$true] %s466_s22 }
  0x6f   : > { %s490_s25 = sshll.u32 %s6534_s23, 4  ;;  %s8001_s1 = sld [smem:[#allocation49_spill]]  ;;  %s6793_s25 = int_to_ptr.vmem [resolvable:$true] %s490_s25 }
  0x70   : > { %p8002_p8 = scmp.ne.s32.totalorder %s7989_s7, 0 }
  0x75   : > { %s6034_s0 = scalar_lea.hbm %s8001_s1, 32 }
  0x76   : > { %p6035_p6 = scmp.ne.s32.totalorder %s8001_s1, %s6034_s0  ;;  %p6041_p2 = scmp.lt.u32.totalorder %s6034_s0, %s8001_s1 }
  0x78   : > { %p6037_p10 = pnand %p6035_p6, %p8002_p8 }
  0x7a   : > { %p6038_p13 = pneg %p6037_p10 }
  0x7c   : > { %p6043_p5 = pnand %p6041_p2, %p6038_p13 }
  0x7e   : > { %6046 = shalt.err (!%p6043_p5)
}
  0x7f   : > { %s6047_s13 = scalar_lea.vmem %s467_s22, 32  ;;  %p6055_p7 = scmp.lt.s32.totalorder %s467_s22, %s467_s22 }
  0x80   : > { %p6048_p9 = scmp.ne.s32.totalorder %s467_s22, %s6047_s13  ;;  %p6056_p11 = scmp.lt.s32.totalorder %s6047_s13, %s6047_s13 }
  0x82   : > { %p6050_p0 = pnand %p6048_p9, %p8002_p8  ;;  %p6057_p12 = por %p6056_p11, %p6055_p7 }
  0x84   : > { %p6051_p3 = pneg %p6050_p0 }
  0x86   : > { %p6058_p1 = pnand %p6057_p12, %p6051_p3 }
  0x88   : > { %6061 = shalt.err (!%p6058_p1)
}
  0x89   : > { %p8003_p6 = scmp.ne.s32.totalorder %s7986_s18, 0  ;;  %s8004_s3 = sld [smem:[#allocation51_spill]] }
  0x8b   : > { %5735 = dma.hbm_to_vmem [thread:$0]  (!%p8003_p6), %s8001_s1, 32, %s467_s22, [#allocation7]  }
  0x8f   : > { %s6062_s20 = scalar_lea.hbm %s8004_s3, 32 }
  0x90   : > { %p6063_p10 = scmp.ne.s32.totalorder %s8004_s3, %s6062_s20  ;;  %p6069_p1 = scmp.lt.u32.totalorder %s6062_s20, %s8004_s3 }
  0x92   : > { %p6065_p13 = pnand %p6063_p10, %p8002_p8 }
  0x94   : > { %p6066_p2 = pneg %p6065_p13 }
  0x96   : > { %p6071_p5 = pnand %p6069_p1, %p6066_p2 }
  0x98   : > { %6074 = shalt.err (!%p6071_p5)
}
  0x99   : > { %s6075_s22 = scalar_lea.vmem %s6793_s25, 32  ;;  %p6083_p7 = scmp.lt.s32.totalorder %s6793_s25, %s6793_s25 }
  0x9a   : > { %p6076_p9 = scmp.ne.s32.totalorder %s6793_s25, %s6075_s22  ;;  %p6084_p11 = scmp.lt.s32.totalorder %s6075_s22, %s6075_s22 }
  0x9c   : > { %p6078_p0 = pnand %p6076_p9, %p8002_p8  ;;  %p6085_p12 = por %p6084_p11, %p6083_p7 }
  0x9e   : > { %p6079_p3 = pneg %p6078_p0 }
  0xa0   : > { %p6086_p10 = pnand %p6085_p12, %p6079_p3 }
  0xa2   : > { %6089 = shalt.err (!%p6086_p10)
}
  0xa3   : > { %5741 = dma.hbm_to_vmem [thread:$0]  (!%p8003_p6), %s8004_s3, 32, %s6793_s25, [#allocation10]  }
  0xa4   : > { %s6535_s30 = smov [#allocation12]   ;;  %s8005_s5 = sld [smem:[#allocation53_spill]] }
  0xa5   : > { %s511_s13 = sshll.u32 %s6535_s30, 4  ;;  %s512_s13 = int_to_ptr.vmem [resolvable:$true] %s511_s13 }
  0xaa   : > { %s6090_s9 = scalar_lea.hbm %s8005_s5, 2048 }
  0xab   : > { %p6091_p13 = scmp.ne.s32.totalorder %s8005_s5, %s6090_s9  ;;  %p6097_p5 = scmp.lt.u32.totalorder %s6090_s9, %s8005_s5 }
  0xad   : > { %p6093_p2 = pnand %p6091_p13, %p8002_p8 }
  0xaf   : > { %p6094_p1 = pneg %p6093_p2 }
  0xb1   : > { %p6099_p9 = pnand %p6097_p5, %p6094_p1 }
  0xb3   : > { %6102 = shalt.err (!%p6099_p9)
}
  0xb4   : > { %s6103_s25 = scalar_lea.vmem %s512_s13, 2048  ;;  %p6111_p11 = scmp.lt.s32.totalorder %s512_s13, %s512_s13 }
  0xb5   : > { %p6104_p0 = scmp.ne.s32.totalorder %s512_s13, %s6103_s25  ;;  %p6112_p12 = scmp.lt.s32.totalorder %s6103_s25, %s6103_s25 }
  0xb7   : > { %p6106_p3 = pnand %p6104_p0, %p8002_p8  ;;  %p6113_p10 = por %p6112_p12, %p6111_p11 }
  0xb9   : > { %p6107_p7 = pneg %p6106_p3 }
  0xbb   : > { %p6114_p4 = pnand %p6113_p10, %p6107_p7 }
  0xbd   : > { %6117 = shalt.err (!%p6114_p4)
}
  0xbe   : > { %s7962_s12 = smov 64   ;;  %s6537_s23 = smov 4  }
  0xbf   : > { %5747 = dma.hbm_to_vmem [thread:$0]  (!%p8003_p6), %s8005_s5, 2048, %s512_s13, [#allocation13], %s7962_s12, %s7962_s12, %s6537_s23  }
  0xc0   : > { %s6538_s19 = smov [#allocation15]   ;;  %s6539_s11 = smov [#allocation18]  }
  0xc1   : > { %s539_s30 = sshll.u32 %s6538_s19, 4  ;;  %s563_s15 = sshll.u32 %s6539_s11, 4  ;;  %s540_s30 = int_to_ptr.vmem [resolvable:$true] %s539_s30  ;;  %s564_s15 = int_to_ptr.vmem [resolvable:$true] %s563_s15 }
  0xc2   : > { %s8006_s8 = sld [smem:[#allocation56_spill]] }
  0xc8   : > { %s6118_s20 = scalar_lea.hbm %s8006_s8, 16 }
  0xc9   : > { %p6119_p4 = scmp.ne.s32.totalorder %s8006_s8, %s6118_s20  ;;  %p6125_p1 = scmp.lt.u32.totalorder %s6118_s20, %s8006_s8 }
  0xcb   : > { %p6121_p13 = pnand %p6119_p4, %p8002_p8 }
  0xcd   : > { %p6122_p2 = pneg %p6121_p13 }
  0xcf   : > { %p6127_p5 = pnand %p6125_p1, %p6122_p2 }
  0xd1   : > { %6130 = shalt.err (!%p6127_p5)
}
  0xd2   : > { %s6131_s13 = scalar_lea.vmem %s540_s30, 16  ;;  %s6138_s22 = scalar_lea.vmem %s540_s30, 32 }
  0xd3   : > { %p6132_p9 = scmp.ne.s32.totalorder %s540_s30, %s6131_s13  ;;  %p6139_p7 = scmp.lt.s32.totalorder %s540_s30, %s540_s30 }
  0xd4   : > { %p6140_p11 = scmp.lt.s32.totalorder %s6138_s22, %s6131_s13 }
  0xd5   : > { %p6134_p0 = pnand %p6132_p9, %p8002_p8 }
  0xd6   : > { %p6141_p12 = por %p6140_p11, %p6139_p7 }
  0xd7   : > { %p6135_p3 = pneg %p6134_p0 }
  0xd9   : > { %p6142_p10 = pnand %p6141_p12, %p6135_p3 }
  0xdb   : > { %6145 = shalt.err (!%p6142_p10)
}
  0xdc   : > { %5753 = dma.hbm_to_vmem [thread:$0]  (!%p8003_p6), %s8006_s8, 16, %s540_s30, [#allocation16]  }
  0xdd   : > { %s8007_s1 = sand.u32 1, %s6522_s26   ;;  %s8008_s10 = sld [smem:[#allocation58_spill]] }
  0xde   : > { %s6877_s11 = smul.u32 25, %s8007_s1 }
  0xe3   : > { %s6146_s20 = scalar_lea.hbm %s8008_s10, 16 }
  0xe4   : > { %p6147_p4 = scmp.ne.s32.totalorder %s8008_s10, %s6146_s20  ;;  %p6153_p1 = scmp.lt.u32.totalorder %s6146_s20, %s8008_s10 }
  0xe6   : > { %p6149_p13 = pnand %p6147_p4, %p8002_p8 }
  0xe8   : > { %p6150_p2 = pneg %p6149_p13 }
  0xea   : > { %p6155_p5 = pnand %p6153_p1, %p6150_p2 }
  0xec   : > { %6158 = shalt.err (!%p6155_p5)
}
  0xed   : > { %s6159_s30 = scalar_lea.vmem %s564_s15, 16  ;;  %s6166_s22 = scalar_lea.vmem %s564_s15, 32 }
  0xee   : > { %p6160_p9 = scmp.ne.s32.totalorder %s564_s15, %s6159_s30  ;;  %p6167_p7 = scmp.lt.s32.totalorder %s564_s15, %s564_s15 }
  0xef   : > { %p6168_p11 = scmp.lt.s32.totalorder %s6166_s22, %s6159_s30 }
  0xf0   : > { %p6162_p0 = pnand %p6160_p9, %p8002_p8 }
  0xf1   : > { %p6169_p12 = por %p6168_p11, %p6167_p7 }
  0xf2   : > { %p6163_p3 = pneg %p6162_p0 }
  0xf4   : > { %p6170_p10 = pnand %p6169_p12, %p6163_p3 }
  0xf6   : > { %6173 = shalt.err (!%p6170_p10)
}
  0xf7   : > { %5759 = dma.hbm_to_vmem [thread:$0]  (!%p8003_p6), %s8008_s10, 16, %s564_s15, [#allocation19]  }
  0xf8   : > { %s7961_s1 = smul.u32 400, %s6526_s27  ;;  %s623_s9 = scalar_lea.vmem [#allocation24], %s6877_s11 }
  0xf9   : > { %s631_s0 = sshll.u32 %s623_s9, 4  ;;  %p8009_p13 = scmp.ne.s32.totalorder %s8000_s29, 0  ;;  %s632_s0 = int_to_ptr.vmem [resolvable:$true] %s631_s0 }
  0xfa   : > { %s629_s16 = scalar_lea.hbm %s7917_s14, %s7961_s1  ;;  %s6179_s22 = scalar_lea.hbm %s7917_s14, 1200 }
  0xfb   : > { %s6174_s25 = scalar_lea.hbm %s629_s16, 400  ;;  %p6180_p5 = scmp.lt.u32.totalorder %s629_s16, %s7917_s14 }
  0xfc   : > { %p6175_p4 = scmp.ne.s32.totalorder %s629_s16, %s6174_s25  ;;  %p6181_p9 = scmp.lt.u32.totalorder %s6179_s22, %s6174_s25 }
  0xfd   : > { %p6183_p3 = scmp.lt.u32.totalorder %s6174_s25, %s629_s16 }
  0xfe   : > { %p6177_p2 = pnand %p6175_p4, %p8009_p13  ;;  %p6182_p0 = por %p6181_p9, %p6180_p5 }
 0x100   : > { %p6178_p1 = pneg %p6177_p2  ;;  %p6184_p7 = por %p6183_p3, %p6182_p0 }
 0x102   : > { %p6185_p11 = pnand %p6184_p7, %p6178_p1 }
 0x104   : > { %6188 = shalt.err (!%p6185_p11)
}
 0x105   : > { %s6189_s19 = scalar_lea.vmem %s632_s0, 400  ;;  %s6540_s9 = smov [#allocation24]  }
 0x106   : > { %p6190_p12 = scmp.ne.s32.totalorder %s632_s0, %s6189_s19  ;;  %s6194_s20 = sshll.u32 %s6540_s9, 4  ;;  %s6195_s20 = int_to_ptr.vmem [resolvable:$false] %s6194_s20 }
 0x107   : > { %s6196_s24 = scalar_lea.vmem %s6195_s20, 800  ;;  %p6197_p2 = scmp.lt.s32.totalorder %s632_s0, %s6195_s20 }
 0x108   : > { %p6192_p10 = pnand %p6190_p12, %p8009_p13  ;;  %p6198_p6 = scmp.lt.s32.totalorder %s6196_s24, %s6189_s19 }
 0x10a   : > { %p6193_p4 = pneg %p6192_p10  ;;  %p6199_p8 = por %p6198_p6, %p6197_p2 }
 0x10c   : > { %p6200_p5 = pnand %p6199_p8, %p6193_p4 }
 0x10e   : > { %6203 = shalt.err (!%p6200_p5)
}
 0x10f   : > { %p8010_p9 = scmp.ne.s32.totalorder %s7998_s17, 0  ;;  %s6541_s25 = smov [#allocation8]  }
 0x110   : > { %s476_s13 = sshll.u32 %s6541_s25, 4  ;;  %s8011_s2 = sld [smem:[#allocation50_spill]]  ;;  %s477_s13 = int_to_ptr.vmem [resolvable:$true] %s476_s13 }
 0x111   : > { %5772 = dma.hbm_to_vmem [thread:$0]  (!%p8010_p9), %s629_s16, 400, %s632_s0, %s6763_s21  }
 0x112   : > { %p8012_p0 = scmp.ne.s32.totalorder %s7989_s7, 0 }
 0x116   : > { %s6204_s28 = scalar_lea.hbm %s8011_s2, 38912 }
 0x117   : > { %p6205_p1 = scmp.ne.s32.totalorder %s8011_s2, %s6204_s28  ;;  %p6211_p3 = scmp.lt.u32.totalorder %s6204_s28, %s8011_s2 }
 0x119   : > { %p6207_p6 = pnand %p6205_p1, %p8012_p0 }
 0x11b   : > { %p6208_p8 = pneg %p6207_p6 }
 0x11d   : > { %p6213_p7 = pnand %p6211_p3, %p6208_p8 }
 0x11f   : > { %6216 = shalt.err (!%p6213_p7)
}
 0x120   : > { %s6217_s0 = scalar_lea.vmem %s477_s13, 38912  ;;  %p6225_p4 = scmp.lt.s32.totalorder %s477_s13, %s477_s13 }
 0x121   : > { %p6218_p11 = scmp.ne.s32.totalorder %s477_s13, %s6217_s0  ;;  %p6226_p2 = scmp.lt.s32.totalorder %s6217_s0, %s6217_s0 }
 0x123   : > { %p6220_p12 = pnand %p6218_p11, %p8012_p0  ;;  %p6227_p5 = por %p6226_p2, %p6225_p4 }
 0x125   : > { %p6221_p10 = pneg %p6220_p12 }
 0x127   : > { %p6228_p9 = pnand %p6227_p5, %p6221_p10 }
 0x129   : > { %6231 = shalt.err (!%p6228_p9)
}
 0x12a   : > { %s6542_s16 = smov 256   ;;  %s6543_s24 = smov 16  }
 0x12b   : > { %p8013_p1 = scmp.ne.s32.totalorder %s7986_s18, 0  ;;  %s6544_s22 = smov [#allocation11]  }
 0x12c   : > { %s501_s28 = sshll.u32 %s6544_s22, 4  ;;  %s6545_s15 = smov [#allocation14]   ;;  %s502_s28 = int_to_ptr.vmem [resolvable:$true] %s501_s28 }
 0x12d   : > { %5738 = dma.hbm_to_vmem [thread:$0]  (!%p8013_p1), %s8011_s2, 38912, %s477_s13, [#allocation7], %s6542_s16, %s6542_s16, %s6543_s24  }
 0x12e   : > { %s525_s9 = sshll.u32 %s6545_s15, 4  ;;  %s8014_s4 = sld [smem:[#allocation52_spill]]  ;;  %s6935_s9 = int_to_ptr.vmem [resolvable:$true] %s525_s9 }
 0x134   : > { %s6232_s0 = scalar_lea.hbm %s8014_s4, 32 }
 0x135   : > { %p6233_p9 = scmp.ne.s32.totalorder %s8014_s4, %s6232_s0  ;;  %p6239_p3 = scmp.lt.u32.totalorder %s6232_s0, %s8014_s4 }
 0x137   : > { %p6235_p6 = pnand %p6233_p9, %p8012_p0 }
 0x139   : > { %p6236_p8 = pneg %p6235_p6 }
 0x13b   : > { %p6241_p7 = pnand %p6239_p3, %p6236_p8 }
 0x13d   : > { %6244 = shalt.err (!%p6241_p7)
}
 0x13e   : > { %s6245_s16 = scalar_lea.vmem %s502_s28, 32  ;;  %p6253_p4 = scmp.lt.s32.totalorder %s502_s28, %s502_s28 }
 0x13f   : > { %p6246_p11 = scmp.ne.s32.totalorder %s502_s28, %s6245_s16  ;;  %p6254_p2 = scmp.lt.s32.totalorder %s6245_s16, %s6245_s16 }
 0x141   : > { %p6248_p12 = pnand %p6246_p11, %p8012_p0  ;;  %p6255_p5 = por %p6254_p2, %p6253_p4 }
 0x143   : > { %p6249_p10 = pneg %p6248_p12 }
 0x145   : > { %p6256_p13 = pnand %p6255_p5, %p6249_p10 }
 0x147   : > { %6259 = shalt.err (!%p6256_p13)
}
 0x148   : > { %5744 = dma.hbm_to_vmem [thread:$0]  (!%p8013_p1), %s8014_s4, 32, %s502_s28, [#allocation10]  }
 0x149   : > { %s8015_s6 = sld [smem:[#allocation54_spill]] }
 0x14f   : > { %s6260_s22 = scalar_lea.hbm %s8015_s6, 16 }
 0x150   : > { %p6261_p9 = scmp.ne.s32.totalorder %s8015_s6, %s6260_s22  ;;  %p6267_p13 = scmp.lt.u32.totalorder %s6260_s22, %s8015_s6 }
 0x152   : > { %p6263_p6 = pnand %p6261_p9, %p8012_p0 }
 0x154   : > { %p6264_p8 = pneg %p6263_p6 }
 0x156   : > { %p6269_p3 = pnand %p6267_p13, %p6264_p8 }
 0x158   : > { %6272 = shalt.err (!%p6269_p3)
}
 0x159   : > { %s6273_s28 = scalar_lea.vmem %s6935_s9, 16  ;;  %s6280_s25 = scalar_lea.vmem %s6935_s9, 32 }
 0x15a   : > { %p6274_p7 = scmp.ne.s32.totalorder %s6935_s9, %s6273_s28  ;;  %p6281_p10 = scmp.lt.s32.totalorder %s6935_s9, %s6935_s9 }
 0x15b   : > { %p6282_p4 = scmp.lt.s32.totalorder %s6280_s25, %s6273_s28 }
 0x15c   : > { %p6276_p11 = pnand %p6274_p7, %p8012_p0 }
 0x15d   : > { %p6283_p2 = por %p6282_p4, %p6281_p10 }
 0x15e   : > { %p6277_p12 = pneg %p6276_p11 }
 0x160   : > { %p6284_p5 = pnand %p6283_p2, %p6277_p12 }
 0x162   : > { %6287 = shalt.err (!%p6284_p5)
}
 0x163   : > { %5750 = dma.hbm_to_vmem [thread:$0]  (!%p8013_p1), %s8015_s6, 16, %s6935_s9, [#allocation13]  }
 0x164   : > { %s6546_s12 = smov [#allocation17]   ;;  %s6547_s24 = smov [#allocation20]  }
 0x165   : > { %s549_s1 = sshll.u32 %s6546_s12, 4  ;;  %s573_s30 = sshll.u32 %s6547_s24, 4  ;;  %s550_s1 = int_to_ptr.vmem [resolvable:$true] %s549_s1  ;;  %s6979_s30 = int_to_ptr.vmem [resolvable:$true] %s573_s30 }
 0x166   : > { %s8016_s19 = sld [smem:[#allocation57_spill]] }
 0x16c   : > { %s6288_s20 = scalar_lea.hbm %s8016_s19, 256 }
 0x16d   : > { %p6289_p9 = scmp.ne.s32.totalorder %s8016_s19, %s6288_s20  ;;  %p6295_p13 = scmp.lt.u32.totalorder %s6288_s20, %s8016_s19 }
 0x16f   : > { %p6291_p6 = pnand %p6289_p9, %p8012_p0 }
 0x171   : > { %p6292_p8 = pneg %p6291_p6 }
 0x173   : > { %p6297_p3 = pnand %p6295_p13, %p6292_p8 }
 0x175   : > { %6300 = shalt.err (!%p6297_p3)
}
 0x176   : > { %s6301_s13 = scalar_lea.vmem %s550_s1, 256  ;;  %p6309_p10 = scmp.lt.s32.totalorder %s550_s1, %s550_s1 }
 0x177   : > { %p6302_p7 = scmp.ne.s32.totalorder %s550_s1, %s6301_s13  ;;  %p6310_p4 = scmp.lt.s32.totalorder %s6301_s13, %s6301_s13 }
 0x179   : > { %p6304_p11 = pnand %p6302_p7, %p8012_p0  ;;  %p6311_p2 = por %p6310_p4, %p6309_p10 }
 0x17b   : > { %p6305_p12 = pneg %p6304_p11 }
 0x17d   : > { %p6312_p5 = pnand %p6311_p2, %p6305_p12 }
 0x17f   : > { %6315 = shalt.err (!%p6312_p5)
}
 0x180   : > { %s8017_s16 = smov 64   ;;  %s8018_s20 = sld [smem:[#allocation59_spill]] }
 0x181   : > { %5756 = dma.hbm_to_vmem [thread:$0]  (!%p8013_p1), %s8016_s19, 256, %s550_s1, [#allocation16], %s8017_s16, %s8017_s16, %s6537_s23  }
 0x186   : > { %s6316_s0 = scalar_lea.hbm %s8018_s20, 2048 }
 0x187   : > { %p6317_p9 = scmp.ne.s32.totalorder %s8018_s20, %s6316_s0  ;;  %p6323_p13 = scmp.lt.u32.totalorder %s6316_s0, %s8018_s20 }
 0x189   : > { %p6319_p6 = pnand %p6317_p9, %p8012_p0 }
 0x18b   : > { %p6320_p8 = pneg %p6319_p6 }
 0x18d   : > { %p6325_p3 = pnand %p6323_p13, %p6320_p8 }
 0x18f   : > { %6328 = shalt.err (!%p6325_p3)
}
 0x190   : > { %s6329_s23 = scalar_lea.vmem %s6979_s30, 2048  ;;  %p6337_p10 = scmp.lt.s32.totalorder %s6979_s30, %s6979_s30 }
 0x191   : > { %p6330_p7 = scmp.ne.s32.totalorder %s6979_s30, %s6329_s23  ;;  %p6338_p4 = scmp.lt.s32.totalorder %s6329_s23, %s6329_s23 }
 0x193   : > { %p6332_p11 = pnand %p6330_p7, %p8012_p0  ;;  %p6339_p2 = por %p6338_p4, %p6337_p10 }
 0x195   : > { %p6333_p12 = pneg %p6332_p11 }
 0x197   : > { %p6340_p5 = pnand %p6339_p2, %p6333_p12 }
 0x199   : > { %6343 = shalt.err (!%p6340_p5)
}
 0x19a   : > { %s6548_s1 = smov 128   ;;  %s6549_s16 = smov 8  }
 0x19b   : > { %5762 = dma.hbm_to_vmem [thread:$0]  (!%p8013_p1), %s8018_s20, 2048, %s6979_s30, [#allocation19], %s6548_s1, %s6548_s1, %s6549_s16  }
 0x19c   : > { %s6550_s22 = smov [#allocation21]   ;;  %s8019_s0 = smul.u32 400, %s6526_s27 }
 0x19d   : > { %s587_s15 = sshll.u32 %s6550_s22, 4  ;;  %s8020_s9 = sld [smem:[#allocation62_spill]]  ;;  %s588_s15 = int_to_ptr.vmem [resolvable:$true] %s587_s15 }
 0x19e   : > { %s642_s23 = scalar_lea.vmem [#allocation25], %s6877_s11  ;;  %s8021_s5 = sld [smem:[#allocation60_spill]] }
 0x19f   : > { %s650_s2 = sshll.u32 %s642_s23, 4  ;;  %s651_s2 = int_to_ptr.vmem [resolvable:$true] %s650_s2 }
 0x1a3   : > { %s7030_s13 = scalar_lea.hbm %s8020_s9, %s8019_s0 }
 0x1a4   : > { %s6344_s6 = scalar_lea.hbm %s8021_s5, 32 }
 0x1a5   : > { %p6345_p9 = scmp.ne.s32.totalorder %s8021_s5, %s6344_s6  ;;  %p6351_p13 = scmp.lt.u32.totalorder %s6344_s6, %s8021_s5 }
 0x1a7   : > { %p6347_p6 = pnand %p6345_p9, %p8012_p0 }
 0x1a9   : > { %p6348_p8 = pneg %p6347_p6 }
 0x1ab   : > { %p6353_p3 = pnand %p6351_p13, %p6348_p8 }
 0x1ad   : > { %6356 = shalt.err (!%p6353_p3)
}
 0x1ae   : > { %s6357_s16 = scalar_lea.vmem %s588_s15, 32  ;;  %p6365_p10 = scmp.lt.s32.totalorder %s588_s15, %s588_s15 }
 0x1af   : > { %p6358_p7 = scmp.ne.s32.totalorder %s588_s15, %s6357_s16  ;;  %p6366_p4 = scmp.lt.s32.totalorder %s6357_s16, %s6357_s16 }
 0x1b1   : > { %p6360_p11 = pnand %p6358_p7, %p8012_p0  ;;  %p6367_p2 = por %p6366_p4, %p6365_p10 }
 0x1b3   : > { %p6361_p12 = pneg %p6360_p11 }
 0x1b5   : > { %p6368_p5 = pnand %p6367_p2, %p6361_p12 }
 0x1b7   : > { %6371 = shalt.err (!%p6368_p5)
}
 0x1b8   : > { %5765 = dma.hbm_to_vmem [thread:$0]  (!%p8013_p1), %s8021_s5, 32, %s588_s15, [#allocation22]  }
 0x1b9   : > { %s6372_s6 = scalar_lea.hbm %s7030_s13, 400  ;;  %p8022_p9 = scmp.ne.s32.totalorder %s8000_s29, 0 }
 0x1ba   : > { %p6373_p0 = scmp.ne.s32.totalorder %s7030_s13, %s6372_s6  ;;  %s6377_s10 = scalar_lea.hbm %s8020_s9, 1200 }
 0x1bb   : > { %p6378_p13 = scmp.lt.u32.totalorder %s7030_s13, %s8020_s9  ;;  %p6379_p3 = scmp.lt.u32.totalorder %s6377_s10, %s6372_s6 }
 0x1bc   : > { %p6375_p6 = pnand %p6373_p0, %p8022_p9  ;;  %p6381_p11 = scmp.lt.u32.totalorder %s6372_s6, %s7030_s13 }
 0x1bd   : > { %p6380_p7 = por %p6379_p3, %p6378_p13 }
 0x1be   : > { %p6376_p8 = pneg %p6375_p6 }
 0x1bf   : > { %p6382_p12 = por %p6381_p11, %p6380_p7 }
 0x1c1   : > { %p6383_p10 = pnand %p6382_p12, %p6376_p8 }
 0x1c3   : > { %6386 = shalt.err (!%p6383_p10)
}
 0x1c4   : > { %s6387_s12 = scalar_lea.vmem %s651_s2, 400  ;;  %s6551_s24 = smov [#allocation25]  }
 0x1c5   : > { %p6388_p1 = scmp.ne.s32.totalorder %s651_s2, %s6387_s12  ;;  %s6392_s22 = sshll.u32 %s6551_s24, 4  ;;  %s6393_s22 = int_to_ptr.vmem [resolvable:$false] %s6392_s22 }
 0x1c6   : > { %s6394_s15 = scalar_lea.vmem %s6393_s22, 800  ;;  %p6395_p5 = scmp.lt.s32.totalorder %s651_s2, %s6393_s22 }
 0x1c7   : > { %p6390_p4 = pnand %p6388_p1, %p8022_p9  ;;  %p6396_p0 = scmp.lt.s32.totalorder %s6394_s15, %s6387_s12 }
 0x1c9   : > { %p6391_p2 = pneg %p6390_p4  ;;  %p6397_p6 = por %p6396_p0, %p6395_p5 }
 0x1cb   : > { %p6398_p3 = pnand %p6397_p6, %p6391_p2 }
 0x1cd   : > { %6401 = shalt.err (!%p6398_p3)
}
 0x1ce   : > { %p8023_p13 = scmp.ne.s32.totalorder %s7998_s17, 0  ;;  %s8024_s0 = sld [smem:[#allocation42_spill]] }
 0x1d0   : > { %5775 = dma.hbm_to_vmem [thread:$0]  (!%p8023_p13), %s7030_s13, 400, %s651_s2, %s6763_s21  }
 0x1d4   : > { %p8025_p8 = scmp.ne.s32.totalorder %s8024_s0, 0 }
 0x1d5   : > { %s8026_s29 = sld [smem:[#allocation41_spill]] (!%p8025_p8) }
 0x1d6   : > { %659 = sbr.rel (%p8025_p8) target bundleno = 3061 (0xbf5), region = 84 }
 0x1db   : > { %p8027_p9 = scmp.eq.s32.totalorder (!%p8025_p8), %s8026_s29, 0 }
 0x1dd   : > { %6473 = dma.done.wait (%p8027_p9), [#allocation4], 608   ;;  %p8028_p7 = pmov %p8027_p9 }
 0x1df   : > { %6475 = vsyncadd (%p8028_p7), [#allocation4], 4294966688  ;;  %p8029_p11 = pmov %p8028_p7 }
 0x1e0   : > { %p8030_p12 = pmov %p8028_p7 }
 0x1e1   : > { %6477 = dma.done.wait (%p8029_p11), [#allocation7], 38944  }
 0x1e2   : > { %6479 = vsyncadd (%p8030_p12), [#allocation7], 4294928352  ;;  %p8031_p10 = pmov %p8028_p7 }
 0x1e3   : > { %p8032_p1 = pmov %p8028_p7 }
 0x1e4   : > { %6481 = dma.done.wait (%p8031_p10), [#allocation10], 64  }
 0x1e5   : > { %6483 = vsyncadd (%p8032_p1), [#allocation10], 4294967232  ;;  %p8033_p4 = pmov %p8032_p1 }
 0x1e6   : > { %p8034_p2 = pmov %p8032_p1 }
 0x1e7   : > { %6485 = dma.done.wait (%p8033_p4), [#allocation13], 2064  }
 0x1e8   : > { %6487 = vsyncadd (%p8034_p2), [#allocation13], 4294965232  ;;  %p8035_p5 = pmov %p8032_p1 }
 0x1e9   : > { %p8036_p0 = pmov %p8032_p1 }
 0x1ea   : > { %6489 = dma.done.wait (%p8035_p5), [#allocation16], 272  }
 0x1eb   : > { %6491 = vsyncadd (%p8036_p0), [#allocation16], 4294967024  ;;  %p8037_p6 = pmov %p8036_p0 }
 0x1ec   : > { %p8038_p3 = pmov %p8036_p0 }
 0x1ed   : > { %6493 = dma.done.wait (%p8037_p6), [#allocation19], 2064  }
 0x1ee   : > { %6495 = vsyncadd (%p8038_p3), [#allocation19], 4294965232  ;;  %p8039_p13 = pmov %p8036_p0 }
 0x1ef   : > { %p8040_p8 = pmov %p8036_p0 }
 0x1f0   : > { %6497 = dma.done.wait (%p8039_p13), [#allocation22], 32  }
 0x1f1   : > { %6499 = vsyncadd (%p8040_p8), [#allocation22], 4294967264  ;;  %s8041_s2 = sld [smem:[#allocation40_spill]]  ;;  %s8042_s21 = sld [smem:[#allocation45_spill]] }
 0x1f2   : > { %s709_s17 = sand.u32 1, %s8026_s29  }
 0x1f3   : > { %s710_s13 = scalar_lea.sflag [#allocation4], %s709_s17 }
 0x1f7   : > { %s7101_s28 = sand.u32 1, %s8041_s2   ;;  %p8043_p9 = scmp.ne.s32.totalorder %s8042_s21, 0 }
 0x1f8   : > { %s5667_s25 = smul.u32 1600, %s7101_s28 }
 0x1fa   : > { %s7104_s23 = scalar_lea.vmem [#allocation23], %s5667_s25 }
 0x1fb   : > { %6501 = dma.done.wait (%p8043_p9), %s710_s13, 26400  }
 0x1fc   : > { %6503 = vsyncadd (%p8043_p9), %s710_s13, 4294940896  ;;  %s5668_s30 = smul.u32 25, %s7101_s28  ;;  %p8044_p7 = scmp.ne.s32.totalorder %s8026_s29, 0 }
 0x1fd   : > { %v807_v0 = vld [vmem:[#allocation8 + $0x8] sm:$0xff] (!%p8044_p7)  ;;  %v806_v2 = vld [vmem:[#allocation8] sm:$0xff] (!%p8044_p7)  ;;  %v809_v10 = vld [vmem:[#allocation8 + $0x18] sm:$0xff] (!%p8044_p7)  ;;  %v1727_v30 = vlaneseq (!%p8044_p7)  ;;  %v6552_v35 = vmov (!%p8044_p7), 1966171168   ;;  %s8045_s7 = sld [smem:[#allocation55_spill]] (!%p8044_p7) }
 0x1fe   : > { %s7111_s1 = scalar_lea.vmem [#allocation24], %s5668_s30  ;;  %s7113_s16 = scalar_lea.vmem [#allocation25], %s5668_s30  ;;  %v951_v1 = vld [vmem:[#allocation8 + $0x488] sm:$0xff] (!%p8044_p7)  ;;  %v1111_v3 = vunpack.c.l.s8.bf16 (!%p8044_p7), %v807_v0  ;;  %v1113_v4 = vunpack.c.h.s8.bf16 (!%p8044_p7), %v807_v0  ;;  %v950_v7 = vld [vmem:[#allocation8 + $0x480] sm:$0xff] (!%p8044_p7)  ;;  %v1110_v8 = vunpack.c.l.s8.bf16 (!%p8044_p7), %v806_v2  ;;  %v953_v11 = vld [vmem:[#allocation8 + $0x498] sm:$0xff] (!%p8044_p7)  ;;  %v1112_v12 = vunpack.c.h.s8.bf16 (!%p8044_p7), %v806_v2 }
 0x1ff   : > { %s7115_s3 = scalar_lea.vmem [#allocation27], %s5668_s30  ;;  %800 = sbr.rel (%p8044_p7) target bundleno = 2386 (0x952), region = 148  ;;  %v1399_v5 = vunpack.c.l.s8.bf16 (!%p8044_p7), %v951_v1  ;;  %v1401_v6 = vunpack.c.h.s8.bf16 (!%p8044_p7), %v951_v1  ;;  %v1398_v9 = vunpack.c.l.s8.bf16 (!%p8044_p7), %v950_v7  ;;  %v1400_v13 = vunpack.c.h.s8.bf16 (!%p8044_p7), %v950_v7  ;;  %v808_v16 = vld [vmem:[#allocation8 + $0x10] sm:$0xff] (!%p8044_p7)  ;;  %v811_v22 = vld [vmem:[#allocation8 + $0x28] sm:$0xff] (!%p8044_p7)  ;;  %v810_v28 = vld [vmem:[#allocation8 + $0x20] sm:$0xff] (!%p8044_p7) }
 0x200   : > { %2004 = vmatprep.subr.bf16.mxu1 (!%p8044_p7), %v1111_v3  ;;  %v1115_v14 = vunpack.c.l.s8.bf16 (!%p8044_p7), %v809_v10  ;;  %v1403_v15 = vunpack.c.l.s8.bf16 (!%p8044_p7), %v953_v11  ;;  %v952_v17 = vld [vmem:[#allocation8 + $0x490] sm:$0xff] (!%p8044_p7)  ;;  %v1114_v18 = vunpack.c.l.s8.bf16 (!%p8044_p7), %v808_v16  ;;  %v1117_v20 = vunpack.c.h.s8.bf16 (!%p8044_p7), %v809_v10  ;;  %v955_v23 = vld [vmem:[#allocation8 + $0x4a8] sm:$0xff] (!%p8044_p7)  ;;  %v954_v29 = vld [vmem:[#allocation8 + $0x4a0] sm:$0xff] (!%p8044_p7)  ;;  %s6555_s13 = smov (!%p8044_p7), 32   ;;  %s6556_s30 = smov (!%p8044_p7), 96  }
 0x201   : > { %2373 = vmatprep.subr.bf16.mxu0 (!%p8044_p7), %v1399_v5  ;;  %2005 = vmatpush1.bf16.msra.mxu1 (!%p8044_p7), %v1110_v8  ;;  %v1402_v19 = vunpack.c.l.s8.bf16 (!%p8044_p7), %v952_v17  ;;  %v1405_v21 = vunpack.c.h.s8.bf16 (!%p8044_p7), %v953_v11  ;;  %v1116_v24 = vunpack.c.h.s8.bf16 (!%p8044_p7), %v808_v16  ;;  %v1404_v25 = vunpack.c.h.s8.bf16 (!%p8044_p7), %v952_v17  ;;  %v813_v38 = vld [vmem:[#allocation8 + $0x38] sm:$0xff] (!%p8044_p7)  ;;  %v7123_v44 = vld [vmem:[#allocation3 + $0x10] sm:$0xff] (!%p8044_p7)  ;;  %v812_v47 = vld [vmem:[#allocation8 + $0x30] sm:$0xff] (!%p8044_p7) }
 0x202   : > { %2374 = vmatpush1.bf16.msra.mxu0 (!%p8044_p7), %v1398_v9  ;;  %2006 = vmatprep.subr.bf16.mxu1 (!%p8044_p7), %v1113_v4  ;;  %v1119_v26 = vunpack.c.l.s8.bf16 (!%p8044_p7), %v811_v22  ;;  %v1407_v27 = vunpack.c.l.s8.bf16 (!%p8044_p7), %v955_v23  ;;  %v1118_v31 = vunpack.c.l.s8.bf16 (!%p8044_p7), %v810_v28  ;;  %v1406_v32 = vunpack.c.l.s8.bf16 (!%p8044_p7), %v954_v29  ;;  %v957_v39 = vld [vmem:[#allocation8 + $0x4b8] sm:$0xff] (!%p8044_p7)  ;;  %v956_v48 = vld [vmem:[#allocation8 + $0x4b0] sm:$0xff] (!%p8044_p7)  ;;  %v815_v58 = vld [vmem:[#allocation8 + $0x48] sm:$0xff] (!%p8044_p7) }
 0x203   : > { %2375 = vmatprep.subr.bf16.mxu0 (!%p8044_p7), %v1401_v6  ;;  %v1121_v33 = vunpack.c.h.s8.bf16 (!%p8044_p7), %v811_v22  ;;  %v1409_v34 = vunpack.c.h.s8.bf16 (!%p8044_p7), %v955_v23  ;;  %v1725_v36 = vunpack.c.l.s4 (!%p8044_p7), %v6552_v35  ;;  %v7119_v37 = vshrl.u32 (!%p8044_p7), %v1727_v30, 7  ;;  %v7121_v43 = vld [vmem:[#allocation3] sm:$0xff] (!%p8044_p7)  ;;  %v959_v59 = vld [vmem:[#allocation8 + $0x4c8] sm:$0xff] (!%p8044_p7)  ;;  %v814_v60 = vld [vmem:[#allocation8 + $0x40] sm:$0xff] (!%p8044_p7) }
 0x204   : > { %v1120_v41 = vunpack.c.h.s8.bf16 (!%p8044_p7), %v810_v28  ;;  %v1408_v42 = vunpack.c.h.s8.bf16 (!%p8044_p7), %v954_v29  ;;  %v1123_v45 = vunpack.c.l.s8.bf16 (!%p8044_p7), %v813_v38  ;;  %v1411_v46 = vunpack.c.l.s8.bf16 (!%p8044_p7), %v957_v39  ;;  %v958_v61 = vld [vmem:[#allocation8 + $0x4c0] sm:$0xff] (!%p8044_p7)  ;;  %v817_v9 = vld [vmem:[#allocation8 + $0x58] sm:$0xff] (!%p8044_p7)  ;;  %v816_v11 = vld [vmem:[#allocation8 + $0x50] sm:$0xff] (!%p8044_p7) }
 0x205   : > { %2007 = vmatpush1.bf16.msra.mxu1 (!%p8044_p7), %v1112_v12  ;;  %v1726_v40 = vunpack.c.0.s8 (!%p8044_p7), %v1725_v36  ;;  %v1122_v52 = vunpack.c.l.s8.bf16 (!%p8044_p7), %v812_v47  ;;  %v1410_v53 = vunpack.c.l.s8.bf16 (!%p8044_p7), %v956_v48  ;;  %v1125_v54 = vunpack.c.h.s8.bf16 (!%p8044_p7), %v813_v38  ;;  %v961_v10 = vld [vmem:[#allocation8 + $0x4d8] sm:$0xff] (!%p8044_p7)  ;;  %v960_v12 = vld [vmem:[#allocation8 + $0x4d0] sm:$0xff] (!%p8044_p7)  ;;  %v963_v22 = vld [vmem:[#allocation8 + $0x4e8] sm:$0xff] (!%p8044_p7) }
 0x206   : > { %2376 = vmatpush1.bf16.msra.mxu0 %v1400_v13  ;;  %2008 = vmatprep.subr.bf16.mxu1 %v1115_v14  ;;  %v1413_v55 = vunpack.c.h.s8.bf16 %v957_v39  ;;  %v1124_v0 = vunpack.c.h.s8.bf16 %v812_v47  ;;  %v1412_v1 = vunpack.c.h.s8.bf16 %v956_v48  ;;  %v1127_v2 = vunpack.c.l.s8.bf16 %v815_v58  ;;  %v818_v23 = vld [vmem:[#allocation8 + $0x60] sm:$0xff]  ;;  %v820_v35 = vld [vmem:[#allocation8 + $0x70] sm:$0xff] }
 0x207   : > { %2377 = vmatprep.subr.bf16.mxu0 %v1403_v15  ;;  %v7126_v49 = vsub.s32 %v1726_v40, %v7119_v37  ;;  %v1415_v3 = vunpack.c.l.s8.bf16 %v959_v59  ;;  %v1126_v5 = vunpack.c.l.s8.bf16 %v814_v60  ;;  %v1414_v6 = vunpack.c.l.s8.bf16 %v958_v61  ;;  %v964_v36 = vld [vmem:[#allocation8 + $0x4f0] sm:$0xff] }
 0x208   : > { %v1129_v7 = vunpack.c.h.s8.bf16 %v815_v58  ;;  %v1417_v8 = vunpack.c.h.s8.bf16 %v959_v59  ;;  %v1128_v13 = vunpack.c.h.s8.bf16 %v814_v60  ;;  %v1416_v14 = vunpack.c.h.s8.bf16 %v958_v61  ;;  %v822_v59 = vld [vmem:[#allocation8 + $0x80] sm:$0xff] }
 0x209   : > { %2009 = vmatpush1.bf16.msra.mxu1 %v1114_v18  ;;  %v7130_v50 = vrot.slane %v7121_v43, %v7126_v49  ;;  %v7134_v51 = vrot.slane %v7123_v44, %v7126_v49  ;;  %v1131_v15 = vunpack.c.l.s8.bf16 %v817_v9  ;;  %v1419_v16 = vunpack.c.l.s8.bf16 %v961_v10  ;;  %v966_v60 = vld [vmem:[#allocation8 + $0x500] sm:$0xff] }
 0x20a   : > { %2378 = vmatpush1.bf16.msra.mxu0 %v1402_v19  ;;  %2010 = vmatprep.subr.bf16.mxu1 %v1117_v20  ;;  %v1130_v17 = vunpack.c.l.s8.bf16 %v816_v11  ;;  %v1418_v18 = vunpack.c.l.s8.bf16 %v960_v12  ;;  %v1133_v19 = vunpack.c.h.s8.bf16 %v817_v9  ;;  %v1421_v20 = vunpack.c.h.s8.bf16 %v961_v10 }
 0x20b   : > { %2379 = vmatprep.subr.bf16.mxu0 %v1405_v21  ;;  %v1738_v56 = vcombine.high %v7130_v50, %v7130_v50  ;;  %v1836_v57 = vcombine.high %v7134_v51, %v7134_v51  ;;  %v819_v21 = vld [vmem:[#allocation8 + $0x68] sm:$0xff]  ;;  %v1423_v28 = vunpack.c.l.s8.bf16 %v963_v22  ;;  %v1134_v29 = vunpack.c.l.s8.bf16 %v818_v23 }
 0x20c   : > { %v1136_v38 = vunpack.c.h.s8.bf16 %v818_v23  ;;  %v1432_v9 = vunpack.c.h.s8.bf16 %v966_v60  ;;  %v826_v23 = vld [vmem:[#allocation8 + $0xa0] sm:$0xff]  ;;  %vm6554_vm0 = vmmov 0   ;;  %vm3153_vm1 = vcmask 261120  }
 0x20d   : > { %2011 = vmatpush1.bf16.msra.mxu1 %v1116_v24  ;;  %v7141_v62 = vrot.slane %v1738_v56, %v7126_v49  ;;  %v7144_v63 = vrot.slane %v1836_v57, %v7126_v49  ;;  %v962_v24 = vld [vmem:[#allocation8 + $0x4e0] sm:$0xff]  ;;  %v1428_v56 = vunpack.c.h.s8.bf16 %v964_v36  ;;  %vm3124_vm2 = vcmask 523264  }
 0x20e   : > { %2380 = vmatpush1.bf16.msra.mxu0 %v1404_v25  ;;  %2012 = vmatprep.subr.bf16.mxu1 %v1119_v26  ;;  %v1132_v25 = vunpack.c.h.s8.bf16 %v816_v11  ;;  %v1420_v26 = vunpack.c.h.s8.bf16 %v960_v12  ;;  %v1422_v30 = vunpack.c.l.s8.bf16 %v962_v24  ;;  %v1424_v39 = vunpack.c.h.s8.bf16 %v962_v24  ;;  %v824_v12 = vld [vmem:[#allocation8 + $0x90] sm:$0xff]  ;;  %v970_v24 = vld [vmem:[#allocation8 + $0x520] sm:$0xff] }
 0x20f   : > { %2381 = vmatprep.subr.bf16.mxu0 %v1407_v27  ;;  %v1868_v4 = vcombine.high %v7144_v63, %v7144_v63  ;;  %2036 = vmatprep.mubr.bf16.mxu1 %v7141_v62  ;;  %v1135_v27 = vunpack.c.l.s8.bf16 %v819_v21  ;;  %vm3126_vm3 = vcmask 785408  }
 0x211   : > { %2013 = vmatpush1.bf16.msra.mxu1 %v1118_v31  ;;  %2405 = vmatprep.mubr.bf16.mxu0 %v1868_v4  ;;  %v1137_v31 = vunpack.c.h.s8.bf16 %v819_v21 }
 0x212   : > { %2382 = vmatpush1.bf16.msra.mxu0 %v1406_v32  ;;  %2014 = vmatprep.subr.bf16.mxu1 %v1121_v33  ;;  %v1425_v32 = vunpack.c.h.s8.bf16 %v963_v22  ;;  %v821_v33 = vld [vmem:[#allocation8 + $0x78] sm:$0xff] }
 0x213   : > { %2383 = vmatprep.subr.bf16.mxu0 %v1409_v34  ;;  %v965_v34 = vld [vmem:[#allocation8 + $0x4f8] sm:$0xff]  ;;  %v1139_v40 = vunpack.c.l.s8.bf16 %v821_v33  ;;  %v1141_v47 = vunpack.c.h.s8.bf16 %v821_v33 }
 0x214   : > { %v1429_v48 = vunpack.c.h.s8.bf16 %v965_v34 }
 0x215   : > { %2015 = vmatpush1.bf16.msra.mxu1 %v1120_v41  ;;  %v1427_v41 = vunpack.c.l.s8.bf16 %v965_v34 }
 0x216   : > { %2384 = vmatpush1.bf16.msra.mxu0 %v1408_v42  ;;  %2016 = vmatprep.subr.bf16.mxu1 %v1123_v45  ;;  %v1821_v42 = vcombine.high %v7123_v44, %v7123_v44  ;;  %v1138_v45 = vunpack.c.l.s8.bf16 %v820_v35  ;;  %v1140_v44 = vunpack.c.h.s8.bf16 %v820_v35  ;;  %v828_v35 = vld [vmem:[#allocation8 + $0xb0] sm:$0xff] }
 0x217   : > { %2385 = vmatprep.subr.bf16.mxu0 %v1411_v46  ;;  %v1426_v46 = vunpack.c.l.s8.bf16 %v964_v36  ;;  %v972_v36 = vld [vmem:[#allocation8 + $0x530] sm:$0xff] }
 0x219   : > { %2017 = vmatpush1.bf16.msra.mxu1 %v1122_v52  ;;  %v823_v52 = vld [vmem:[#allocation8 + $0x88] sm:$0xff] }
 0x21a   : > { %2386 = vmatpush1.bf16.msra.mxu0 %v1410_v53  ;;  %2018 = vmatprep.subr.bf16.mxu1 %v1125_v54  ;;  %v967_v53 = vld [vmem:[#allocation8 + $0x508] sm:$0xff]  ;;  %v7152_v54 = vrot.slane %v1821_v42, %v7126_v49  ;;  %v1143_v57 = vunpack.c.l.s8.bf16 %v823_v52 }
 0x21b   : > { %2387 = vmatprep.subr.bf16.mxu0 %v1413_v55  ;;  %v7156_v55 = vrot.slane %v7134_v51, %v7126_v49  ;;  %v1431_v58 = vunpack.c.l.s8.bf16 %v967_v53  ;;  %v1433_v4 = vunpack.c.h.s8.bf16 %v967_v53  ;;  %v831_v42 = vld [vmem:[#allocation8 + $0xc8] sm:$0xff]  ;;  %v830_v53 = vld [vmem:[#allocation8 + $0xc0] sm:$0xff] }
 0x21c   : > { %v1837_v61 = vcombine.high %v7152_v54, %v7152_v54 }
 0x21d   : > { %2019 = vmatpush1.bf16.msra.mxu1 %v1124_v0  ;;  %v7162_v0 = vrot.slane %v7130_v50, %v7126_v49  ;;  %v1866_v51 = vcombine.high %v7156_v55, %v7156_v55  ;;  %v1144_v50 = vunpack.c.h.s8.bf16 %v822_v59 }
 0x21e   : > { %2388 = vmatpush1.bf16.msra.mxu0 %v1412_v1  ;;  %2020 = vmatprep.subr.bf16.mxu1 %v1127_v2  ;;  %v1142_v1 = vunpack.c.l.s8.bf16 %v822_v59  ;;  %v1430_v2 = vunpack.c.l.s8.bf16 %v966_v60  ;;  %v833_v60 = vld [vmem:[#allocation8 + $0xd8] sm:$0xff] }
 0x21f   : > { %2389 = vmatprep.subr.bf16.mxu0 %v1415_v3  ;;  %v1145_v3 = vunpack.c.h.s8.bf16 %v823_v52 }
 0x221   : > { %2021 = vmatpush1.bf16.msra.mxu1 %v1126_v5  ;;  %v1770_v5 = vcombine.high %v7141_v62, %v7141_v62  ;;  %v1146_v62 = vunpack.c.l.s8.bf16 %v824_v12 }
 0x222   : > { %2390 = vmatpush1.bf16.msra.mxu0 %v1414_v6  ;;  %2022 = vmatprep.subr.bf16.mxu1 %v1129_v7  ;;  %v825_v6 = vld [vmem:[#allocation8 + $0x98] sm:$0xff] }
 0x223   : > { %2391 = vmatprep.subr.bf16.mxu0 %v1417_v8  ;;  %v969_v7 = vld [vmem:[#allocation8 + $0x518] sm:$0xff]  ;;  %v7169_v8 = vrot.slane %v1837_v61, %v7126_v49  ;;  %v1147_v10 = vunpack.c.l.s8.bf16 %v825_v6 }
 0x224   : > { %v1435_v11 = vunpack.c.l.s8.bf16 %v969_v7  ;;  %v977_v61 = vld [vmem:[#allocation8 + $0x558] sm:$0xff] }
 0x225   : > { %2023 = vmatpush1.bf16.msra.mxu1 %v1128_v13  ;;  %v968_v13 = vld [vmem:[#allocation8 + $0x510] sm:$0xff] }
 0x226   : > { %2392 = vmatpush1.bf16.msra.mxu0 %v1416_v14  ;;  %2024 = vmatprep.subr.bf16.mxu1 %v1131_v15  ;;  %v1434_v14 = vunpack.c.l.s8.bf16 %v968_v13  ;;  %v1149_v15 = vunpack.c.h.s8.bf16 %v825_v6 }
 0x227   : > { %2393 = vmatprep.subr.bf16.mxu0 %v1419_v16  ;;  %v1437_v16 = vunpack.c.h.s8.bf16 %v969_v7 }
 0x229   : > { %2025 = vmatpush1.bf16.msra.mxu1 %v1130_v17  ;;  %v827_v17 = vld [vmem:[#allocation8 + $0xa8] sm:$0xff] }
 0x22a   : > { %2394 = vmatpush1.bf16.msra.mxu0 %v1418_v18  ;;  %2026 = vmatprep.subr.bf16.mxu1 %v1133_v19  ;;  %v971_v18 = vld [vmem:[#allocation8 + $0x528] sm:$0xff]  ;;  %v1148_v19 = vunpack.c.h.s8.bf16 %v824_v12  ;;  %v1151_v21 = vunpack.c.l.s8.bf16 %v827_v17 }
 0x22b   : > { %2395 = vmatprep.subr.bf16.mxu0 %v1421_v20  ;;  %v1436_v20 = vunpack.c.h.s8.bf16 %v968_v13  ;;  %v1439_v22 = vunpack.c.l.s8.bf16 %v971_v18 }
 0x22d   : > { %2027 = vmatpush1.bf16.msra.mxu1 %v1132_v25  ;;  %v1150_v25 = vunpack.c.l.s8.bf16 %v826_v23 }
 0x22e   : > { %2396 = vmatpush1.bf16.msra.mxu0 %v1420_v26  ;;  %2028 = vmatprep.subr.bf16.mxu1 %v1135_v27  ;;  %v1438_v26 = vunpack.c.l.s8.bf16 %v970_v24  ;;  %v1153_v27 = vunpack.c.h.s8.bf16 %v827_v17 }
 0x22f   : > { %2397 = vmatprep.subr.bf16.mxu0 %v1423_v28  ;;  %v1441_v28 = vunpack.c.h.s8.bf16 %v971_v18 }
 0x231   : > { %2029 = vmatpush1.bf16.msra.mxu1 %v1134_v29  ;;  %v829_v29 = vld [vmem:[#allocation8 + $0xb8] sm:$0xff] }
 0x232   : > { %2398 = vmatpush1.bf16.msra.mxu0 %v1422_v30  ;;  %2030 = vmatprep.subr.bf16.mxu1 %v1137_v31  ;;  %v973_v30 = vld [vmem:[#allocation8 + $0x538] sm:$0xff]  ;;  %v1152_v31 = vunpack.c.h.s8.bf16 %v826_v23  ;;  %v1155_v33 = vunpack.c.l.s8.bf16 %v829_v29 }
 0x233   : > { %2399 = vmatprep.subr.bf16.mxu0 %v1425_v32  ;;  %v1440_v32 = vunpack.c.h.s8.bf16 %v970_v24  ;;  %v1443_v34 = vunpack.c.l.s8.bf16 %v973_v30 }
 0x235   : > { %2031 = vmatpush1.bf16.msra.mxu1 %v1136_v38  ;;  %v1154_v38 = vunpack.c.l.s8.bf16 %v828_v35 }
 0x236   : > { %2400 = vmatpush1.bf16.msra.mxu0 %v1424_v39  ;;  %2032 = vmatprep.subr.bf16.mxu1 %v1139_v40  ;;  %v1442_v39 = vunpack.c.l.s8.bf16 %v972_v36  ;;  %v1157_v40 = vunpack.c.h.s8.bf16 %v829_v29  ;;  %v1723_v29 = vcombine.high %v7121_v43, %v7121_v43 }
 0x237   : > { %2401 = vmatprep.subr.bf16.mxu0 %v1427_v41  ;;  %v1445_v41 = vunpack.c.h.s8.bf16 %v973_v30 }
 0x239   : > { %2033 = vmatpush1.bf16.msra.mxu1 %v1138_v45  ;;  %v975_v45 = vld [vmem:[#allocation8 + $0x548] sm:$0xff] }
 0x23a   : > { %2402 = vmatpush1.bf16.msra.mxu0 %v1426_v46  ;;  %2034 = vmatprep.subr.bf16.mxu1 %v1141_v47  ;;  %v1156_v46 = vunpack.c.h.s8.bf16 %v828_v35  ;;  %v1444_v47 = vunpack.c.h.s8.bf16 %v972_v36  ;;  %v1447_v52 = vunpack.c.l.s8.bf16 %v975_v45  ;;  %v1449_v59 = vunpack.c.h.s8.bf16 %v975_v45  ;;  %v983_v35 = vld [vmem:[#allocation8 + $0x588] sm:$0xff] }
 0x23b   : > { %2403 = vmatprep.subr.bf16.mxu0 %v1429_v48  ;;  %v1159_v48 = vunpack.c.l.s8.bf16 %v831_v42  ;;  %v7176_v36 = vrot.slane %v1723_v29, %v7126_v49  ;;  %v991_v29 = vld [vmem:[#allocation8 + $0x5c8] sm:$0xff] }
 0x23d   : > { %2035 = vmatpush1.bf16.msra.mxu1 %v1140_v44  ;;  %v974_v44 = vld [vmem:[#allocation8 + $0x540] sm:$0xff]  ;;  %v1739_v45 = vcombine.high %v7176_v36, %v7176_v36 }
 0x23e   : > { %2404 = vmatpush1.bf16.msra.mxu0 %v1428_v56  ;;  %2045 = vmatprep.subr.bf16.mxu1 %v1143_v57  ;;  %v1158_v56 = vunpack.c.l.s8.bf16 %v830_v53  ;;  %v1446_v57 = vunpack.c.l.s8.bf16 %v974_v44 }
 0x23f   : > { %2414 = vmatprep.subr.bf16.mxu0 %v1431_v58  ;;  %v1161_v58 = vunpack.c.h.s8.bf16 %v831_v42  ;;  %v982_v42 = vld [vmem:[#allocation8 + $0x580] sm:$0xff] }
 0x240   : > { %2037 = vmatmul.mubr.bf16.vlgmr.msra.gmra.mrb[0].mxu1 %v7162_v0 }
 0x241   : > { %2406 = vmatmul.mubr.bf16.vlgmr.msra.gmra.mrb[0].mxu0 %v1866_v51  ;;  %2046 = vmatpush1.bf16.msra.mxu1 %v1142_v1  ;;  %v1160_v51 = vunpack.c.h.s8.bf16 %v830_v53  ;;  %v1448_v1 = vunpack.c.h.s8.bf16 %v974_v44  ;;  %v1465_v44 = vunpack.c.h.s8.bf16 %v983_v35 }
 0x242   : > { %2415 = vmatpush1.bf16.msra.mxu0 %v1430_v2  ;;  %2047 = vmatprep.subr.bf16.mxu1 %v1145_v3  ;;  %v1163_v2 = vunpack.c.l.s8.bf16 %v833_v60  ;;  %v1451_v3 = vunpack.c.l.s8.bf16 %v977_v61 }
 0x243   : > { %2416 = vmatprep.subr.bf16.mxu0 %v1433_v4  ;;  %2077 = vmatprep.mubr.bf16.mxu1 %v1770_v5  ;;  %v832_v4 = vld [vmem:[#allocation8 + $0xd0] sm:$0xff] }
 0x244   : > { %2446 = vmatprep.mubr.bf16.mxu0 %v7169_v8  ;;  %v976_v5 = vld [vmem:[#allocation8 + $0x550] sm:$0xff]  ;;  %v1162_v6 = vunpack.c.l.s8.bf16 %v832_v4  ;;  %v1164_v12 = vunpack.c.h.s8.bf16 %v832_v4 }
 0x245   : > { %2048 = vmatpush1.bf16.msra.mxu1 %v1144_v50  ;;  %v1450_v7 = vunpack.c.l.s8.bf16 %v976_v5  ;;  %v1165_v50 = vunpack.c.h.s8.bf16 %v833_v60  ;;  %v1452_v13 = vunpack.c.h.s8.bf16 %v976_v5  ;;  %v843_v5 = vld [vmem:[#allocation8 + $0x128] sm:$0xff] }
 0x246   : > { %2417 = vmatpush1.bf16.msra.mxu0 %v1432_v9  ;;  %2049 = vmatprep.subr.bf16.mxu1 %v1147_v10  ;;  %v1453_v9 = vunpack.c.h.s8.bf16 %v977_v61  ;;  %v835_v10 = vld [vmem:[#allocation8 + $0xe8] sm:$0xff] }
 0x247   : > { %2418 = vmatprep.subr.bf16.mxu0 %v1435_v11  ;;  %v979_v11 = vld [vmem:[#allocation8 + $0x568] sm:$0xff] }
 0x249   : > { %2050 = vmatpush1.bf16.msra.mxu1 %v1146_v62  ;;  %v1167_v62 = vunpack.c.l.s8.bf16 %v835_v10 }
 0x24a   : > { %2419 = vmatpush1.bf16.msra.mxu0 %v1434_v14  ;;  %2051 = vmatprep.subr.bf16.mxu1 %v1149_v15  ;;  %v1455_v14 = vunpack.c.l.s8.bf16 %v979_v11  ;;  %v834_v15 = vld [vmem:[#allocation8 + $0xe0] sm:$0xff] }
 0x24b   : > { %2420 = vmatprep.subr.bf16.mxu0 %v1437_v16  ;;  %v978_v16 = vld [vmem:[#allocation8 + $0x560] sm:$0xff]  ;;  %v1166_v17 = vunpack.c.l.s8.bf16 %v834_v15  ;;  %v1168_v23 = vunpack.c.h.s8.bf16 %v834_v15 }
 0x24c   : > { %v1454_v18 = vunpack.c.l.s8.bf16 %v978_v16  ;;  %v1456_v24 = vunpack.c.h.s8.bf16 %v978_v16  ;;  %v845_v16 = vld [vmem:[#allocation8 + $0x138] sm:$0xff] }
 0x24d   : > { %2052 = vmatpush1.bf16.msra.mxu1 %v1148_v19  ;;  %v1169_v19 = vunpack.c.h.s8.bf16 %v835_v10 }
 0x24e   : > { %2421 = vmatpush1.bf16.msra.mxu0 %v1436_v20  ;;  %2053 = vmatprep.subr.bf16.mxu1 %v1151_v21  ;;  %v1457_v20 = vunpack.c.h.s8.bf16 %v979_v11  ;;  %v837_v21 = vld [vmem:[#allocation8 + $0xf8] sm:$0xff]  ;;  %v842_v11 = vld [vmem:[#allocation8 + $0x120] sm:$0xff] }
 0x24f   : > { %2422 = vmatprep.subr.bf16.mxu0 %v1439_v22  ;;  %v981_v22 = vld [vmem:[#allocation8 + $0x578] sm:$0xff] }
 0x251   : > { %2054 = vmatpush1.bf16.msra.mxu1 %v1150_v25  ;;  %v1171_v25 = vunpack.c.l.s8.bf16 %v837_v21 }
 0x252   : > { %2423 = vmatpush1.bf16.msra.mxu0 %v1438_v26  ;;  %2055 = vmatprep.subr.bf16.mxu1 %v1153_v27  ;;  %v1459_v26 = vunpack.c.l.s8.bf16 %v981_v22  ;;  %v836_v27 = vld [vmem:[#allocation8 + $0xf0] sm:$0xff] }
 0x253   : > { %2424 = vmatprep.subr.bf16.mxu0 %v1441_v28  ;;  %v980_v28 = vld [vmem:[#allocation8 + $0x570] sm:$0xff]  ;;  %v1170_v30 = vunpack.c.l.s8.bf16 %v836_v27 }
 0x255   : > { %2056 = vmatpush1.bf16.msra.mxu1 %v1152_v31  ;;  %v1458_v31 = vunpack.c.l.s8.bf16 %v980_v28 }
 0x256   : > { %2425 = vmatpush1.bf16.msra.mxu0 %v1440_v32  ;;  %2057 = vmatprep.subr.bf16.mxu1 %v1155_v33  ;;  %v1173_v32 = vunpack.c.h.s8.bf16 %v837_v21  ;;  %v1461_v33 = vunpack.c.h.s8.bf16 %v981_v22  ;;  %v844_v22 = vld [vmem:[#allocation8 + $0x130] sm:$0xff] }
 0x257   : > { %2426 = vmatprep.subr.bf16.mxu0 %v1443_v34  ;;  %v839_v34 = vld [vmem:[#allocation8 + $0x108] sm:$0xff] }
 0x258   : > { %v1175_v43 = vunpack.c.l.s8.bf16 %v839_v34  ;;  %v1177_v53 = vunpack.c.h.s8.bf16 %v839_v34  ;;  %v846_v34 = vld [vmem:[#allocation8 + $0x140] sm:$0xff] }
 0x259   : > { %2058 = vmatpush1.bf16.msra.mxu1 %v1154_v38  ;;  %v1172_v38 = vunpack.c.h.s8.bf16 %v836_v27 }
 0x25a   : > { %2427 = vmatpush1.bf16.msra.mxu0 %v1442_v39  ;;  %2059 = vmatprep.subr.bf16.mxu1 %v1157_v40  ;;  %v1460_v39 = vunpack.c.h.s8.bf16 %v980_v28  ;;  %v1463_v40 = vunpack.c.l.s8.bf16 %v983_v35  ;;  %v847_v28 = vld [vmem:[#allocation8 + $0x148] sm:$0xff]  ;;  %v990_v35 = vld [vmem:[#allocation8 + $0x5c0] sm:$0xff] }
 0x25b   : > { %2428 = vmatprep.subr.bf16.mxu0 %v1445_v41  ;;  %v838_v41 = vld [vmem:[#allocation8 + $0x100] sm:$0xff] }
 0x25d   : > { %2060 = vmatpush1.bf16.msra.mxu1 %v1156_v46  ;;  %v1768_v46 = vcombine.high %v7162_v0, %v7162_v0  ;;  %v1869_v0 = vcombine.high %v7169_v8, %v7169_v8 }
 0x25e   : > { %2429 = vmatpush1.bf16.msra.mxu0 %v1444_v47  ;;  %2061 = vmatprep.subr.bf16.mxu1 %v1159_v48  ;;  %v7184_v47 = vrot.slane %v7152_v54, %v7126_v49  ;;  %v1174_v48 = vunpack.c.l.s8.bf16 %v838_v41  ;;  %v1176_v54 = vunpack.c.h.s8.bf16 %v838_v41  ;;  %v849_v41 = vld [vmem:[#allocation8 + $0x158] sm:$0xff] }
 0x25f   : > { %2430 = vmatprep.subr.bf16.mxu0 %v1447_v52  ;;  %v1462_v52 = vunpack.c.l.s8.bf16 %v982_v42 }
 0x261   : > { %2062 = vmatpush1.bf16.msra.mxu1 %v1158_v56  ;;  %v841_v56 = vld [vmem:[#allocation8 + $0x118] sm:$0xff] }
 0x262   : > { %2431 = vmatpush1.bf16.msra.mxu0 %v1446_v57  ;;  %2063 = vmatprep.subr.bf16.mxu1 %v1161_v58  ;;  %v985_v57 = vld [vmem:[#allocation8 + $0x598] sm:$0xff]  ;;  %v7187_v58 = vrot.slane %v1739_v45, %v7126_v49  ;;  %v1179_v60 = vunpack.c.l.s8.bf16 %v841_v56  ;;  %v1192_v45 = vunpack.c.h.s8.bf16 %v846_v34 }
 0x263   : > { %2432 = vmatprep.subr.bf16.mxu0 %v1449_v59  ;;  %v1464_v59 = vunpack.c.h.s8.bf16 %v982_v42  ;;  %v1467_v61 = vunpack.c.l.s8.bf16 %v985_v57  ;;  %v1469_v4 = vunpack.c.h.s8.bf16 %v985_v57  ;;  %v993_v42 = vld [vmem:[#allocation8 + $0x5d8] sm:$0xff] }
 0x265   : > { %2064 = vmatpush1.bf16.msra.mxu1 %v1160_v51  ;;  %v840_v51 = vld [vmem:[#allocation8 + $0x110] sm:$0xff] }
 0x266   : > { %2433 = vmatpush1.bf16.msra.mxu0 %v1448_v1  ;;  %2065 = vmatprep.subr.bf16.mxu1 %v1163_v2  ;;  %v984_v1 = vld [vmem:[#allocation8 + $0x590] sm:$0xff]  ;;  %v1178_v2 = vunpack.c.l.s8.bf16 %v840_v51 }
 0x267   : > { %2434 = vmatprep.subr.bf16.mxu0 %v1451_v3  ;;  %v1466_v8 = vunpack.c.l.s8.bf16 %v984_v1  ;;  %v1181_v3 = vunpack.c.h.s8.bf16 %v841_v56 }
 0x269   : > { %2066 = vmatpush1.bf16.msra.mxu1 %v1162_v6  ;;  %v987_v6 = vld [vmem:[#allocation8 + $0x5a8] sm:$0xff] }
 0x26a   : > { %2435 = vmatpush1.bf16.msra.mxu0 %v1450_v7  ;;  %2067 = vmatprep.subr.bf16.mxu1 %v1165_v50  ;;  %v1180_v7 = vunpack.c.h.s8.bf16 %v840_v51  ;;  %v1468_v50 = vunpack.c.h.s8.bf16 %v984_v1  ;;  %v1471_v10 = vunpack.c.l.s8.bf16 %v987_v6  ;;  %v1473_v15 = vunpack.c.h.s8.bf16 %v987_v6 }
 0x26b   : > { %2436 = vmatprep.subr.bf16.mxu0 %v1453_v9  ;;  %v1183_v9 = vunpack.c.l.s8.bf16 %v843_v5 }
 0x26d   : > { %2068 = vmatpush1.bf16.msra.mxu1 %v1164_v12  ;;  %v986_v12 = vld [vmem:[#allocation8 + $0x5a0] sm:$0xff] }
 0x26e   : > { %2437 = vmatpush1.bf16.msra.mxu0 %v1452_v13  ;;  %2069 = vmatprep.subr.bf16.mxu1 %v1167_v62  ;;  %v1182_v13 = vunpack.c.l.s8.bf16 %v842_v11  ;;  %v1470_v62 = vunpack.c.l.s8.bf16 %v986_v12 }
 0x26f   : > { %2438 = vmatprep.subr.bf16.mxu0 %v1455_v14  ;;  %v1185_v14 = vunpack.c.h.s8.bf16 %v843_v5 }
 0x271   : > { %2070 = vmatpush1.bf16.msra.mxu1 %v1166_v17  ;;  %v989_v17 = vld [vmem:[#allocation8 + $0x5b8] sm:$0xff] }
 0x272   : > { %2439 = vmatpush1.bf16.msra.mxu0 %v1454_v18  ;;  %2071 = vmatprep.subr.bf16.mxu1 %v1169_v19  ;;  %v1184_v18 = vunpack.c.h.s8.bf16 %v842_v11  ;;  %v1472_v19 = vunpack.c.h.s8.bf16 %v986_v12  ;;  %v1475_v21 = vunpack.c.l.s8.bf16 %v989_v17  ;;  %v1477_v27 = vunpack.c.h.s8.bf16 %v989_v17 }
 0x273   : > { %2440 = vmatprep.subr.bf16.mxu0 %v1457_v20  ;;  %v1187_v20 = vunpack.c.l.s8.bf16 %v845_v16 }
 0x275   : > { %2072 = vmatpush1.bf16.msra.mxu1 %v1168_v23  ;;  %v988_v23 = vld [vmem:[#allocation8 + $0x5b0] sm:$0xff] }
 0x276   : > { %2441 = vmatpush1.bf16.msra.mxu0 %v1456_v24  ;;  %2073 = vmatprep.subr.bf16.mxu1 %v1171_v25  ;;  %v1186_v24 = vunpack.c.l.s8.bf16 %v844_v22  ;;  %v1474_v25 = vunpack.c.l.s8.bf16 %v988_v23 }
 0x277   : > { %2442 = vmatprep.subr.bf16.mxu0 %v1459_v26  ;;  %v1189_v26 = vunpack.c.h.s8.bf16 %v845_v16 }
 0x279   : > { %2074 = vmatpush1.bf16.msra.mxu1 %v1170_v30  ;;  %v1188_v30 = vunpack.c.h.s8.bf16 %v844_v22 }
 0x27a   : > { %2443 = vmatpush1.bf16.msra.mxu0 %v1458_v31  ;;  %2075 = vmatprep.subr.bf16.mxu1 %v1173_v32  ;;  %v1476_v31 = vunpack.c.h.s8.bf16 %v988_v23  ;;  %v1191_v32 = vunpack.c.l.s8.bf16 %v847_v28 }
 0x27b   : > { %2444 = vmatprep.subr.bf16.mxu0 %v1461_v33  ;;  %v1479_v33 = vunpack.c.l.s8.bf16 %v991_v29 }
 0x27d   : > { %2076 = vmatpush1.bf16.msra.mxu1 %v1172_v38  ;;  %v1190_v38 = vunpack.c.l.s8.bf16 %v846_v34 }
 0x27e   : > { %2445 = vmatpush1.bf16.msra.mxu0 %v1460_v39  ;;  %2086 = vmatprep.subr.bf16.mxu1 %v1175_v43  ;;  %v1478_v39 = vunpack.c.l.s8.bf16 %v990_v35  ;;  %v1193_v43 = vunpack.c.h.s8.bf16 %v847_v28  ;;  %v998_v28 = vld [vmem:[#allocation8 + $0x600] sm:$0xff] }
 0x27f   : > { %2455 = vmatprep.subr.bf16.mxu0 %v1463_v40  ;;  %v1481_v40 = vunpack.c.h.s8.bf16 %v991_v29 }
 0x280   : > { %2078 = vmatmul.mubr.bf16.vlgmr.msra.gmra.mrb[0].mxu1 %v1768_v46  ;;  %v1480_v46 = vunpack.c.h.s8.bf16 %v990_v35 }
 0x281   : > { %2447 = vmatmul.mubr.bf16.vlgmr.msra.gmra.mrb[0].mxu0 %v7184_v47  ;;  %2087 = vmatpush1.bf16.msra.mxu1 %v1174_v48  ;;  %v1195_v48 = vunpack.c.l.s8.bf16 %v849_v41 }
 0x282   : > { %2456 = vmatpush1.bf16.msra.mxu0 %v1462_v52  ;;  %2088 = vmatprep.subr.bf16.mxu1 %v1177_v53  ;;  %v1483_v52 = vunpack.c.l.s8.bf16 %v993_v42  ;;  %v848_v53 = vld [vmem:[#allocation8 + $0x150] sm:$0xff] }
 0x283   : > { %2457 = vmatprep.subr.bf16.mxu0 %v1465_v44  ;;  %2118 = vmatprep.mubr.bf16.mxu1 %v7187_v58  ;;  %v992_v44 = vld [vmem:[#allocation8 + $0x5d0] sm:$0xff]  ;;  %v1194_v56 = vunpack.c.l.s8.bf16 %v848_v53 }
 0x284   : > { %2487 = vmatprep.mubr.bf16.mxu0 %v1869_v0  ;;  %v1482_v57 = vunpack.c.l.s8.bf16 %v992_v44  ;;  %v1197_v0 = vunpack.c.h.s8.bf16 %v849_v41  ;;  %v1484_v51 = vunpack.c.h.s8.bf16 %v992_v44  ;;  %v859_v44 = vld [vmem:[#allocation8 + $0x1a8] sm:$0xff] }
 0x285   : > { %2089 = vmatpush1.bf16.msra.mxu1 %v1176_v54  ;;  %v1485_v54 = vunpack.c.h.s8.bf16 %v993_v42 }
 0x286   : > { %2458 = vmatpush1.bf16.msra.mxu0 %v1464_v59  ;;  %2090 = vmatprep.subr.bf16.mxu1 %v1179_v60  ;;  %v851_v59 = vld [vmem:[#allocation8 + $0x168] sm:$0xff] }
 0x287   : > { %2459 = vmatprep.subr.bf16.mxu0 %v1467_v61  ;;  %v995_v60 = vld [vmem:[#allocation8 + $0x5e8] sm:$0xff]  ;;  %v1196_v61 = vunpack.c.h.s8.bf16 %v848_v53  ;;  %v1199_v1 = vunpack.c.l.s8.bf16 %v851_v59  ;;  %v1201_v6 = vunpack.c.h.s8.bf16 %v851_v59 }
 0x289   : > { %2091 = vmatpush1.bf16.msra.mxu1 %v1178_v2  ;;  %v1487_v2 = vunpack.c.l.s8.bf16 %v995_v60 }
 0x28a   : > { %2460 = vmatpush1.bf16.msra.mxu0 %v1466_v8  ;;  %2092 = vmatprep.subr.bf16.mxu1 %v1181_v3  ;;  %v850_v8 = vld [vmem:[#allocation8 + $0x160] sm:$0xff] }
 0x28b   : > { %2461 = vmatprep.subr.bf16.mxu0 %v1469_v4  ;;  %v994_v3 = vld [vmem:[#allocation8 + $0x5e0] sm:$0xff]  ;;  %v1198_v4 = vunpack.c.l.s8.bf16 %v850_v8 }
 0x28c   : > { %v1486_v5 = vunpack.c.l.s8.bf16 %v994_v3  ;;  %v1488_v11 = vunpack.c.h.s8.bf16 %v994_v3  ;;  %v861_v3 = vld [vmem:[#allocation8 + $0x1b8] sm:$0xff] }
 0x28d   : > { %2093 = vmatpush1.bf16.msra.mxu1 %v1180_v7  ;;  %v1489_v7 = vunpack.c.h.s8.bf16 %v995_v60  ;;  %v858_v60 = vld [vmem:[#allocation8 + $0x1a0] sm:$0xff] }
 0x28e   : > { %2462 = vmatpush1.bf16.msra.mxu0 %v1468_v50  ;;  %2094 = vmatprep.subr.bf16.mxu1 %v1183_v9  ;;  %v853_v50 = vld [vmem:[#allocation8 + $0x178] sm:$0xff] }
 0x28f   : > { %2463 = vmatprep.subr.bf16.mxu0 %v1471_v10  ;;  %v997_v9 = vld [vmem:[#allocation8 + $0x5f8] sm:$0xff]  ;;  %v1200_v10 = vunpack.c.h.s8.bf16 %v850_v8  ;;  %v1203_v12 = vunpack.c.l.s8.bf16 %v853_v50 }
 0x291   : > { %2095 = vmatpush1.bf16.msra.mxu1 %v1182_v13  ;;  %v1491_v13 = vunpack.c.l.s8.bf16 %v997_v9 }
 0x292   : > { %2464 = vmatpush1.bf16.msra.mxu0 %v1470_v62  ;;  %2096 = vmatprep.subr.bf16.mxu1 %v1185_v14  ;;  %v852_v62 = vld [vmem:[#allocation8 + $0x170] sm:$0xff] }
 0x293   : > { %2465 = vmatprep.subr.bf16.mxu0 %v1473_v15  ;;  %v996_v14 = vld [vmem:[#allocation8 + $0x5f0] sm:$0xff]  ;;  %v1202_v16 = vunpack.c.l.s8.bf16 %v852_v62  ;;  %v1204_v23 = vunpack.c.h.s8.bf16 %v852_v62 }
 0x294   : > { %v7193_v15 = vld [vmem:[#allocation3 + $0x18] sm:$0xff]  ;;  %v1490_v17 = vunpack.c.l.s8.bf16 %v996_v14 }
 0x295   : > { %2097 = vmatpush1.bf16.msra.mxu1 %v1184_v18  ;;  %v1205_v18 = vunpack.c.h.s8.bf16 %v853_v50  ;;  %v7197_v22 = vrot.slane %v7193_v15, %v7126_v49 }
 0x296   : > { %2466 = vmatpush1.bf16.msra.mxu0 %v1472_v19  ;;  %2098 = vmatprep.subr.bf16.mxu1 %v1187_v20  ;;  %v1493_v19 = vunpack.c.h.s8.bf16 %v997_v9  ;;  %v855_v20 = vld [vmem:[#allocation8 + $0x188] sm:$0xff]  ;;  %v860_v9 = vld [vmem:[#allocation8 + $0x1b0] sm:$0xff] }
 0x297   : > { %2467 = vmatprep.subr.bf16.mxu0 %v1475_v21  ;;  %v999_v21 = vld [vmem:[#allocation8 + $0x608] sm:$0xff]  ;;  %v1885_v29 = vcombine.high %v7197_v22, %v7197_v22  ;;  %v1209_v34 = vunpack.c.h.s8.bf16 %v855_v20 }
 0x298   : > { %v1497_v35 = vunpack.c.h.s8.bf16 %v999_v21 }
 0x299   : > { %2099 = vmatpush1.bf16.msra.mxu1 %v1186_v24  ;;  %v1492_v24 = vunpack.c.h.s8.bf16 %v996_v14  ;;  %v863_v14 = vld [vmem:[#allocation8 + $0x1c8] sm:$0xff] }
 0x29a   : > { %2468 = vmatpush1.bf16.msra.mxu0 %v1474_v25  ;;  %2100 = vmatprep.subr.bf16.mxu1 %v1189_v26  ;;  %v1207_v25 = vunpack.c.l.s8.bf16 %v855_v20  ;;  %v1495_v26 = vunpack.c.l.s8.bf16 %v999_v21  ;;  %v862_v21 = vld [vmem:[#allocation8 + $0x1c0] sm:$0xff] }
 0x29b   : > { %2469 = vmatprep.subr.bf16.mxu0 %v1477_v27  ;;  %v854_v27 = vld [vmem:[#allocation8 + $0x180] sm:$0xff] }
 0x29d   : > { %2101 = vmatpush1.bf16.msra.mxu1 %v1188_v30  ;;  %v7203_v30 = vrot.slane %v7176_v36, %v7126_v49  ;;  %v1208_v36 = vunpack.c.h.s8.bf16 %v854_v27 }
 0x29e   : > { %2470 = vmatpush1.bf16.msra.mxu0 %v1476_v31  ;;  %2102 = vmatprep.subr.bf16.mxu1 %v1191_v32  ;;  %v1867_v31 = vcombine.high %v7184_v47, %v7184_v47  ;;  %v1206_v32 = vunpack.c.l.s8.bf16 %v854_v27  ;;  %v1496_v47 = vunpack.c.h.s8.bf16 %v998_v28 }
 0x29f   : > { %2471 = vmatprep.subr.bf16.mxu0 %v1479_v33  ;;  %v1494_v33 = vunpack.c.l.s8.bf16 %v998_v28  ;;  %v865_v28 = vld [vmem:[#allocation8 + $0x1d8] sm:$0xff] }
 0x2a1   : > { %2103 = vmatpush1.bf16.msra.mxu1 %v1190_v38  ;;  %v857_v38 = vld [vmem:[#allocation8 + $0x198] sm:$0xff] }
 0x2a2   : > { %2472 = vmatpush1.bf16.msra.mxu0 %v1478_v39  ;;  %2104 = vmatprep.subr.bf16.mxu1 %v1193_v43  ;;  %v1001_v39 = vld [vmem:[#allocation8 + $0x618] sm:$0xff]  ;;  %v1771_v43 = vcombine.high %v7187_v58, %v7187_v58  ;;  %v1211_v41 = vunpack.c.l.s8.bf16 %v857_v38 }
 0x2a3   : > { %2473 = vmatprep.subr.bf16.mxu0 %v1481_v40  ;;  %v7210_v40 = vrot.slane %v1885_v29, %v7126_v49  ;;  %v1499_v42 = vunpack.c.l.s8.bf16 %v1001_v39  ;;  %v1501_v53 = vunpack.c.h.s8.bf16 %v1001_v39  ;;  %v1009_v29 = vld [vmem:[#allocation8 + $0x658] sm:$0xff] }
 0x2a5   : > { %2105 = vmatpush1.bf16.msra.mxu1 %v1192_v45  ;;  %v856_v45 = vld [vmem:[#allocation8 + $0x190] sm:$0xff] }
 0x2a6   : > { %2474 = vmatpush1.bf16.msra.mxu0 %v1480_v46  ;;  %2106 = vmatprep.subr.bf16.mxu1 %v1195_v48  ;;  %v1000_v46 = vld [vmem:[#allocation8 + $0x610] sm:$0xff]  ;;  %v1210_v58 = vunpack.c.l.s8.bf16 %v856_v45 }
 0x2a7   : > { %2475 = vmatprep.subr.bf16.mxu0 %v1483_v52  ;;  %v1498_v48 = vunpack.c.l.s8.bf16 %v1000_v46  ;;  %v1213_v52 = vunpack.c.h.s8.bf16 %v857_v38  ;;  %v1008_v38 = vld [vmem:[#allocation8 + $0x650] sm:$0xff] }
 0x2a9   : > { %2107 = vmatpush1.bf16.msra.mxu1 %v1194_v56  ;;  %v1003_v56 = vld [vmem:[#allocation8 + $0x628] sm:$0xff] }
 0x2aa   : > { %2476 = vmatpush1.bf16.msra.mxu0 %v1482_v57  ;;  %2108 = vmatprep.subr.bf16.mxu1 %v1197_v0  ;;  %v1212_v57 = vunpack.c.h.s8.bf16 %v856_v45  ;;  %v1500_v0 = vunpack.c.h.s8.bf16 %v1000_v46  ;;  %v1503_v59 = vunpack.c.l.s8.bf16 %v1003_v56  ;;  %v1505_v8 = vunpack.c.h.s8.bf16 %v1003_v56 }
 0x2ab   : > { %2477 = vmatprep.subr.bf16.mxu0 %v1485_v54  ;;  %v1215_v54 = vunpack.c.l.s8.bf16 %v859_v44  ;;  %v1516_v46 = vunpack.c.h.s8.bf16 %v1008_v38 }
 0x2ad   : > { %2109 = vmatpush1.bf16.msra.mxu1 %v1196_v61  ;;  %v1002_v61 = vld [vmem:[#allocation8 + $0x620] sm:$0xff] }
 0x2ae   : > { %2478 = vmatpush1.bf16.msra.mxu0 %v1484_v51  ;;  %2110 = vmatprep.subr.bf16.mxu1 %v1199_v1  ;;  %v1214_v51 = vunpack.c.l.s8.bf16 %v858_v60  ;;  %v1502_v1 = vunpack.c.l.s8.bf16 %v1002_v61 }
 0x2af   : > { %2479 = vmatprep.subr.bf16.mxu0 %v1487_v2  ;;  %v1217_v2 = vunpack.c.h.s8.bf16 %v859_v44 }
 0x2b1   : > { %2111 = vmatpush1.bf16.msra.mxu1 %v1198_v4  ;;  %v1005_v4 = vld [vmem:[#allocation8 + $0x638] sm:$0xff] }
 0x2b2   : > { %2480 = vmatpush1.bf16.msra.mxu0 %v1486_v5  ;;  %2112 = vmatprep.subr.bf16.mxu1 %v1201_v6  ;;  %v1216_v5 = vunpack.c.h.s8.bf16 %v858_v60  ;;  %v1504_v6 = vunpack.c.h.s8.bf16 %v1002_v61  ;;  %v1507_v50 = vunpack.c.l.s8.bf16 %v1005_v4  ;;  %v1509_v62 = vunpack.c.h.s8.bf16 %v1005_v4 }
 0x2b3   : > { %2481 = vmatprep.subr.bf16.mxu0 %v1489_v7  ;;  %v1219_v7 = vunpack.c.l.s8.bf16 %v861_v3 }
 0x2b5   : > { %2113 = vmatpush1.bf16.msra.mxu1 %v1200_v10  ;;  %v1004_v10 = vld [vmem:[#allocation8 + $0x630] sm:$0xff] }
 0x2b6   : > { %2482 = vmatpush1.bf16.msra.mxu0 %v1488_v11  ;;  %2114 = vmatprep.subr.bf16.mxu1 %v1203_v12  ;;  %v1218_v11 = vunpack.c.l.s8.bf16 %v860_v9  ;;  %v1506_v12 = vunpack.c.l.s8.bf16 %v1004_v10 }
 0x2b7   : > { %2483 = vmatprep.subr.bf16.mxu0 %v1491_v13  ;;  %v1221_v13 = vunpack.c.h.s8.bf16 %v861_v3  ;;  %v7214_v3 = vld [vmem:[#allocation3 + $0x8] sm:$0xff] }
 0x2b9   : > { %2115 = vmatpush1.bf16.msra.mxu1 %v1202_v16  ;;  %v1007_v16 = vld [vmem:[#allocation8 + $0x648] sm:$0xff] }
 0x2ba   : > { %2484 = vmatpush1.bf16.msra.mxu0 %v1490_v17  ;;  %2116 = vmatprep.subr.bf16.mxu1 %v1205_v18  ;;  %v1220_v17 = vunpack.c.h.s8.bf16 %v860_v9  ;;  %v1508_v18 = vunpack.c.h.s8.bf16 %v1004_v10  ;;  %v1511_v20 = vunpack.c.l.s8.bf16 %v1007_v16  ;;  %v1513_v27 = vunpack.c.h.s8.bf16 %v1007_v16  ;;  %v1015_v9 = vld [vmem:[#allocation8 + $0x688] sm:$0xff]  ;;  %v1014_v16 = vld [vmem:[#allocation8 + $0x680] sm:$0xff] }
 0x2bb   : > { %2485 = vmatprep.subr.bf16.mxu0 %v1493_v19  ;;  %v1223_v19 = vunpack.c.l.s8.bf16 %v863_v14  ;;  %v7218_v10 = vrot.slane %v7214_v3, %v7126_v49 }
 0x2bd   : > { %2117 = vmatpush1.bf16.msra.mxu1 %v1204_v23  ;;  %v1006_v23 = vld [vmem:[#allocation8 + $0x640] sm:$0xff] }
 0x2be   : > { %2486 = vmatpush1.bf16.msra.mxu0 %v1492_v24  ;;  %2127 = vmatprep.subr.bf16.mxu1 %v1207_v25  ;;  %v1222_v24 = vunpack.c.l.s8.bf16 %v862_v21  ;;  %v1510_v25 = vunpack.c.l.s8.bf16 %v1006_v23 }
 0x2bf   : > { %2496 = vmatprep.subr.bf16.mxu0 %v1495_v26  ;;  %v1225_v26 = vunpack.c.h.s8.bf16 %v863_v14  ;;  %v870_v14 = vld [vmem:[#allocation8 + $0x200] sm:$0xff] }
 0x2c0   : > { %2119 = vmatmul.mubr.bf16.vlgmr.msra.gmra.mrb[0].mxu1 %v7203_v30 }
 0x2c1   : > { %2488 = vmatmul.mubr.bf16.vlgmr.msra.gmra.mrb[0].mxu0 %v1867_v31  ;;  %2128 = vmatpush1.bf16.msra.mxu1 %v1206_v32  ;;  %v1224_v31 = vunpack.c.h.s8.bf16 %v862_v21  ;;  %v1512_v32 = vunpack.c.h.s8.bf16 %v1006_v23  ;;  %v1526_v21 = vunpack.c.l.s8.bf16 %v1014_v16 }
 0x2c2   : > { %2497 = vmatpush1.bf16.msra.mxu0 %v1494_v33  ;;  %2129 = vmatprep.subr.bf16.mxu1 %v1209_v34  ;;  %v1227_v33 = vunpack.c.l.s8.bf16 %v865_v28  ;;  %v1515_v34 = vunpack.c.l.s8.bf16 %v1009_v29 }
 0x2c3   : > { %2498 = vmatprep.subr.bf16.mxu0 %v1497_v35  ;;  %2159 = vmatprep.mubr.bf16.mxu1 %v1771_v43  ;;  %v864_v35 = vld [vmem:[#allocation8 + $0x1d0] sm:$0xff]  ;;  %v1514_v43 = vunpack.c.l.s8.bf16 %v1008_v38 }
 0x2c4   : > { %2528 = vmatprep.mubr.bf16.mxu0 %v7210_v40  ;;  %v1226_v39 = vunpack.c.l.s8.bf16 %v864_v35  ;;  %v1228_v45 = vunpack.c.h.s8.bf16 %v864_v35 }
 0x2c5   : > { %2130 = vmatpush1.bf16.msra.mxu1 %v1208_v36  ;;  %v1229_v36 = vunpack.c.h.s8.bf16 %v865_v28  ;;  %v1528_v28 = vunpack.c.h.s8.bf16 %v1014_v16 }
 0x2c6   : > { %2499 = vmatpush1.bf16.msra.mxu0 %v1496_v47  ;;  %2131 = vmatprep.subr.bf16.mxu1 %v1211_v41  ;;  %v1517_v47 = vunpack.c.h.s8.bf16 %v1009_v29  ;;  %v867_v41 = vld [vmem:[#allocation8 + $0x1e8] sm:$0xff] }
 0x2c7   : > { %2500 = vmatprep.subr.bf16.mxu0 %v1499_v42  ;;  %v1011_v42 = vld [vmem:[#allocation8 + $0x668] sm:$0xff] }
 0x2c9   : > { %2132 = vmatpush1.bf16.msra.mxu1 %v1210_v58  ;;  %v1231_v58 = vunpack.c.l.s8.bf16 %v867_v41 }
 0x2ca   : > { %2501 = vmatpush1.bf16.msra.mxu0 %v1498_v48  ;;  %2133 = vmatprep.subr.bf16.mxu1 %v1213_v52  ;;  %v1519_v48 = vunpack.c.l.s8.bf16 %v1011_v42  ;;  %v866_v52 = vld [vmem:[#allocation8 + $0x1e0] sm:$0xff] }
 0x2cb   : > { %2502 = vmatprep.subr.bf16.mxu0 %v1501_v53  ;;  %v1010_v53 = vld [vmem:[#allocation8 + $0x660] sm:$0xff]  ;;  %v1230_v44 = vunpack.c.l.s8.bf16 %v866_v52  ;;  %v1232_v60 = vunpack.c.h.s8.bf16 %v866_v52 }
 0x2cc   : > { %v1518_v56 = vunpack.c.l.s8.bf16 %v1010_v53  ;;  %v1520_v61 = vunpack.c.h.s8.bf16 %v1010_v53 }
 0x2cd   : > { %2134 = vmatpush1.bf16.msra.mxu1 %v1212_v57  ;;  %v1233_v57 = vunpack.c.h.s8.bf16 %v867_v41 }
 0x2ce   : > { %2503 = vmatpush1.bf16.msra.mxu0 %v1500_v0  ;;  %2135 = vmatprep.subr.bf16.mxu1 %v1215_v54  ;;  %v1521_v0 = vunpack.c.h.s8.bf16 %v1011_v42  ;;  %v869_v54 = vld [vmem:[#allocation8 + $0x1f8] sm:$0xff] }
 0x2cf   : > { %2504 = vmatprep.subr.bf16.mxu0 %v1503_v59  ;;  %v1013_v59 = vld [vmem:[#allocation8 + $0x678] sm:$0xff] }
 0x2d1   : > { %2136 = vmatpush1.bf16.msra.mxu1 %v1214_v51  ;;  %v1235_v51 = vunpack.c.l.s8.bf16 %v869_v54 }
 0x2d2   : > { %2505 = vmatpush1.bf16.msra.mxu0 %v1502_v1  ;;  %2137 = vmatprep.subr.bf16.mxu1 %v1217_v2  ;;  %v1523_v1 = vunpack.c.l.s8.bf16 %v1013_v59  ;;  %v868_v2 = vld [vmem:[#allocation8 + $0x1f0] sm:$0xff] }
 0x2d3   : > { %2506 = vmatprep.subr.bf16.mxu0 %v1505_v8  ;;  %v1012_v8 = vld [vmem:[#allocation8 + $0x670] sm:$0xff]  ;;  %v1234_v4 = vunpack.c.l.s8.bf16 %v868_v2 }
 0x2d5   : > { %2138 = vmatpush1.bf16.msra.mxu1 %v1216_v5  ;;  %v1522_v5 = vunpack.c.l.s8.bf16 %v1012_v8 }
 0x2d6   : > { %2507 = vmatpush1.bf16.msra.mxu0 %v1504_v6  ;;  %2139 = vmatprep.subr.bf16.mxu1 %v1219_v7  ;;  %v1237_v6 = vunpack.c.h.s8.bf16 %v869_v54  ;;  %v1525_v7 = vunpack.c.h.s8.bf16 %v1013_v59 }
 0x2d7   : > { %2508 = vmatprep.subr.bf16.mxu0 %v1507_v50  ;;  %v871_v50 = vld [vmem:[#allocation8 + $0x208] sm:$0xff] }
 0x2d8   : > { %v1241_v23 = vunpack.c.h.s8.bf16 %v871_v50 }
 0x2d9   : > { %2140 = vmatpush1.bf16.msra.mxu1 %v1218_v11  ;;  %v1236_v11 = vunpack.c.h.s8.bf16 %v868_v2 }
 0x2da   : > { %2509 = vmatpush1.bf16.msra.mxu0 %v1506_v12  ;;  %2141 = vmatprep.subr.bf16.mxu1 %v1221_v13  ;;  %v1524_v12 = vunpack.c.h.s8.bf16 %v1012_v8  ;;  %v1239_v13 = vunpack.c.l.s8.bf16 %v871_v50 }
 0x2db   : > { %2510 = vmatprep.subr.bf16.mxu0 %v1509_v62  ;;  %v1527_v62 = vunpack.c.l.s8.bf16 %v1015_v9 }
 0x2dd   : > { %2142 = vmatpush1.bf16.msra.mxu1 %v1220_v17  ;;  %v1787_v17 = vcombine.high %v7218_v10, %v7218_v10 }
 0x2de   : > { %2511 = vmatpush1.bf16.msra.mxu0 %v1508_v18  ;;  %2143 = vmatprep.subr.bf16.mxu1 %v1223_v19  ;;  %v1769_v18 = vcombine.high %v7203_v30, %v7203_v30  ;;  %v7226_v19 = vrot.slane %v7197_v22, %v7126_v49  ;;  %v1917_v30 = vcombine.high %v7210_v40, %v7210_v40  ;;  %v1240_v22 = vunpack.c.h.s8.bf16 %v870_v14 }
 0x2df   : > { %2512 = vmatprep.subr.bf16.mxu0 %v1511_v20  ;;  %v1238_v20 = vunpack.c.l.s8.bf16 %v870_v14 }
 0x2e1   : > { %2144 = vmatpush1.bf16.msra.mxu1 %v1222_v24  ;;  %v1529_v24 = vunpack.c.h.s8.bf16 %v1015_v9 }
 0x2e2   : > { %2513 = vmatpush1.bf16.msra.mxu0 %v1510_v25  ;;  %2145 = vmatprep.subr.bf16.mxu1 %v1225_v26  ;;  %v873_v25 = vld [vmem:[#allocation8 + $0x218] sm:$0xff] }
 0x2e3   : > { %2514 = vmatprep.subr.bf16.mxu0 %v1513_v27  ;;  %v1017_v26 = vld [vmem:[#allocation8 + $0x698] sm:$0xff]  ;;  %v7229_v27 = vrot.slane %v1787_v17, %v7126_v49  ;;  %v1243_v29 = vunpack.c.l.s8.bf16 %v873_v25  ;;  %v1245_v35 = vunpack.c.h.s8.bf16 %v873_v25  ;;  %v880_v25 = vld [vmem:[#allocation8 + $0x250] sm:$0xff] }
 0x2e4   : > { %v1533_v38 = vunpack.c.h.s8.bf16 %v1017_v26  ;;  %v881_v17 = vld [vmem:[#allocation8 + $0x258] sm:$0xff] }
 0x2e5   : > { %2146 = vmatpush1.bf16.msra.mxu1 %v1224_v31  ;;  %v1531_v31 = vunpack.c.l.s8.bf16 %v1017_v26  ;;  %v1024_v26 = vld [vmem:[#allocation8 + $0x6d0] sm:$0xff] }
 0x2e6   : > { %2515 = vmatpush1.bf16.msra.mxu0 %v1512_v32  ;;  %2147 = vmatprep.subr.bf16.mxu1 %v1227_v33  ;;  %v872_v32 = vld [vmem:[#allocation8 + $0x210] sm:$0xff] }
 0x2e7   : > { %2516 = vmatprep.subr.bf16.mxu0 %v1515_v34  ;;  %v1016_v33 = vld [vmem:[#allocation8 + $0x690] sm:$0xff]  ;;  %v1242_v34 = vunpack.c.l.s8.bf16 %v872_v32 }
 0x2e8   : > { %v1530_v40 = vunpack.c.l.s8.bf16 %v1016_v33 }
 0x2e9   : > { %2148 = vmatpush1.bf16.msra.mxu1 %v1226_v39  ;;  %v875_v39 = vld [vmem:[#allocation8 + $0x228] sm:$0xff] }
 0x2ea   : > { %2517 = vmatpush1.bf16.msra.mxu0 %v1514_v43  ;;  %2149 = vmatprep.subr.bf16.mxu1 %v1229_v36  ;;  %v1019_v43 = vld [vmem:[#allocation8 + $0x6a8] sm:$0xff]  ;;  %v1244_v36 = vunpack.c.h.s8.bf16 %v872_v32  ;;  %v1247_v41 = vunpack.c.l.s8.bf16 %v875_v39  ;;  %v1249_v52 = vunpack.c.h.s8.bf16 %v875_v39  ;;  %v1026_v39 = vld [vmem:[#allocation8 + $0x6e0] sm:$0xff] }
 0x2eb   : > { %2518 = vmatprep.subr.bf16.mxu0 %v1517_v47  ;;  %v1532_v47 = vunpack.c.h.s8.bf16 %v1016_v33  ;;  %v1535_v42 = vunpack.c.l.s8.bf16 %v1019_v43  ;;  %v1537_v53 = vunpack.c.h.s8.bf16 %v1019_v43  ;;  %v1027_v32 = vld [vmem:[#allocation8 + $0x6e8] sm:$0xff]  ;;  %v1260_v33 = vunpack.c.h.s8.bf16 %v880_v25 }
 0x2ed   : > { %2150 = vmatpush1.bf16.msra.mxu1 %v1228_v45  ;;  %v874_v45 = vld [vmem:[#allocation8 + $0x220] sm:$0xff] }
 0x2ee   : > { %2519 = vmatpush1.bf16.msra.mxu0 %v1516_v46  ;;  %2151 = vmatprep.subr.bf16.mxu1 %v1231_v58  ;;  %v1018_v46 = vld [vmem:[#allocation8 + $0x6a0] sm:$0xff]  ;;  %v1246_v58 = vunpack.c.l.s8.bf16 %v874_v45 }
 0x2ef   : > { %2520 = vmatprep.subr.bf16.mxu0 %v1519_v48  ;;  %v1534_v48 = vunpack.c.l.s8.bf16 %v1018_v46 }
 0x2f1   : > { %2152 = vmatpush1.bf16.msra.mxu1 %v1230_v44  ;;  %v877_v44 = vld [vmem:[#allocation8 + $0x238] sm:$0xff] }
 0x2f2   : > { %2521 = vmatpush1.bf16.msra.mxu0 %v1518_v56  ;;  %2153 = vmatprep.subr.bf16.mxu1 %v1233_v57  ;;  %v1021_v56 = vld [vmem:[#allocation8 + $0x6b8] sm:$0xff]  ;;  %v1248_v57 = vunpack.c.h.s8.bf16 %v874_v45  ;;  %v1251_v54 = vunpack.c.l.s8.bf16 %v877_v44  ;;  %v1253_v2 = vunpack.c.h.s8.bf16 %v877_v44  ;;  %v1028_v44 = vld [vmem:[#allocation8 + $0x6f0] sm:$0xff] }
 0x2f3   : > { %2522 = vmatprep.subr.bf16.mxu0 %v1521_v0  ;;  %v1536_v0 = vunpack.c.h.s8.bf16 %v1018_v46  ;;  %v1539_v59 = vunpack.c.l.s8.bf16 %v1021_v56  ;;  %v1541_v8 = vunpack.c.h.s8.bf16 %v1021_v56  ;;  %v1029_v45 = vld [vmem:[#allocation8 + $0x6f8] sm:$0xff]  ;;  %v1870_v56 = vcombine.high %v7193_v15, %v7193_v15 }
 0x2f5   : > { %2154 = vmatpush1.bf16.msra.mxu1 %v1232_v60  ;;  %v876_v60 = vld [vmem:[#allocation8 + $0x230] sm:$0xff] }
 0x2f6   : > { %2523 = vmatpush1.bf16.msra.mxu0 %v1520_v61  ;;  %2155 = vmatprep.subr.bf16.mxu1 %v1235_v51  ;;  %v1020_v61 = vld [vmem:[#allocation8 + $0x6b0] sm:$0xff]  ;;  %v1250_v51 = vunpack.c.l.s8.bf16 %v876_v60 }
 0x2f7   : > { %2524 = vmatprep.subr.bf16.mxu0 %v1523_v1  ;;  %v1538_v1 = vunpack.c.l.s8.bf16 %v1020_v61 }
 0x2f9   : > { %2156 = vmatpush1.bf16.msra.mxu1 %v1234_v4  ;;  %v879_v4 = vld [vmem:[#allocation8 + $0x248] sm:$0xff] }
 0x2fa   : > { %2525 = vmatpush1.bf16.msra.mxu0 %v1522_v5  ;;  %2157 = vmatprep.subr.bf16.mxu1 %v1237_v6  ;;  %v1023_v5 = vld [vmem:[#allocation8 + $0x6c8] sm:$0xff]  ;;  %v1252_v6 = vunpack.c.h.s8.bf16 %v876_v60  ;;  %v1255_v50 = vunpack.c.l.s8.bf16 %v879_v4  ;;  %v1257_v14 = vunpack.c.h.s8.bf16 %v879_v4  ;;  %v886_v4 = vld [vmem:[#allocation8 + $0x280] sm:$0xff] }
 0x2fb   : > { %2526 = vmatprep.subr.bf16.mxu0 %v1525_v7  ;;  %v1540_v7 = vunpack.c.h.s8.bf16 %v1020_v61  ;;  %v1543_v9 = vunpack.c.l.s8.bf16 %v1023_v5  ;;  %v1545_v16 = vunpack.c.h.s8.bf16 %v1023_v5  ;;  %v887_v60 = vld [vmem:[#allocation8 + $0x288] sm:$0xff]  ;;  %v1030_v5 = vld [vmem:[#allocation8 + $0x700] sm:$0xff] }
 0x2fc   : > { %v1031_v61 = vld [vmem:[#allocation8 + $0x708] sm:$0xff]  ;;  %v1271_v15 = vunpack.c.l.s8.bf16 %v887_v60 }
 0x2fd   : > { %2158 = vmatpush1.bf16.msra.mxu1 %v1236_v11  ;;  %v878_v11 = vld [vmem:[#allocation8 + $0x240] sm:$0xff] }
 0x2fe   : > { %2527 = vmatpush1.bf16.msra.mxu0 %v1524_v12  ;;  %2168 = vmatprep.subr.bf16.mxu1 %v1239_v13  ;;  %v1022_v12 = vld [vmem:[#allocation8 + $0x6c0] sm:$0xff]  ;;  %v1254_v13 = vunpack.c.l.s8.bf16 %v878_v11 }
 0x2ff   : > { %2537 = vmatprep.subr.bf16.mxu0 %v1527_v62  ;;  %v1542_v62 = vunpack.c.l.s8.bf16 %v1022_v12 }
 0x300   : > { %2160 = vmatmul.mubr.bf16.vlgmr.msra.gmra.mrb[0].mxu1 %v1769_v18  ;;  %v1025_v18 = vld [vmem:[#allocation8 + $0x6d8] sm:$0xff] }
 0x301   : > { %2529 = vmatmul.mubr.bf16.vlgmr.msra.gmra.mrb[0].mxu0 %v7226_v19  ;;  %2169 = vmatpush1.bf16.msra.mxu1 %v1238_v20  ;;  %v1256_v20 = vunpack.c.h.s8.bf16 %v878_v11  ;;  %v1558_v11 = vunpack.c.l.s8.bf16 %v1030_v5 }
 0x302   : > { %2538 = vmatpush1.bf16.msra.mxu0 %v1526_v21  ;;  %2170 = vmatprep.subr.bf16.mxu1 %v1241_v23  ;;  %v1544_v21 = vunpack.c.h.s8.bf16 %v1022_v12  ;;  %v1259_v23 = vunpack.c.l.s8.bf16 %v881_v17  ;;  %v1273_v12 = vunpack.c.h.s8.bf16 %v887_v60 }
 0x303   : > { %2539 = vmatprep.subr.bf16.mxu0 %v1529_v24  ;;  %2200 = vmatprep.mubr.bf16.mxu1 %v7229_v27  ;;  %v1547_v24 = vunpack.c.l.s8.bf16 %v1025_v18 }
 0x304   : > { %2569 = vmatprep.mubr.bf16.mxu0 %v1917_v30  ;;  %v1258_v30 = vunpack.c.l.s8.bf16 %v880_v25 }
 0x305   : > { %2171 = vmatpush1.bf16.msra.mxu1 %v1240_v22  ;;  %v1546_v22 = vunpack.c.l.s8.bf16 %v1024_v26 }
 0x306   : > { %2540 = vmatpush1.bf16.msra.mxu0 %v1528_v28  ;;  %2172 = vmatprep.subr.bf16.mxu1 %v1243_v29  ;;  %v1261_v28 = vunpack.c.h.s8.bf16 %v881_v17  ;;  %v1549_v29 = vunpack.c.h.s8.bf16 %v1025_v18 }
 0x307   : > { %2541 = vmatprep.subr.bf16.mxu0 %v1531_v31  ;;  %v883_v31 = vld [vmem:[#allocation8 + $0x268] sm:$0xff] }
 0x309   : > { %2173 = vmatpush1.bf16.msra.mxu1 %v1242_v34  ;;  %v1548_v34 = vunpack.c.h.s8.bf16 %v1024_v26 }
 0x30a   : > { %2542 = vmatpush1.bf16.msra.mxu0 %v1530_v40  ;;  %2174 = vmatprep.subr.bf16.mxu1 %v1245_v35  ;;  %v1263_v40 = vunpack.c.l.s8.bf16 %v883_v31  ;;  %v1551_v35 = vunpack.c.l.s8.bf16 %v1027_v32 }
 0x30b   : > { %2543 = vmatprep.subr.bf16.mxu0 %v1533_v38  ;;  %v882_v38 = vld [vmem:[#allocation8 + $0x260] sm:$0xff] }
 0x30c   : > { %v1262_v43 = vunpack.c.l.s8.bf16 %v882_v38  ;;  %v1264_v46 = vunpack.c.h.s8.bf16 %v882_v38 }
 0x30d   : > { %2175 = vmatpush1.bf16.msra.mxu1 %v1244_v36  ;;  %v1550_v36 = vunpack.c.l.s8.bf16 %v1026_v39 }
 0x30e   : > { %2544 = vmatpush1.bf16.msra.mxu0 %v1532_v47  ;;  %2176 = vmatprep.subr.bf16.mxu1 %v1247_v41  ;;  %v1265_v47 = vunpack.c.h.s8.bf16 %v883_v31  ;;  %v1553_v41 = vunpack.c.h.s8.bf16 %v1027_v32 }
 0x30f   : > { %2545 = vmatprep.subr.bf16.mxu0 %v1535_v42  ;;  %v885_v42 = vld [vmem:[#allocation8 + $0x278] sm:$0xff] }
 0x311   : > { %2177 = vmatpush1.bf16.msra.mxu1 %v1246_v58  ;;  %v1552_v58 = vunpack.c.h.s8.bf16 %v1026_v39 }
 0x312   : > { %2546 = vmatpush1.bf16.msra.mxu0 %v1534_v48  ;;  %2178 = vmatprep.subr.bf16.mxu1 %v1249_v52  ;;  %v1267_v48 = vunpack.c.l.s8.bf16 %v885_v42  ;;  %v1555_v52 = vunpack.c.l.s8.bf16 %v1029_v45 }
 0x313   : > { %2547 = vmatprep.subr.bf16.mxu0 %v1537_v53  ;;  %v884_v53 = vld [vmem:[#allocation8 + $0x270] sm:$0xff] }
 0x315   : > { %2179 = vmatpush1.bf16.msra.mxu1 %v1248_v57  ;;  %v1266_v57 = vunpack.c.l.s8.bf16 %v884_v53 }
 0x316   : > { %2548 = vmatpush1.bf16.msra.mxu0 %v1536_v0  ;;  %2180 = vmatprep.subr.bf16.mxu1 %v1251_v54  ;;  %v1554_v0 = vunpack.c.l.s8.bf16 %v1028_v44  ;;  %v1269_v54 = vunpack.c.h.s8.bf16 %v885_v42 }
 0x317   : > { %2549 = vmatprep.subr.bf16.mxu0 %v1539_v59  ;;  %v1557_v59 = vunpack.c.h.s8.bf16 %v1029_v45 }
 0x319   : > { %2181 = vmatpush1.bf16.msra.mxu1 %v1250_v51  ;;  %v7238_v51 = vrot.slane %v1870_v56, %v7126_v49  ;;  %v895_v56 = vld [vmem:[#allocation8 + $0x2c8] sm:$0xff] }
 0x31a   : > { %2550 = vmatpush1.bf16.msra.mxu0 %v1538_v1  ;;  %2182 = vmatprep.subr.bf16.mxu1 %v1253_v2  ;;  %v1268_v1 = vunpack.c.h.s8.bf16 %v884_v53  ;;  %v1556_v2 = vunpack.c.h.s8.bf16 %v1028_v44 }
 0x31b   : > { %2551 = vmatprep.subr.bf16.mxu0 %v1541_v8  ;;  %v1559_v8 = vunpack.c.l.s8.bf16 %v1031_v61 }
 0x31d   : > { %2183 = vmatpush1.bf16.msra.mxu1 %v1252_v6  ;;  %v1886_v6 = vcombine.high %v7238_v51, %v7238_v51 }
 0x31e   : > { %2552 = vmatpush1.bf16.msra.mxu0 %v1540_v7  ;;  %2184 = vmatprep.subr.bf16.mxu1 %v1255_v50  ;;  %v7244_v7 = vrot.slane %v7218_v10, %v7126_v49  ;;  %v1915_v50 = vcombine.high %v7226_v19, %v7226_v19  ;;  %v1272_v10 = vunpack.c.h.s8.bf16 %v886_v4  ;;  %v1560_v19 = vunpack.c.h.s8.bf16 %v1030_v5  ;;  %v897_v5 = vld [vmem:[#allocation8 + $0x2d8] sm:$0xff] }
 0x31f   : > { %2553 = vmatprep.subr.bf16.mxu0 %v1543_v9  ;;  %v1270_v9 = vunpack.c.l.s8.bf16 %v886_v4  ;;  %v7251_v17 = vrot.slane %v1886_v6, %v7126_v49  ;;  %v1041_v6 = vld [vmem:[#allocation8 + $0x758] sm:$0xff] }
 0x321   : > { %2185 = vmatpush1.bf16.msra.mxu1 %v1254_v13  ;;  %v1561_v13 = vunpack.c.h.s8.bf16 %v1031_v61  ;;  %v894_v61 = vld [vmem:[#allocation8 + $0x2c0] sm:$0xff] }
 0x322   : > { %2554 = vmatpush1.bf16.msra.mxu0 %v1542_v62  ;;  %2186 = vmatprep.subr.bf16.mxu1 %v1257_v14  ;;  %v889_v62 = vld [vmem:[#allocation8 + $0x298] sm:$0xff] }
 0x323   : > { %2555 = vmatprep.subr.bf16.mxu0 %v1545_v16  ;;  %v1033_v14 = vld [vmem:[#allocation8 + $0x718] sm:$0xff]  ;;  %v1819_v16 = vcombine.high %v7229_v27, %v7229_v27  ;;  %v1275_v18 = vunpack.c.l.s8.bf16 %v889_v62  ;;  %v1277_v25 = vunpack.c.h.s8.bf16 %v889_v62  ;;  %v1040_v62 = vld [vmem:[#allocation8 + $0x750] sm:$0xff] }
 0x324   : > { %v1565_v26 = vunpack.c.h.s8.bf16 %v1033_v14 }
 0x325   : > { %2187 = vmatpush1.bf16.msra.mxu1 %v1256_v20  ;;  %v1563_v20 = vunpack.c.l.s8.bf16 %v1033_v14 }
 0x326   : > { %2556 = vmatpush1.bf16.msra.mxu0 %v1544_v21  ;;  %2188 = vmatprep.subr.bf16.mxu1 %v1259_v23  ;;  %v888_v21 = vld [vmem:[#allocation8 + $0x290] sm:$0xff] }
 0x327   : > { %2557 = vmatprep.subr.bf16.mxu0 %v1547_v24  ;;  %v1032_v23 = vld [vmem:[#allocation8 + $0x710] sm:$0xff]  ;;  %v1274_v27 = vunpack.c.l.s8.bf16 %v888_v21 }
 0x328   : > { %v1562_v24 = vunpack.c.l.s8.bf16 %v1032_v23 }
 0x329   : > { %2189 = vmatpush1.bf16.msra.mxu1 %v1258_v30  ;;  %v891_v30 = vld [vmem:[#allocation8 + $0x2a8] sm:$0xff] }
 0x32a   : > { %2558 = vmatpush1.bf16.msra.mxu0 %v1546_v22  ;;  %2190 = vmatprep.subr.bf16.mxu1 %v1261_v28  ;;  %v1035_v22 = vld [vmem:[#allocation8 + $0x728] sm:$0xff]  ;;  %v1276_v28 = vunpack.c.h.s8.bf16 %v888_v21  ;;  %v1279_v31 = vunpack.c.l.s8.bf16 %v891_v30  ;;  %v1281_v38 = vunpack.c.h.s8.bf16 %v891_v30 }
 0x32b   : > { %2559 = vmatprep.subr.bf16.mxu0 %v1549_v29  ;;  %v1564_v29 = vunpack.c.h.s8.bf16 %v1032_v23  ;;  %v1567_v32 = vunpack.c.l.s8.bf16 %v1035_v22  ;;  %v1569_v39 = vunpack.c.h.s8.bf16 %v1035_v22  ;;  %v1580_v23 = vunpack.c.h.s8.bf16 %v1040_v62 }
 0x32d   : > { %2191 = vmatpush1.bf16.msra.mxu1 %v1260_v33  ;;  %v890_v33 = vld [vmem:[#allocation8 + $0x2a0] sm:$0xff] }
 0x32e   : > { %2560 = vmatpush1.bf16.msra.mxu0 %v1548_v34  ;;  %2192 = vmatprep.subr.bf16.mxu1 %v1263_v40  ;;  %v1034_v34 = vld [vmem:[#allocation8 + $0x720] sm:$0xff]  ;;  %v1278_v40 = vunpack.c.l.s8.bf16 %v890_v33 }
 0x32f   : > { %2561 = vmatprep.subr.bf16.mxu0 %v1551_v35  ;;  %v1566_v35 = vunpack.c.l.s8.bf16 %v1034_v34 }
 0x331   : > { %2193 = vmatpush1.bf16.msra.mxu1 %v1262_v43  ;;  %v893_v43 = vld [vmem:[#allocation8 + $0x2b8] sm:$0xff] }
 0x332   : > { %2562 = vmatpush1.bf16.msra.mxu0 %v1550_v36  ;;  %2194 = vmatprep.subr.bf16.mxu1 %v1265_v47  ;;  %v1037_v36 = vld [vmem:[#allocation8 + $0x738] sm:$0xff]  ;;  %v1280_v47 = vunpack.c.h.s8.bf16 %v890_v33  ;;  %v1283_v42 = vunpack.c.l.s8.bf16 %v893_v43  ;;  %v1285_v53 = vunpack.c.h.s8.bf16 %v893_v43  ;;  %v1772_v43 = vcombine.high %v7214_v3, %v7214_v3 }
 0x333   : > { %2563 = vmatprep.subr.bf16.mxu0 %v1553_v41  ;;  %v1568_v41 = vunpack.c.h.s8.bf16 %v1034_v34  ;;  %v1571_v45 = vunpack.c.l.s8.bf16 %v1037_v36  ;;  %v1573_v44 = vunpack.c.h.s8.bf16 %v1037_v36 }
 0x335   : > { %2195 = vmatpush1.bf16.msra.mxu1 %v1264_v46  ;;  %v892_v46 = vld [vmem:[#allocation8 + $0x2b0] sm:$0xff] }
 0x336   : > { %2564 = vmatpush1.bf16.msra.mxu0 %v1552_v58  ;;  %2196 = vmatprep.subr.bf16.mxu1 %v1267_v48  ;;  %v1036_v58 = vld [vmem:[#allocation8 + $0x730] sm:$0xff]  ;;  %v1282_v48 = vunpack.c.l.s8.bf16 %v892_v46 }
 0x337   : > { %2565 = vmatprep.subr.bf16.mxu0 %v1555_v52  ;;  %v1570_v52 = vunpack.c.l.s8.bf16 %v1036_v58 }
 0x339   : > { %2197 = vmatpush1.bf16.msra.mxu1 %v1266_v57  ;;  %v1039_v57 = vld [vmem:[#allocation8 + $0x748] sm:$0xff] }
 0x33a   : > { %2566 = vmatpush1.bf16.msra.mxu0 %v1554_v0  ;;  %2198 = vmatprep.subr.bf16.mxu1 %v1269_v54  ;;  %v1284_v0 = vunpack.c.h.s8.bf16 %v892_v46  ;;  %v1572_v54 = vunpack.c.h.s8.bf16 %v1036_v58  ;;  %v1575_v60 = vunpack.c.l.s8.bf16 %v1039_v57  ;;  %v1577_v4 = vunpack.c.h.s8.bf16 %v1039_v57  ;;  %v1047_v46 = vld [vmem:[#allocation8 + $0x788] sm:$0xff] }
 0x33b   : > { %2567 = vmatprep.subr.bf16.mxu0 %v1557_v59  ;;  %v1287_v59 = vunpack.c.l.s8.bf16 %v895_v56  ;;  %v7258_v58 = vrot.slane %v1772_v43, %v7126_v49  ;;  %v1055_v43 = vld [vmem:[#allocation8 + $0x7c8] sm:$0xff] }
 0x33d   : > { %2199 = vmatpush1.bf16.msra.mxu1 %v1268_v1  ;;  %v1038_v1 = vld [vmem:[#allocation8 + $0x740] sm:$0xff]  ;;  %v1788_v57 = vcombine.high %v7258_v58, %v7258_v58 }
 0x33e   : > { %2568 = vmatpush1.bf16.msra.mxu0 %v1556_v2  ;;  %2209 = vmatprep.subr.bf16.mxu1 %v1271_v15  ;;  %v1286_v2 = vunpack.c.l.s8.bf16 %v894_v61  ;;  %v1574_v15 = vunpack.c.l.s8.bf16 %v1038_v1 }
 0x33f   : > { %2578 = vmatprep.subr.bf16.mxu0 %v1559_v8  ;;  %v1289_v8 = vunpack.c.h.s8.bf16 %v895_v56  ;;  %v1046_v56 = vld [vmem:[#allocation8 + $0x780] sm:$0xff] }
 0x340   : > { %2201 = vmatmul.mubr.bf16.vlgmr.msra.gmra.mrb[0].mxu1 %v7244_v7 }
 0x341   : > { %2570 = vmatmul.mubr.bf16.vlgmr.msra.gmra.mrb[0].mxu0 %v1915_v50  ;;  %2210 = vmatpush1.bf16.msra.mxu1 %v1270_v9  ;;  %v1288_v50 = vunpack.c.h.s8.bf16 %v894_v61  ;;  %v1576_v9 = vunpack.c.h.s8.bf16 %v1038_v1  ;;  %v1593_v1 = vunpack.c.h.s8.bf16 %v1047_v46 }
 0x342   : > { %2579 = vmatpush1.bf16.msra.mxu0 %v1558_v11  ;;  %2211 = vmatprep.subr.bf16.mxu1 %v1273_v12  ;;  %v1291_v11 = vunpack.c.l.s8.bf16 %v897_v5  ;;  %v1579_v12 = vunpack.c.l.s8.bf16 %v1041_v6 }
 0x343   : > { %2580 = vmatprep.subr.bf16.mxu0 %v1561_v13  ;;  %2241 = vmatprep.mubr.bf16.mxu1 %v1819_v16  ;;  %v896_v13 = vld [vmem:[#allocation8 + $0x2d0] sm:$0xff]  ;;  %v1578_v16 = vunpack.c.l.s8.bf16 %v1040_v62  ;;  %v907_v62 = vld [vmem:[#allocation8 + $0x328] sm:$0xff] }
 0x344   : > { %2610 = vmatprep.mubr.bf16.mxu0 %v7251_v17  ;;  %v1290_v14 = vunpack.c.l.s8.bf16 %v896_v13  ;;  %v1292_v21 = vunpack.c.h.s8.bf16 %v896_v13 }
 0x345   : > { %2212 = vmatpush1.bf16.msra.mxu1 %v1272_v10  ;;  %v1293_v10 = vunpack.c.h.s8.bf16 %v897_v5 }
 0x346   : > { %2581 = vmatpush1.bf16.msra.mxu0 %v1560_v19  ;;  %2213 = vmatprep.subr.bf16.mxu1 %v1275_v18  ;;  %v1581_v19 = vunpack.c.h.s8.bf16 %v1041_v6  ;;  %v899_v18 = vld [vmem:[#allocation8 + $0x2e8] sm:$0xff] }
 0x347   : > { %2582 = vmatprep.subr.bf16.mxu0 %v1563_v20  ;;  %v1043_v20 = vld [vmem:[#allocation8 + $0x768] sm:$0xff] }
 0x349   : > { %2214 = vmatpush1.bf16.msra.mxu1 %v1274_v27  ;;  %v1295_v27 = vunpack.c.l.s8.bf16 %v899_v18 }
 0x34a   : > { %2583 = vmatpush1.bf16.msra.mxu0 %v1562_v24  ;;  %2215 = vmatprep.subr.bf16.mxu1 %v1277_v25  ;;  %v1583_v24 = vunpack.c.l.s8.bf16 %v1043_v20  ;;  %v898_v25 = vld [vmem:[#allocation8 + $0x2e0] sm:$0xff] }
 0x34b   : > { %2584 = vmatprep.subr.bf16.mxu0 %v1565_v26  ;;  %v1042_v26 = vld [vmem:[#allocation8 + $0x760] sm:$0xff]  ;;  %v1294_v30 = vunpack.c.l.s8.bf16 %v898_v25  ;;  %v1296_v33 = vunpack.c.h.s8.bf16 %v898_v25 }
 0x34c   : > { %v1582_v22 = vunpack.c.l.s8.bf16 %v1042_v26  ;;  %v1584_v34 = vunpack.c.h.s8.bf16 %v1042_v26  ;;  %v909_v26 = vld [vmem:[#allocation8 + $0x338] sm:$0xff] }
 0x34d   : > { %2216 = vmatpush1.bf16.msra.mxu1 %v1276_v28  ;;  %v1297_v28 = vunpack.c.h.s8.bf16 %v899_v18 }
 0x34e   : > { %2585 = vmatpush1.bf16.msra.mxu0 %v1564_v29  ;;  %2217 = vmatprep.subr.bf16.mxu1 %v1279_v31  ;;  %v1585_v29 = vunpack.c.h.s8.bf16 %v1043_v20  ;;  %v901_v31 = vld [vmem:[#allocation8 + $0x2f8] sm:$0xff]  ;;  %v906_v20 = vld [vmem:[#allocation8 + $0x320] sm:$0xff] }
 0x34f   : > { %2586 = vmatprep.subr.bf16.mxu0 %v1567_v32  ;;  %v1045_v32 = vld [vmem:[#allocation8 + $0x778] sm:$0xff] }
 0x351   : > { %2218 = vmatpush1.bf16.msra.mxu1 %v1278_v40  ;;  %v1299_v40 = vunpack.c.l.s8.bf16 %v901_v31 }
 0x352   : > { %2587 = vmatpush1.bf16.msra.mxu0 %v1566_v35  ;;  %2219 = vmatprep.subr.bf16.mxu1 %v1281_v38  ;;  %v1587_v35 = vunpack.c.l.s8.bf16 %v1045_v32  ;;  %v900_v38 = vld [vmem:[#allocation8 + $0x2f0] sm:$0xff] }
 0x353   : > { %2588 = vmatprep.subr.bf16.mxu0 %v1569_v39  ;;  %v1044_v39 = vld [vmem:[#allocation8 + $0x770] sm:$0xff]  ;;  %v1298_v36 = vunpack.c.l.s8.bf16 %v900_v38 }
 0x355   : > { %2220 = vmatpush1.bf16.msra.mxu1 %v1280_v47  ;;  %v1586_v47 = vunpack.c.l.s8.bf16 %v1044_v39 }
 0x356   : > { %2589 = vmatpush1.bf16.msra.mxu0 %v1568_v41  ;;  %2221 = vmatprep.subr.bf16.mxu1 %v1283_v42  ;;  %v1301_v41 = vunpack.c.h.s8.bf16 %v901_v31  ;;  %v1589_v42 = vunpack.c.h.s8.bf16 %v1045_v32  ;;  %v908_v32 = vld [vmem:[#allocation8 + $0x330] sm:$0xff] }
 0x357   : > { %2590 = vmatprep.subr.bf16.mxu0 %v1571_v45  ;;  %v903_v45 = vld [vmem:[#allocation8 + $0x308] sm:$0xff] }
 0x358   : > { %v1303_v3 = vunpack.c.l.s8.bf16 %v903_v45  ;;  %v1305_v61 = vunpack.c.h.s8.bf16 %v903_v45  ;;  %v910_v45 = vld [vmem:[#allocation8 + $0x340] sm:$0xff] }
 0x359   : > { %2222 = vmatpush1.bf16.msra.mxu1 %v1282_v48  ;;  %v1300_v48 = vunpack.c.h.s8.bf16 %v900_v38 }
 0x35a   : > { %2591 = vmatpush1.bf16.msra.mxu0 %v1570_v52  ;;  %2223 = vmatprep.subr.bf16.mxu1 %v1285_v53  ;;  %v1588_v52 = vunpack.c.h.s8.bf16 %v1044_v39  ;;  %v1591_v53 = vunpack.c.l.s8.bf16 %v1047_v46  ;;  %v911_v39 = vld [vmem:[#allocation8 + $0x348] sm:$0xff]  ;;  %v1054_v46 = vld [vmem:[#allocation8 + $0x7c0] sm:$0xff] }
 0x35b   : > { %2592 = vmatprep.subr.bf16.mxu0 %v1573_v44  ;;  %v902_v44 = vld [vmem:[#allocation8 + $0x300] sm:$0xff] }
 0x35d   : > { %2224 = vmatpush1.bf16.msra.mxu1 %v1284_v0  ;;  %v1817_v0 = vcombine.high %v7244_v7, %v7244_v7  ;;  %v1918_v7 = vcombine.high %v7251_v17, %v7251_v17 }
 0x35e   : > { %2593 = vmatpush1.bf16.msra.mxu0 %v1572_v54  ;;  %2225 = vmatprep.subr.bf16.mxu1 %v1287_v59  ;;  %v7266_v54 = vrot.slane %v7238_v51, %v7126_v49  ;;  %v1302_v59 = vunpack.c.l.s8.bf16 %v902_v44  ;;  %v1304_v51 = vunpack.c.h.s8.bf16 %v902_v44  ;;  %v913_v44 = vld [vmem:[#allocation8 + $0x358] sm:$0xff] }
 0x35f   : > { %2594 = vmatprep.subr.bf16.mxu0 %v1575_v60  ;;  %v1590_v60 = vunpack.c.l.s8.bf16 %v1046_v56 }
 0x361   : > { %2226 = vmatpush1.bf16.msra.mxu1 %v1286_v2  ;;  %v905_v2 = vld [vmem:[#allocation8 + $0x318] sm:$0xff] }
 0x362   : > { %2595 = vmatpush1.bf16.msra.mxu0 %v1574_v15  ;;  %2227 = vmatprep.subr.bf16.mxu1 %v1289_v8  ;;  %v1049_v15 = vld [vmem:[#allocation8 + $0x798] sm:$0xff]  ;;  %v7269_v8 = vrot.slane %v1788_v57, %v7126_v49  ;;  %v1307_v5 = vunpack.c.l.s8.bf16 %v905_v2  ;;  %v1320_v57 = vunpack.c.h.s8.bf16 %v910_v45 }
 0x363   : > { %2596 = vmatprep.subr.bf16.mxu0 %v1577_v4  ;;  %v1592_v4 = vunpack.c.h.s8.bf16 %v1046_v56  ;;  %v1595_v6 = vunpack.c.l.s8.bf16 %v1049_v15  ;;  %v1597_v13 = vunpack.c.h.s8.bf16 %v1049_v15  ;;  %v1057_v56 = vld [vmem:[#allocation8 + $0x7d8] sm:$0xff] }
 0x365   : > { %2228 = vmatpush1.bf16.msra.mxu1 %v1288_v50  ;;  %v904_v50 = vld [vmem:[#allocation8 + $0x310] sm:$0xff] }
 0x366   : > { %2597 = vmatpush1.bf16.msra.mxu0 %v1576_v9  ;;  %2229 = vmatprep.subr.bf16.mxu1 %v1291_v11  ;;  %v1048_v9 = vld [vmem:[#allocation8 + $0x790] sm:$0xff]  ;;  %v1306_v11 = vunpack.c.l.s8.bf16 %v904_v50 }
 0x367   : > { %2598 = vmatprep.subr.bf16.mxu0 %v1579_v12  ;;  %v1594_v17 = vunpack.c.l.s8.bf16 %v1048_v9  ;;  %v1309_v12 = vunpack.c.h.s8.bf16 %v905_v2 }
 0x369   : > { %2230 = vmatpush1.bf16.msra.mxu1 %v1290_v14  ;;  %v1051_v14 = vld [vmem:[#allocation8 + $0x7a8] sm:$0xff] }
 0x36a   : > { %2599 = vmatpush1.bf16.msra.mxu0 %v1578_v16  ;;  %2231 = vmatprep.subr.bf16.mxu1 %v1293_v10  ;;  %v1308_v16 = vunpack.c.h.s8.bf16 %v904_v50  ;;  %v1596_v10 = vunpack.c.h.s8.bf16 %v1048_v9  ;;  %v1599_v18 = vunpack.c.l.s8.bf16 %v1051_v14  ;;  %v1601_v25 = vunpack.c.h.s8.bf16 %v1051_v14 }
 0x36b   : > { %2600 = vmatprep.subr.bf16.mxu0 %v1581_v19  ;;  %v1311_v19 = vunpack.c.l.s8.bf16 %v907_v62 }
 0x36d   : > { %2232 = vmatpush1.bf16.msra.mxu1 %v1292_v21  ;;  %v1050_v21 = vld [vmem:[#allocation8 + $0x7a0] sm:$0xff] }
 0x36e   : > { %2601 = vmatpush1.bf16.msra.mxu0 %v1580_v23  ;;  %2233 = vmatprep.subr.bf16.mxu1 %v1295_v27  ;;  %v1310_v23 = vunpack.c.l.s8.bf16 %v906_v20  ;;  %v1598_v27 = vunpack.c.l.s8.bf16 %v1050_v21 }
 0x36f   : > { %2602 = vmatprep.subr.bf16.mxu0 %v1583_v24  ;;  %v1313_v24 = vunpack.c.h.s8.bf16 %v907_v62 }
 0x371   : > { %2234 = vmatpush1.bf16.msra.mxu1 %v1294_v30  ;;  %v1053_v30 = vld [vmem:[#allocation8 + $0x7b8] sm:$0xff] }
 0x372   : > { %2603 = vmatpush1.bf16.msra.mxu0 %v1582_v22  ;;  %2235 = vmatprep.subr.bf16.mxu1 %v1297_v28  ;;  %v1312_v22 = vunpack.c.h.s8.bf16 %v906_v20  ;;  %v1600_v28 = vunpack.c.h.s8.bf16 %v1050_v21  ;;  %v1603_v31 = vunpack.c.l.s8.bf16 %v1053_v30  ;;  %v1605_v38 = vunpack.c.h.s8.bf16 %v1053_v30 }
 0x373   : > { %2604 = vmatprep.subr.bf16.mxu0 %v1585_v29  ;;  %v1315_v29 = vunpack.c.l.s8.bf16 %v909_v26 }
 0x375   : > { %2236 = vmatpush1.bf16.msra.mxu1 %v1296_v33  ;;  %v1052_v33 = vld [vmem:[#allocation8 + $0x7b0] sm:$0xff] }
 0x376   : > { %2605 = vmatpush1.bf16.msra.mxu0 %v1584_v34  ;;  %2237 = vmatprep.subr.bf16.mxu1 %v1299_v40  ;;  %v1314_v34 = vunpack.c.l.s8.bf16 %v908_v32  ;;  %v1602_v40 = vunpack.c.l.s8.bf16 %v1052_v33 }
 0x377   : > { %2606 = vmatprep.subr.bf16.mxu0 %v1587_v35  ;;  %v1317_v35 = vunpack.c.h.s8.bf16 %v909_v26 }
 0x379   : > { %2238 = vmatpush1.bf16.msra.mxu1 %v1298_v36  ;;  %v1316_v36 = vunpack.c.h.s8.bf16 %v908_v32 }
 0x37a   : > { %2607 = vmatpush1.bf16.msra.mxu0 %v1586_v47  ;;  %2239 = vmatprep.subr.bf16.mxu1 %v1301_v41  ;;  %v1604_v47 = vunpack.c.h.s8.bf16 %v1052_v33  ;;  %v1319_v41 = vunpack.c.l.s8.bf16 %v911_v39 }
 0x37b   : > { %2608 = vmatprep.subr.bf16.mxu0 %v1589_v42  ;;  %v1607_v42 = vunpack.c.l.s8.bf16 %v1055_v43 }
 0x37d   : > { %2240 = vmatpush1.bf16.msra.mxu1 %v1300_v48  ;;  %v1318_v48 = vunpack.c.l.s8.bf16 %v910_v45 }
 0x37e   : > { %2609 = vmatpush1.bf16.msra.mxu0 %v1588_v52  ;;  %2250 = vmatprep.subr.bf16.mxu1 %v1303_v3  ;;  %v1606_v52 = vunpack.c.l.s8.bf16 %v1054_v46  ;;  %v1321_v3 = vunpack.c.h.s8.bf16 %v911_v39  ;;  %v1062_v39 = vld [vmem:[#allocation8 + $0x800] sm:$0xff] }
 0x37f   : > { %2619 = vmatprep.subr.bf16.mxu0 %v1591_v53  ;;  %v1609_v53 = vunpack.c.h.s8.bf16 %v1055_v43 }
 0x380   : > { %2242 = vmatmul.mubr.bf16.vlgmr.msra.gmra.mrb[0].mxu1 %v1817_v0  ;;  %v1608_v0 = vunpack.c.h.s8.bf16 %v1054_v46 }
 0x381   : > { %2611 = vmatmul.mubr.bf16.vlgmr.msra.gmra.mrb[0].mxu0 %v7266_v54  ;;  %2251 = vmatpush1.bf16.msra.mxu1 %v1302_v59  ;;  %v1323_v59 = vunpack.c.l.s8.bf16 %v913_v44 }
 0x382   : > { %2620 = vmatpush1.bf16.msra.mxu0 %v1590_v60  ;;  %2252 = vmatprep.subr.bf16.mxu1 %v1305_v61  ;;  %v1611_v60 = vunpack.c.l.s8.bf16 %v1057_v56  ;;  %v912_v61 = vld [vmem:[#allocation8 + $0x350] sm:$0xff] }
 0x383   : > { %2621 = vmatprep.subr.bf16.mxu0 %v1593_v1  ;;  %2282 = vmatprep.mubr.bf16.mxu1 %v7269_v8  ;;  %v1056_v1 = vld [vmem:[#allocation8 + $0x7d0] sm:$0xff]  ;;  %v1322_v2 = vunpack.c.l.s8.bf16 %v912_v61 }
 0x384   : > { %2651 = vmatprep.mubr.bf16.mxu0 %v1918_v7  ;;  %v1610_v15 = vunpack.c.l.s8.bf16 %v1056_v1  ;;  %v1325_v7 = vunpack.c.h.s8.bf16 %v913_v44  ;;  %v1612_v50 = vunpack.c.h.s8.bf16 %v1056_v1  ;;  %v923_v1 = vld [vmem:[#allocation8 + $0x3a8] sm:$0xff] }
 0x385   : > { %2253 = vmatpush1.bf16.msra.mxu1 %v1304_v51  ;;  %v1613_v51 = vunpack.c.h.s8.bf16 %v1057_v56 }
 0x386   : > { %2622 = vmatpush1.bf16.msra.mxu0 %v1592_v4  ;;  %2254 = vmatprep.subr.bf16.mxu1 %v1307_v5  ;;  %v915_v4 = vld [vmem:[#allocation8 + $0x368] sm:$0xff] }
 0x387   : > { %2623 = vmatprep.subr.bf16.mxu0 %v1595_v6  ;;  %v1059_v5 = vld [vmem:[#allocation8 + $0x7e8] sm:$0xff]  ;;  %v1324_v6 = vunpack.c.h.s8.bf16 %v912_v61  ;;  %v1327_v9 = vunpack.c.l.s8.bf16 %v915_v4  ;;  %v1329_v14 = vunpack.c.h.s8.bf16 %v915_v4 }
 0x389   : > { %2255 = vmatpush1.bf16.msra.mxu1 %v1306_v11  ;;  %v1615_v11 = vunpack.c.l.s8.bf16 %v1059_v5 }
 0x38a   : > { %2624 = vmatpush1.bf16.msra.mxu0 %v1594_v17  ;;  %2256 = vmatprep.subr.bf16.mxu1 %v1309_v12  ;;  %v914_v17 = vld [vmem:[#allocation8 + $0x360] sm:$0xff] }
 0x38b   : > { %2625 = vmatprep.subr.bf16.mxu0 %v1597_v13  ;;  %v1058_v12 = vld [vmem:[#allocation8 + $0x7e0] sm:$0xff]  ;;  %v1326_v13 = vunpack.c.l.s8.bf16 %v914_v17 }
 0x38c   : > { %v1614_v62 = vunpack.c.l.s8.bf16 %v1058_v12  ;;  %v1616_v20 = vunpack.c.h.s8.bf16 %v1058_v12  ;;  %v925_v12 = vld [vmem:[#allocation8 + $0x3b8] sm:$0xff] }
 0x38d   : > { %2257 = vmatpush1.bf16.msra.mxu1 %v1308_v16  ;;  %v1617_v16 = vunpack.c.h.s8.bf16 %v1059_v5  ;;  %v922_v5 = vld [vmem:[#allocation8 + $0x3a0] sm:$0xff] }
 0x38e   : > { %2626 = vmatpush1.bf16.msra.mxu0 %v1596_v10  ;;  %2258 = vmatprep.subr.bf16.mxu1 %v1311_v19  ;;  %v917_v10 = vld [vmem:[#allocation8 + $0x378] sm:$0xff] }
 0x38f   : > { %2627 = vmatprep.subr.bf16.mxu0 %v1599_v18  ;;  %v1061_v19 = vld [vmem:[#allocation8 + $0x7f8] sm:$0xff]  ;;  %v1328_v18 = vunpack.c.h.s8.bf16 %v914_v17  ;;  %v1331_v21 = vunpack.c.l.s8.bf16 %v917_v10 }
 0x391   : > { %2259 = vmatpush1.bf16.msra.mxu1 %v1310_v23  ;;  %v1619_v23 = vunpack.c.l.s8.bf16 %v1061_v19 }
 0x392   : > { %2628 = vmatpush1.bf16.msra.mxu0 %v1598_v27  ;;  %2260 = vmatprep.subr.bf16.mxu1 %v1313_v24  ;;  %v916_v27 = vld [vmem:[#allocation8 + $0x370] sm:$0xff] }
 0x393   : > { %2629 = vmatprep.subr.bf16.mxu0 %v1601_v25  ;;  %v1060_v24 = vld [vmem:[#allocation8 + $0x7f0] sm:$0xff]  ;;  %v7275_v25 = vld [vmem:[#allocation3 + $0x20] sm:$0x3f]  ;;  %v1330_v26 = vunpack.c.l.s8.bf16 %v916_v27  ;;  %v1332_v33 = vunpack.c.h.s8.bf16 %v916_v27 }
 0x394   : > { %v1618_v30 = vunpack.c.l.s8.bf16 %v1060_v24  ;;  %v7279_v32 = vrot.slane %v7275_v25, %v7126_v49 }
 0x395   : > { %2261 = vmatpush1.bf16.msra.mxu1 %v1312_v22  ;;  %v1333_v22 = vunpack.c.h.s8.bf16 %v917_v10 }
 0x396   : > { %2630 = vmatpush1.bf16.msra.mxu0 %v1600_v28  ;;  %2262 = vmatprep.subr.bf16.mxu1 %v1315_v29  ;;  %v1621_v28 = vunpack.c.h.s8.bf16 %v1061_v19  ;;  %v919_v29 = vld [vmem:[#allocation8 + $0x388] sm:$0xff]  ;;  %v1934_v43 = vcombine.high %v7279_v32, %v7279_v32  ;;  %v924_v19 = vld [vmem:[#allocation8 + $0x3b0] sm:$0xff] }
 0x397   : > { %2631 = vmatprep.subr.bf16.mxu0 %v1603_v31  ;;  %v1063_v31 = vld [vmem:[#allocation8 + $0x808] sm:$0xff]  ;;  %v1337_v45 = vunpack.c.h.s8.bf16 %v919_v29 }
 0x398   : > { %v1625_v46 = vunpack.c.h.s8.bf16 %v1063_v31 }
 0x399   : > { %2263 = vmatpush1.bf16.msra.mxu1 %v1314_v34  ;;  %v1620_v34 = vunpack.c.h.s8.bf16 %v1060_v24  ;;  %v927_v24 = vld [vmem:[#allocation8 + $0x3c8] sm:$0xff] }
 0x39a   : > { %2632 = vmatpush1.bf16.msra.mxu0 %v1602_v40  ;;  %2264 = vmatprep.subr.bf16.mxu1 %v1317_v35  ;;  %v1335_v40 = vunpack.c.l.s8.bf16 %v919_v29  ;;  %v1623_v35 = vunpack.c.l.s8.bf16 %v1063_v31  ;;  %v926_v31 = vld [vmem:[#allocation8 + $0x3c0] sm:$0xff] }
 0x39b   : > { %2633 = vmatprep.subr.bf16.mxu0 %v1605_v38  ;;  %v918_v38 = vld [vmem:[#allocation8 + $0x380] sm:$0xff] }
 0x39d   : > { %2265 = vmatpush1.bf16.msra.mxu1 %v1316_v36  ;;  %v7285_v36 = vrot.slane %v7258_v58, %v7126_v49  ;;  %v1336_v58 = vunpack.c.h.s8.bf16 %v918_v38 }
 0x39e   : > { %2634 = vmatpush1.bf16.msra.mxu0 %v1604_v47  ;;  %2266 = vmatprep.subr.bf16.mxu1 %v1319_v41  ;;  %v1916_v47 = vcombine.high %v7266_v54, %v7266_v54  ;;  %v1334_v41 = vunpack.c.l.s8.bf16 %v918_v38  ;;  %v1624_v54 = vunpack.c.h.s8.bf16 %v1062_v39 }
 0x39f   : > { %2635 = vmatprep.subr.bf16.mxu0 %v1607_v42  ;;  %v1622_v42 = vunpack.c.l.s8.bf16 %v1062_v39  ;;  %v929_v39 = vld [vmem:[#allocation8 + $0x3d8] sm:$0xff] }
 0x3a1   : > { %2267 = vmatpush1.bf16.msra.mxu1 %v1318_v48  ;;  %v921_v48 = vld [vmem:[#allocation8 + $0x398] sm:$0xff] }
 0x3a2   : > { %2636 = vmatpush1.bf16.msra.mxu0 %v1606_v52  ;;  %2268 = vmatprep.subr.bf16.mxu1 %v1321_v3  ;;  %v1065_v52 = vld [vmem:[#allocation8 + $0x818] sm:$0xff]  ;;  %v1820_v3 = vcombine.high %v7269_v8, %v7269_v8  ;;  %v1339_v44 = vunpack.c.l.s8.bf16 %v921_v48 }
 0x3a3   : > { %2637 = vmatprep.subr.bf16.mxu0 %v1609_v53  ;;  %v7292_v53 = vrot.slane %v1934_v43, %v7126_v49  ;;  %v1627_v56 = vunpack.c.l.s8.bf16 %v1065_v52  ;;  %v1629_v61 = vunpack.c.h.s8.bf16 %v1065_v52  ;;  %v1073_v43 = vld [vmem:[#allocation8 + $0x858] sm:$0xff] }
 0x3a5   : > { %2269 = vmatpush1.bf16.msra.mxu1 %v1320_v57  ;;  %v920_v57 = vld [vmem:[#allocation8 + $0x390] sm:$0xff] }
 0x3a6   : > { %2638 = vmatpush1.bf16.msra.mxu0 %v1608_v0  ;;  %2270 = vmatprep.subr.bf16.mxu1 %v1323_v59  ;;  %v1064_v0 = vld [vmem:[#allocation8 + $0x810] sm:$0xff]  ;;  %v1338_v8 = vunpack.c.l.s8.bf16 %v920_v57 }
 0x3a7   : > { %2639 = vmatprep.subr.bf16.mxu0 %v1611_v60  ;;  %v1626_v59 = vunpack.c.l.s8.bf16 %v1064_v0  ;;  %v1341_v60 = vunpack.c.h.s8.bf16 %v921_v48  ;;  %v1072_v48 = vld [vmem:[#allocation8 + $0x850] sm:$0xff] }
 0x3a9   : > { %2271 = vmatpush1.bf16.msra.mxu1 %v1322_v2  ;;  %v1067_v2 = vld [vmem:[#allocation8 + $0x828] sm:$0xff] }
 0x3aa   : > { %2640 = vmatpush1.bf16.msra.mxu0 %v1610_v15  ;;  %2272 = vmatprep.subr.bf16.mxu1 %v1325_v7  ;;  %v1340_v15 = vunpack.c.h.s8.bf16 %v920_v57  ;;  %v1628_v7 = vunpack.c.h.s8.bf16 %v1064_v0  ;;  %v1631_v4 = vunpack.c.l.s8.bf16 %v1067_v2  ;;  %v1633_v17 = vunpack.c.h.s8.bf16 %v1067_v2 }
 0x3ab   : > { %2641 = vmatprep.subr.bf16.mxu0 %v1613_v51  ;;  %v1343_v51 = vunpack.c.l.s8.bf16 %v923_v1  ;;  %v1644_v0 = vunpack.c.h.s8.bf16 %v1072_v48 }
 0x3ad   : > { %2273 = vmatpush1.bf16.msra.mxu1 %v1324_v6  ;;  %v1066_v6 = vld [vmem:[#allocation8 + $0x820] sm:$0xff] }
 0x3ae   : > { %2642 = vmatpush1.bf16.msra.mxu0 %v1612_v50  ;;  %2274 = vmatprep.subr.bf16.mxu1 %v1327_v9  ;;  %v1342_v50 = vunpack.c.l.s8.bf16 %v922_v5  ;;  %v1630_v9 = vunpack.c.l.s8.bf16 %v1066_v6 }
 0x3af   : > { %2643 = vmatprep.subr.bf16.mxu0 %v1615_v11  ;;  %v1345_v11 = vunpack.c.h.s8.bf16 %v923_v1 }
 0x3b1   : > { %2275 = vmatpush1.bf16.msra.mxu1 %v1326_v13  ;;  %v1069_v13 = vld [vmem:[#allocation8 + $0x838] sm:$0xff] }
 0x3b2   : > { %2644 = vmatpush1.bf16.msra.mxu0 %v1614_v62  ;;  %2276 = vmatprep.subr.bf16.mxu1 %v1329_v14  ;;  %v1344_v62 = vunpack.c.h.s8.bf16 %v922_v5  ;;  %v1632_v14 = vunpack.c.h.s8.bf16 %v1066_v6  ;;  %v1635_v10 = vunpack.c.l.s8.bf16 %v1069_v13  ;;  %v1637_v27 = vunpack.c.h.s8.bf16 %v1069_v13 }
 0x3b3   : > { %2645 = vmatprep.subr.bf16.mxu0 %v1617_v16  ;;  %v1347_v16 = vunpack.c.l.s8.bf16 %v925_v12 }
 0x3b5   : > { %2277 = vmatpush1.bf16.msra.mxu1 %v1328_v18  ;;  %v1068_v18 = vld [vmem:[#allocation8 + $0x830] sm:$0xff] }
 0x3b6   : > { %2646 = vmatpush1.bf16.msra.mxu0 %v1616_v20  ;;  %2278 = vmatprep.subr.bf16.mxu1 %v1331_v21  ;;  %v1346_v20 = vunpack.c.l.s8.bf16 %v924_v19  ;;  %v1634_v21 = vunpack.c.l.s8.bf16 %v1068_v18 }
 0x3b7   : > { %2647 = vmatprep.subr.bf16.mxu0 %v1619_v23  ;;  %v1349_v23 = vunpack.c.h.s8.bf16 %v925_v12 }
 0x3b9   : > { %2279 = vmatpush1.bf16.msra.mxu1 %v1330_v26  ;;  %v1071_v26 = vld [vmem:[#allocation8 + $0x848] sm:$0xff] }
 0x3ba   : > { %2648 = vmatpush1.bf16.msra.mxu0 %v1618_v30  ;;  %2280 = vmatprep.subr.bf16.mxu1 %v1333_v22  ;;  %v1348_v30 = vunpack.c.h.s8.bf16 %v924_v19  ;;  %v1636_v22 = vunpack.c.h.s8.bf16 %v1068_v18  ;;  %v1639_v29 = vunpack.c.l.s8.bf16 %v1071_v26  ;;  %v1641_v38 = vunpack.c.h.s8.bf16 %v1071_v26 }
 0x3bb   : > { %2649 = vmatprep.subr.bf16.mxu0 %v1621_v28  ;;  %v1351_v28 = vunpack.c.l.s8.bf16 %v927_v24  ;;  %v7300_v26 = vrot.slane %v7279_v32, %v7126_v49 }
 0x3bd   : > { %2281 = vmatpush1.bf16.msra.mxu1 %v1332_v33  ;;  %v1070_v33 = vld [vmem:[#allocation8 + $0x840] sm:$0xff] }
 0x3be   : > { %2650 = vmatpush1.bf16.msra.mxu0 %v1620_v34  ;;  %2291 = vmatprep.subr.bf16.mxu1 %v1335_v40  ;;  %v1350_v34 = vunpack.c.l.s8.bf16 %v926_v31  ;;  %v1638_v40 = vunpack.c.l.s8.bf16 %v1070_v33 }
 0x3bf   : > { %2660 = vmatprep.subr.bf16.mxu0 %v1623_v35  ;;  %v1353_v35 = vunpack.c.h.s8.bf16 %v927_v24  ;;  %v1818_v24 = vcombine.high %v7285_v36, %v7285_v36 }
 0x3c0   : > { %2283 = vmatmul.mubr.bf16.vlgmr.msra.gmra.mrb[0].mxu1 %v7285_v36 }
 0x3c1   : > { %2652 = vmatmul.mubr.bf16.vlgmr.msra.gmra.mrb[0].mxu0 %v1916_v47  ;;  %2292 = vmatpush1.bf16.msra.mxu1 %v1334_v41  ;;  %v1352_v47 = vunpack.c.h.s8.bf16 %v926_v31  ;;  %v1640_v41 = vunpack.c.h.s8.bf16 %v1070_v33  ;;  %v937_v31 = vld [vmem:[#allocation8 + $0x418] sm:$0xff] }
 0x3c2   : > { %2661 = vmatpush1.bf16.msra.mxu0 %v1622_v42  ;;  %2293 = vmatprep.subr.bf16.mxu1 %v1337_v45  ;;  %v1355_v42 = vunpack.c.l.s8.bf16 %v929_v39  ;;  %v1643_v45 = vunpack.c.l.s8.bf16 %v1073_v43  ;;  %v1081_v33 = vld [vmem:[#allocation8 + $0x898] sm:$0xff] }
 0x3c3   : > { %2662 = vmatprep.subr.bf16.mxu0 %v1625_v46  ;;  %2323 = vmatprep.mubr.bf16.mxu1 %v1820_v3  ;;  %v928_v46 = vld [vmem:[#allocation8 + $0x3d0] sm:$0xff]  ;;  %v1642_v3 = vunpack.c.l.s8.bf16 %v1072_v48 }
 0x3c4   : > { %2692 = vmatprep.mubr.bf16.mxu0 %v7292_v53  ;;  %v1354_v52 = vunpack.c.l.s8.bf16 %v928_v46  ;;  %v1356_v57 = vunpack.c.h.s8.bf16 %v928_v46 }
 0x3c5   : > { %2294 = vmatpush1.bf16.msra.mxu1 %v1336_v58  ;;  %v1357_v58 = vunpack.c.h.s8.bf16 %v929_v39  ;;  %v1080_v39 = vld [vmem:[#allocation8 + $0x890] sm:$0xff] }
 0x3c6   : > { %2663 = vmatpush1.bf16.msra.mxu0 %v1624_v54  ;;  %2295 = vmatprep.subr.bf16.mxu1 %v1339_v44  ;;  %v1645_v54 = vunpack.c.h.s8.bf16 %v1073_v43  ;;  %v931_v44 = vld [vmem:[#allocation8 + $0x3e8] sm:$0xff]  ;;  %v1660_v48 = vunpack.c.h.s8.bf16 %v1080_v39 }
 0x3c7   : > { %2664 = vmatprep.subr.bf16.mxu0 %v1627_v56  ;;  %v1075_v56 = vld [vmem:[#allocation8 + $0x868] sm:$0xff] }
 0x3c9   : > { %2296 = vmatpush1.bf16.msra.mxu1 %v1338_v8  ;;  %v1359_v8 = vunpack.c.l.s8.bf16 %v931_v44 }
 0x3ca   : > { %2665 = vmatpush1.bf16.msra.mxu0 %v1626_v59  ;;  %2297 = vmatprep.subr.bf16.mxu1 %v1341_v60  ;;  %v1647_v59 = vunpack.c.l.s8.bf16 %v1075_v56  ;;  %v930_v60 = vld [vmem:[#allocation8 + $0x3e0] sm:$0xff] }
 0x3cb   : > { %2666 = vmatprep.subr.bf16.mxu0 %v1629_v61  ;;  %v1074_v61 = vld [vmem:[#allocation8 + $0x860] sm:$0xff]  ;;  %v1358_v1 = vunpack.c.l.s8.bf16 %v930_v60  ;;  %v1360_v5 = vunpack.c.h.s8.bf16 %v930_v60 }
 0x3cc   : > { %v1646_v2 = vunpack.c.l.s8.bf16 %v1074_v61  ;;  %v1648_v6 = vunpack.c.h.s8.bf16 %v1074_v61 }
 0x3cd   : > { %2298 = vmatpush1.bf16.msra.mxu1 %v1340_v15  ;;  %v1361_v15 = vunpack.c.h.s8.bf16 %v931_v44 }
 0x3ce   : > { %2667 = vmatpush1.bf16.msra.mxu0 %v1628_v7  ;;  %2299 = vmatprep.subr.bf16.mxu1 %v1343_v51  ;;  %v1649_v7 = vunpack.c.h.s8.bf16 %v1075_v56  ;;  %v933_v51 = vld [vmem:[#allocation8 + $0x3f8] sm:$0xff] }
 0x3cf   : > { %2668 = vmatprep.subr.bf16.mxu0 %v1631_v4  ;;  %v1077_v4 = vld [vmem:[#allocation8 + $0x878] sm:$0xff] }
 0x3d1   : > { %2300 = vmatpush1.bf16.msra.mxu1 %v1342_v50  ;;  %v1363_v50 = vunpack.c.l.s8.bf16 %v933_v51 }
 0x3d2   : > { %2669 = vmatpush1.bf16.msra.mxu0 %v1630_v9  ;;  %2301 = vmatprep.subr.bf16.mxu1 %v1345_v11  ;;  %v1651_v9 = vunpack.c.l.s8.bf16 %v1077_v4  ;;  %v932_v11 = vld [vmem:[#allocation8 + $0x3f0] sm:$0xff] }
 0x3d3   : > { %2670 = vmatprep.subr.bf16.mxu0 %v1633_v17  ;;  %v1076_v17 = vld [vmem:[#allocation8 + $0x870] sm:$0xff]  ;;  %v1362_v12 = vunpack.c.l.s8.bf16 %v932_v11  ;;  %v1364_v19 = vunpack.c.h.s8.bf16 %v932_v11 }
 0x3d4   : > { %v1650_v13 = vunpack.c.l.s8.bf16 %v1076_v17  ;;  %v1652_v18 = vunpack.c.h.s8.bf16 %v1076_v17 }
 0x3d5   : > { %2302 = vmatpush1.bf16.msra.mxu1 %v1344_v62  ;;  %v1365_v62 = vunpack.c.h.s8.bf16 %v933_v51 }
 0x3d6   : > { %2671 = vmatpush1.bf16.msra.mxu0 %v1632_v14  ;;  %2303 = vmatprep.subr.bf16.mxu1 %v1347_v16  ;;  %v1653_v14 = vunpack.c.h.s8.bf16 %v1077_v4  ;;  %v935_v16 = vld [vmem:[#allocation8 + $0x408] sm:$0xff] }
 0x3d7   : > { %2672 = vmatprep.subr.bf16.mxu0 %v1635_v10  ;;  %v1079_v10 = vld [vmem:[#allocation8 + $0x888] sm:$0xff] }
 0x3d9   : > { %2304 = vmatpush1.bf16.msra.mxu1 %v1346_v20  ;;  %v1367_v20 = vunpack.c.l.s8.bf16 %v935_v16 }
 0x3da   : > { %2673 = vmatpush1.bf16.msra.mxu0 %v1634_v21  ;;  %2305 = vmatprep.subr.bf16.mxu1 %v1349_v23  ;;  %v1655_v21 = vunpack.c.l.s8.bf16 %v1079_v10  ;;  %v934_v23 = vld [vmem:[#allocation8 + $0x400] sm:$0xff] }
 0x3db   : > { %2674 = vmatprep.subr.bf16.mxu0 %v1637_v27  ;;  %v1078_v27 = vld [vmem:[#allocation8 + $0x880] sm:$0xff]  ;;  %v1368_v32 = vunpack.c.h.s8.bf16 %v934_v23 }
 0x3dc   : > { %v1656_v36 = vunpack.c.h.s8.bf16 %v1078_v27 }
 0x3dd   : > { %2306 = vmatpush1.bf16.msra.mxu1 %v1348_v30  ;;  %v1366_v30 = vunpack.c.l.s8.bf16 %v934_v23 }
 0x3de   : > { %2675 = vmatpush1.bf16.msra.mxu0 %v1636_v22  ;;  %2307 = vmatprep.subr.bf16.mxu1 %v1351_v28  ;;  %v1654_v22 = vunpack.c.l.s8.bf16 %v1078_v27  ;;  %v1369_v28 = vunpack.c.h.s8.bf16 %v935_v16 }
 0x3df   : > { %2676 = vmatprep.subr.bf16.mxu0 %v1639_v29  ;;  %v1657_v29 = vunpack.c.h.s8.bf16 %v1079_v10 }
 0x3e1   : > { %2308 = vmatpush1.bf16.msra.mxu1 %v1350_v34  ;;  %v1965_v34 = vcombine.high %v7292_v53, %v7292_v53  ;;  %v1658_v53 = vunpack.c.l.s8.bf16 %v1080_v39  ;;  %v946_v39 = vld [vmem:[#allocation8 + $0x460] sm:$0xff] }
 0x3e2   : > { %2677 = vmatpush1.bf16.msra.mxu0 %v1638_v40  ;;  %2309 = vmatprep.subr.bf16.mxu1 %v1353_v35  ;;  %v1371_v40 = vunpack.c.l.s8.bf16 %v937_v31  ;;  %v1659_v35 = vunpack.c.l.s8.bf16 %v1081_v33 }
 0x3e3   : > { %2678 = vmatprep.subr.bf16.mxu0 %v1641_v38  ;;  %v936_v38 = vld [vmem:[#allocation8 + $0x410] sm:$0xff] }
 0x3e4   : > { %v1370_v43 = vunpack.c.l.s8.bf16 %v936_v38  ;;  %v1372_v46 = vunpack.c.h.s8.bf16 %v936_v38 }
 0x3e5   : > { %2310 = vmatpush1.bf16.msra.mxu1 %v1352_v47  ;;  %v1373_v47 = vunpack.c.h.s8.bf16 %v937_v31 }
 0x3e6   : > { %2679 = vmatpush1.bf16.msra.mxu0 %v1640_v41  ;;  %2311 = vmatprep.subr.bf16.mxu1 %v1355_v42  ;;  %v1661_v41 = vunpack.c.h.s8.bf16 %v1081_v33  ;;  %v939_v42 = vld [vmem:[#allocation8 + $0x428] sm:$0xff] }
 0x3e7   : > { %2680 = vmatprep.subr.bf16.mxu0 %v1643_v45  ;;  %v1083_v45 = vld [vmem:[#allocation8 + $0x8a8] sm:$0xff]  ;;  %v1377_v56 = vunpack.c.h.s8.bf16 %v939_v42 }
 0x3e9   : > { %2312 = vmatpush1.bf16.msra.mxu1 %v1354_v52  ;;  %v1375_v52 = vunpack.c.l.s8.bf16 %v939_v42 }
 0x3ea   : > { %2681 = vmatpush1.bf16.msra.mxu0 %v1642_v3  ;;  %2313 = vmatprep.subr.bf16.mxu1 %v1357_v58  ;;  %v1663_v3 = vunpack.c.l.s8.bf16 %v1083_v45  ;;  %v1082_v58 = vld [vmem:[#allocation8 + $0x8a0] sm:$0xff] }
 0x3eb   : > { %2682 = vmatprep.subr.bf16.mxu0 %v1645_v54  ;;  %v1662_v44 = vunpack.c.l.s8.bf16 %v1082_v58  ;;  %v1664_v60 = vunpack.c.h.s8.bf16 %v1082_v58 }
 0x3ed   : > { %2314 = vmatpush1.bf16.msra.mxu1 %v1356_v57  ;;  %v1665_v57 = vunpack.c.h.s8.bf16 %v1083_v45  ;;  %v949_v45 = vld [vmem:[#allocation8 + $0x478] sm:$0xff] }
 0x3ee   : > { %2683 = vmatpush1.bf16.msra.mxu0 %v1644_v0  ;;  %2315 = vmatprep.subr.bf16.mxu1 %v1359_v8  ;;  %v941_v0 = vld [vmem:[#allocation8 + $0x438] sm:$0xff] }
 0x3ef   : > { %2684 = vmatprep.subr.bf16.mxu0 %v1647_v59  ;;  %v1085_v8 = vld [vmem:[#allocation8 + $0x8b8] sm:$0xff]  ;;  %v1379_v61 = vunpack.c.l.s8.bf16 %v941_v0  ;;  %v1381_v4 = vunpack.c.h.s8.bf16 %v941_v0 }
 0x3f1   : > { %2316 = vmatpush1.bf16.msra.mxu1 %v1358_v1  ;;  %v1667_v1 = vunpack.c.l.s8.bf16 %v1085_v8 }
 0x3f2   : > { %2685 = vmatpush1.bf16.msra.mxu0 %v1646_v2  ;;  %2317 = vmatprep.subr.bf16.mxu1 %v1361_v15  ;;  %v940_v2 = vld [vmem:[#allocation8 + $0x430] sm:$0xff] }
 0x3f3   : > { %2686 = vmatprep.subr.bf16.mxu0 %v1649_v7  ;;  %v1084_v15 = vld [vmem:[#allocation8 + $0x8b0] sm:$0xff]  ;;  %v1378_v7 = vunpack.c.l.s8.bf16 %v940_v2 }
 0x3f4   : > { %v1666_v51 = vunpack.c.l.s8.bf16 %v1084_v15  ;;  %v1668_v11 = vunpack.c.h.s8.bf16 %v1084_v15  ;;  %v1094_v15 = vld [vmem:[#allocation8 + $0x900] sm:$0xff] }
 0x3f5   : > { %2318 = vmatpush1.bf16.msra.mxu1 %v1360_v5  ;;  %v1669_v5 = vunpack.c.h.s8.bf16 %v1085_v8  ;;  %v1397_v8 = vunpack.c.h.s8.bf16 %v949_v45 }
 0x3f6   : > { %2687 = vmatpush1.bf16.msra.mxu0 %v1648_v6  ;;  %2319 = vmatprep.subr.bf16.mxu1 %v1363_v50  ;;  %v943_v6 = vld [vmem:[#allocation8 + $0x448] sm:$0xff] }
 0x3f7   : > { %2688 = vmatprep.subr.bf16.mxu0 %v1651_v9  ;;  %v1087_v50 = vld [vmem:[#allocation8 + $0x8c8] sm:$0xff]  ;;  %v1380_v9 = vunpack.c.h.s8.bf16 %v940_v2  ;;  %v1383_v17 = vunpack.c.l.s8.bf16 %v943_v6  ;;  %v1385_v10 = vunpack.c.h.s8.bf16 %v943_v6  ;;  %v1097_v6 = vld [vmem:[#allocation8 + $0x918] sm:$0xff] }
 0x3f9   : > { %2320 = vmatpush1.bf16.msra.mxu1 %v1362_v12  ;;  %v1671_v12 = vunpack.c.l.s8.bf16 %v1087_v50 }
 0x3fa   : > { %2689 = vmatpush1.bf16.msra.mxu0 %v1650_v13  ;;  %2321 = vmatprep.subr.bf16.mxu1 %v1365_v62  ;;  %v942_v13 = vld [vmem:[#allocation8 + $0x440] sm:$0xff] }
 0x3fb   : > { %2690 = vmatprep.subr.bf16.mxu0 %v1653_v14  ;;  %v1086_v62 = vld [vmem:[#allocation8 + $0x8c0] sm:$0xff]  ;;  %v1382_v14 = vunpack.c.l.s8.bf16 %v942_v13 }
 0x3fc   : > { %v1670_v16 = vunpack.c.l.s8.bf16 %v1086_v62  ;;  %v1672_v23 = vunpack.c.h.s8.bf16 %v1086_v62 }
 0x3fd   : > { %2322 = vmatpush1.bf16.msra.mxu1 %v1364_v19  ;;  %v1673_v19 = vunpack.c.h.s8.bf16 %v1087_v50  ;;  %v1688_v50 = vunpack.c.h.s8.bf16 %v1094_v15 }
 0x3fe   : > { %2691 = vmatpush1.bf16.msra.mxu0 %v1652_v18  ;;  %2332 = vmatprep.subr.bf16.mxu1 %v1367_v20  ;;  %v945_v18 = vld [vmem:[#allocation8 + $0x458] sm:$0xff] }
 0x3ff   : > { %2701 = vmatprep.subr.bf16.mxu0 %v1655_v21  ;;  %v1089_v20 = vld [vmem:[#allocation8 + $0x8d8] sm:$0xff]  ;;  %v1384_v21 = vunpack.c.h.s8.bf16 %v942_v13  ;;  %v1387_v27 = vunpack.c.l.s8.bf16 %v945_v18  ;;  %v1389_v31 = vunpack.c.h.s8.bf16 %v945_v18 }
 0x400   : > { %2324 = vmatmul.mubr.bf16.vlgmr.msra.gmra.mrb[0].mxu1 %v1818_v24  ;;  %v1675_v24 = vunpack.c.l.s8.bf16 %v1089_v20  ;;  %v1677_v33 = vunpack.c.h.s8.bf16 %v1089_v20  ;;  %v1100_v20 = vld [vmem:[#allocation8 + $0x930] sm:$0xff] }
 0x401   : > { %2693 = vmatmul.mubr.bf16.vlgmr.msra.gmra.mrb[0].mxu0 %v7300_v26  ;;  %2333 = vmatpush1.bf16.msra.mxu1 %v1366_v30  ;;  %v944_v30 = vld [vmem:[#allocation8 + $0x450] sm:$0xff] }
 0x402   : > { %2702 = vmatpush1.bf16.msra.mxu0 %v1654_v22  ;;  %2334 = vmatprep.subr.bf16.mxu1 %v1369_v28  ;;  %v1088_v22 = vld [vmem:[#allocation8 + $0x8d0] sm:$0xff]  ;;  %v1386_v28 = vunpack.c.l.s8.bf16 %v944_v30 }
 0x403   : > { %2703 = vmatprep.subr.bf16.mxu0 %v1657_v29  ;;  %2364 = vmatprep.mubr.bf16.mxu1 %v7144_v63  ;;  %v938_v63 = vld [vmem:[#allocation8 + $0x420] sm:$0xff]  ;;  %v1674_v29 = vunpack.c.l.s8.bf16 %v1088_v22 }
 0x404   : > { %2733 = vmatprep.mubr.bf16.mxu0 %v1965_v34  ;;  %v1374_v54 = vunpack.c.l.s8.bf16 %v938_v63  ;;  %v1376_v59 = vunpack.c.h.s8.bf16 %v938_v63  ;;  %v947_v34 = vld [vmem:[#allocation8 + $0x468] sm:$0xff]  ;;  %v1395_v63 = vunpack.c.l.s8.bf16 %v949_v45 }
 0x405   : > { %2335 = vmatpush1.bf16.msra.mxu1 %v1368_v32  ;;  %v1091_v32 = vld [vmem:[#allocation8 + $0x8e8] sm:$0xff] }
 0x406   : > { %2704 = vmatpush1.bf16.msra.mxu0 %v1656_v36  ;;  %2336 = vmatprep.subr.bf16.mxu1 %v1371_v40  ;;  %v1388_v36 = vunpack.c.h.s8.bf16 %v944_v30  ;;  %v1676_v40 = vunpack.c.h.s8.bf16 %v1088_v22  ;;  %v1679_v38 = vunpack.c.l.s8.bf16 %v1091_v32  ;;  %v1681_v42 = vunpack.c.h.s8.bf16 %v1091_v32  ;;  %v1102_v22 = vld [vmem:[#allocation8 + $0x940] sm:$0xff]  ;;  %v1104_v32 = vld [vmem:[#allocation8 + $0x950] sm:$0xff] }
 0x407   : > { %2705 = vmatprep.subr.bf16.mxu0 %v1659_v35  ;;  %v1391_v35 = vunpack.c.l.s8.bf16 %v947_v34 }
 0x409   : > { %2337 = vmatpush1.bf16.msra.mxu1 %v1370_v43  ;;  %v1090_v43 = vld [vmem:[#allocation8 + $0x8e0] sm:$0xff] }
 0x40a   : > { %2706 = vmatpush1.bf16.msra.mxu0 %v1658_v53  ;;  %2338 = vmatprep.subr.bf16.mxu1 %v1373_v47  ;;  %v1390_v53 = vunpack.c.l.s8.bf16 %v946_v39  ;;  %v1678_v47 = vunpack.c.l.s8.bf16 %v1090_v43 }
 0x40b   : > { %2707 = vmatprep.subr.bf16.mxu0 %v1661_v41  ;;  %v1393_v41 = vunpack.c.h.s8.bf16 %v947_v34 }
 0x40d   : > { %2339 = vmatpush1.bf16.msra.mxu1 %v1372_v46  ;;  %v1093_v46 = vld [vmem:[#allocation8 + $0x8f8] sm:$0xff] }
 0x40e   : > { %2708 = vmatpush1.bf16.msra.mxu0 %v1660_v48  ;;  %2340 = vmatprep.subr.bf16.mxu1 %v1375_v52  ;;  %v1392_v48 = vunpack.c.h.s8.bf16 %v946_v39  ;;  %v1680_v52 = vunpack.c.h.s8.bf16 %v1090_v43  ;;  %v1683_v58 = vunpack.c.l.s8.bf16 %v1093_v46  ;;  %v1106_v43 = vld [vmem:[#allocation8 + $0x960] sm:$0xff] }
 0x40f   : > { %2709 = vmatprep.subr.bf16.mxu0 %v1663_v3  ;;  %v1919_v3 = vcombine.high %v7275_v25, %v7275_v25 }
 0x411   : > { %2341 = vmatpush1.bf16.msra.mxu1 %v1374_v54  ;;  %v948_v54 = vld [vmem:[#allocation8 + $0x470] sm:$0xff]  ;;  %v7309_v0 = vrot.slane %v1919_v3, %v7126_v49 }
 0x412   : > { %2710 = vmatpush1.bf16.msra.mxu0 %v1662_v44  ;;  %2342 = vmatprep.subr.bf16.mxu1 %v1377_v56  ;;  %v1092_v44 = vld [vmem:[#allocation8 + $0x8f0] sm:$0xff]  ;;  %v1394_v56 = vunpack.c.l.s8.bf16 %v948_v54  ;;  %v1396_v25 = vunpack.c.h.s8.bf16 %v948_v54  ;;  %v5875_v54 = vld [vmem:[#allocation12] sm:$0xff]  }
 0x413   : > { %2711 = vmatprep.subr.bf16.mxu0 %v1665_v57  ;;  %v1682_v57 = vunpack.c.l.s8.bf16 %v1092_v44 }
 0x415   : > { %2343 = vmatpush1.bf16.msra.mxu1 %v1376_v59  ;;  %v1685_v59 = vunpack.c.h.s8.bf16 %v1093_v46  ;;  %v1108_v46 = vld [vmem:[#allocation8 + $0x970] sm:$0xff] }
 0x416   : > { %2712 = vmatpush1.bf16.msra.mxu0 %v1664_v60  ;;  %2344 = vmatprep.subr.bf16.mxu1 %v1379_v61  ;;  %v1095_v60 = vld [vmem:[#allocation8 + $0x908] sm:$0xff]  ;;  %v1684_v61 = vunpack.c.h.s8.bf16 %v1092_v44  ;;  %v1716_v3 = vunpack.c.h.s8.bf16 %v1108_v46 }
 0x417   : > { %2713 = vmatprep.subr.bf16.mxu0 %v1667_v1  ;;  %v1935_v1 = vcombine.high %v7309_v0, %v7309_v0  ;;  %v1687_v2 = vunpack.c.l.s8.bf16 %v1095_v60  ;;  %v5876_v44 = vld [vmem:[#allocation12 + $0x48] sm:$0xff]  }
 0x419   : > { %2345 = vmatpush1.bf16.msra.mxu1 %v1378_v7  ;;  %v1964_v7 = vcombine.high %v7300_v26, %v7300_v26  ;;  %v1693_v26 = vunpack.c.h.s8.bf16 %v1097_v6 }
 0x41a   : > { %2714 = vmatpush1.bf16.msra.mxu0 %v1666_v51  ;;  %2346 = vmatprep.subr.bf16.mxu1 %v1381_v4  ;;  %v1686_v51 = vunpack.c.l.s8.bf16 %v1094_v15  ;;  %v1963_v4 = vrot.slane %v1935_v1, %v7126_v49  ;;  %v5885_v1 = vld [vmem:[#allocation12 + $0x28] sm:$0xff]   ;;  %v5887_v15 = vld [vmem:[#allocation12 + $0x30] sm:$0xff]  }
 0x41b   : > { %2715 = vmatprep.subr.bf16.mxu0 %v1669_v5  ;;  %v1689_v5 = vunpack.c.h.s8.bf16 %v1095_v60  ;;  %v5881_v60 = vld [vmem:[#allocation12 + $0x18] sm:$0xff]  }
 0x41d   : > { %2347 = vmatpush1.bf16.msra.mxu1 %v1380_v9  ;;  %v1691_v9 = vunpack.c.l.s8.bf16 %v1097_v6  ;;  %v5891_v6 = vld [vmem:[%s8045_s7 + $0x8] sm:$0xff]  }
 0x41e   : > { %2716 = vmatpush1.bf16.msra.mxu0 %v1668_v11  ;;  %2348 = vmatprep.subr.bf16.mxu1 %v1383_v17  ;;  %v1096_v11 = vld [vmem:[#allocation8 + $0x910] sm:$0xff] }
 0x41f   : > { %2717 = vmatprep.subr.bf16.mxu0 %v1671_v12  ;;  %v1690_v17 = vunpack.c.l.s8.bf16 %v1096_v11  ;;  %v1099_v12 = vld [vmem:[#allocation8 + $0x928] sm:$0xff]  ;;  %v1692_v13 = vunpack.c.h.s8.bf16 %v1096_v11  ;;  %v5894_v11 = vld [vmem:[%s8045_s7 + $0x20] sm:$0xff]  }
 0x420   : > { %v1695_v62 = vunpack.c.l.s8.bf16 %v1099_v12 }
 0x421   : > { %2349 = vmatpush1.bf16.msra.mxu1 %v1382_v14  ;;  %v1098_v14 = vld [vmem:[#allocation8 + $0x920] sm:$0xff] }
 0x422   : > { %2718 = vmatpush1.bf16.msra.mxu0 %v1670_v16  ;;  %2350 = vmatprep.subr.bf16.mxu1 %v1385_v10  ;;  %v1694_v16 = vunpack.c.l.s8.bf16 %v1098_v14  ;;  %v1101_v10 = vld [vmem:[#allocation8 + $0x938] sm:$0xff] }
 0x423   : > { %2719 = vmatprep.subr.bf16.mxu0 %v1673_v19  ;;  %v1696_v19 = vunpack.c.h.s8.bf16 %v1098_v14  ;;  %v1699_v18 = vunpack.c.l.s8.bf16 %v1101_v10  ;;  %v7345_v14 = vsub.s32 0, %v7119_v37 }
 0x425   : > { %2351 = vmatpush1.bf16.msra.mxu1 %v1384_v21  ;;  %v1698_v21 = vunpack.c.l.s8.bf16 %v1100_v20 }
 0x426   : > { %2720 = vmatpush1.bf16.msra.mxu0 %v1672_v23  ;;  %2352 = vmatprep.subr.bf16.mxu1 %v1387_v27  ;;  %v1701_v23 = vunpack.c.h.s8.bf16 %v1101_v10  ;;  %v1103_v27 = vld [vmem:[#allocation8 + $0x948] sm:$0xff]  ;;  %v2797_v10 = vld [vmem:[#allocation11] sm:$0x3] }
 0x427   : > { %2721 = vmatprep.subr.bf16.mxu0 %v1675_v24  ;;  %v1700_v24 = vunpack.c.h.s8.bf16 %v1100_v20  ;;  %v1703_v30 = vunpack.c.l.s8.bf16 %v1103_v27 }
 0x429   : > { %2353 = vmatpush1.bf16.msra.mxu1 %v1386_v28  ;;  %v1702_v28 = vunpack.c.l.s8.bf16 %v1102_v22 }
 0x42a   : > { %2722 = vmatpush1.bf16.msra.mxu0 %v1674_v29  ;;  %2354 = vmatprep.subr.bf16.mxu1 %v1389_v31  ;;  %v1705_v29 = vunpack.c.h.s8.bf16 %v1103_v27  ;;  %v1105_v31 = vld [vmem:[#allocation8 + $0x958] sm:$0xff] }
 0x42b   : > { %2723 = vmatprep.subr.bf16.mxu0 %v1677_v33  ;;  %v1704_v33 = vunpack.c.h.s8.bf16 %v1102_v22  ;;  %v1707_v34 = vunpack.c.l.s8.bf16 %v1105_v31 }
 0x42d   : > { %2355 = vmatpush1.bf16.msra.mxu1 %v1388_v36  ;;  %v1706_v36 = vunpack.c.l.s8.bf16 %v1104_v32 }
 0x42e   : > { %2724 = vmatpush1.bf16.msra.mxu0 %v1676_v40  ;;  %2356 = vmatprep.subr.bf16.mxu1 %v1391_v35  ;;  %v1709_v40 = vunpack.c.h.s8.bf16 %v1105_v31  ;;  %v1107_v35 = vld [vmem:[#allocation8 + $0x968] sm:$0xff] }
 0x42f   : > { %2725 = vmatprep.subr.bf16.mxu0 %v1679_v38  ;;  %v1708_v38 = vunpack.c.h.s8.bf16 %v1104_v32  ;;  %v1711_v39 = vunpack.c.l.s8.bf16 %v1107_v35 }
 0x431   : > { %2357 = vmatpush1.bf16.msra.mxu1 %v1390_v53  ;;  %v1710_v53 = vunpack.c.l.s8.bf16 %v1106_v43 }
 0x432   : > { %2726 = vmatpush1.bf16.msra.mxu0 %v1678_v47  ;;  %2358 = vmatprep.subr.bf16.mxu1 %v1393_v41  ;;  %v1713_v47 = vunpack.c.h.s8.bf16 %v1107_v35  ;;  %v1109_v41 = vld [vmem:[#allocation8 + $0x978] sm:$0xff]  ;;  %v5896_v35 = vld [vmem:[%s8045_s7 + $0x30] sm:$0xff]  }
 0x433   : > { %2727 = vmatprep.subr.bf16.mxu0 %v1681_v42  ;;  %v1712_v42 = vunpack.c.h.s8.bf16 %v1106_v43  ;;  %v1715_v45 = vunpack.c.l.s8.bf16 %v1109_v41 }
 0x435   : > { %2359 = vmatpush1.bf16.msra.mxu1 %v1392_v48  ;;  %v1714_v48 = vunpack.c.l.s8.bf16 %v1108_v46 }
 0x436   : > { %2728 = vmatpush1.bf16.msra.mxu0 %v1680_v52  ;;  %2360 = vmatprep.subr.bf16.mxu1 %v1395_v63  ;;  %v1717_v52 = vunpack.c.h.s8.bf16 %v1109_v41  ;;  %v1949_v63 = vrot.slane %v7309_v0, %v7126_v49  ;;  %v5883_v0 = vld [vmem:[#allocation12 + $0x20] sm:$0xff]  }
 0x437   : > { %2729 = vmatprep.subr.bf16.mxu0 %v1683_v58  ;;  %v5874_v58 = vld [vmem:[#allocation12 + $0x40] sm:$0xff]  }
 0x439   : > { %2361 = vmatpush1.bf16.msra.mxu1 %v1394_v56  ;;  %v5877_v56 = vld [vmem:[#allocation12 + $0x8] sm:$0xff]  }
 0x43a   : > { %2730 = vmatpush1.bf16.msra.mxu0 %v1682_v57  ;;  %2362 = vmatprep.subr.bf16.mxu1 %v1397_v8  ;;  %v5878_v57 = vld [vmem:[#allocation12 + $0x50] sm:$0xff]  }
 0x43b   : > { %2731 = vmatprep.subr.bf16.mxu0 %v1685_v59  ;;  %v5879_v8 = vld [vmem:[#allocation12 + $0x10] sm:$0xff]   ;;  %v5880_v59 = vld [vmem:[#allocation12 + $0x58] sm:$0xff]  }
 0x43d   : > { %2363 = vmatpush1.bf16.msra.mxu1 %v1396_v25  ;;  %v5882_v25 = vld [vmem:[#allocation12 + $0x60] sm:$0xff]  }
 0x43e   : > { %2732 = vmatpush1.bf16.msra.mxu0 %v1684_v61  ;;  %v5884_v61 = vld [vmem:[#allocation12 + $0x68] sm:$0xff]  }
 0x43f   : > { %2742 = vmatprep.subr.bf16.mxu0 %v1687_v2  ;;  %v5886_v2 = vld [vmem:[#allocation12 + $0x70] sm:$0xff]  }
 0x440   : > { %2365 = vmatmul.mubr.bf16.vlgmr.msra.gmra.mrb[0].mxu1 %v7156_v55  ;;  %v1697_v55 = vunpack.c.h.s8.bf16 %v1099_v12 }
 0x441   : > { %2734 = vmatmul.mubr.bf16.vlgmr.msra.gmra.mrb[0].mxu0 %v1964_v7  ;;  %v5888_v7 = vld [vmem:[#allocation12 + $0x78] sm:$0xff]  }
 0x442   : > { %2743 = vmatpush1.bf16.msra.mxu0 %v1686_v51  ;;  %2774 = vmatprep.mubr.bf16.mxu0 %v1963_v4  ;;  %v5889_v51 = vld [vmem:[#allocation12 + $0x38] sm:$0xff]  }
 0x443   : > { %2744 = vmatprep.subr.bf16.mxu0 %v1689_v5  ;;  %v5890_v4 = vld [vmem:[%s8045_s7] sm:$0xff]   ;;  %v6553_v5 = vmov 0.0  }
 0x444   : > { %5566 = vmatprep.subr.bf16.mxu1 %v6553_v5  ;;  %5582 = vmatprep.mubr.msk.bf16.mxu1 %vm6554_vm0, %v6553_v5 }
 0x445   : > { %5567 = vmatpush3.bf16.msra.mxu1 %v5890_v4  ;;  %v5903_v4 = vld [vmem:[#allocation20 + $0x10] ss:$8 sps:$4 sm:$0xff]  }
 0x446   : > { %2745 = vmatpush1.bf16.msra.mxu0 %v1688_v50  ;;  %5568 = vmatprep.subr.bf16.mxu1 %v6553_v5  ;;  %v5892_v50 = vld [vmem:[%s8045_s7 + $0x10] sm:$0xff]  }
 0x447   : > { %2746 = vmatprep.subr.bf16.mxu0 %v1691_v9  ;;  %v5893_v9 = vld [vmem:[%s8045_s7 + $0x18] sm:$0xff]  }
 0x449   : > { %5569 = vmatpush3.bf16.msra.mxu1 %v5891_v6  ;;  %v5906_v6 = vld [vmem:[#allocation20 + $0x20] ss:$8 sps:$4 sm:$0xff]  }
 0x44a   : > { %2747 = vmatpush1.bf16.msra.mxu0 %v1690_v17  ;;  %5570 = vmatprep.subr.bf16.mxu1 %v6553_v5  ;;  %v5895_v17 = vld [vmem:[%s8045_s7 + $0x28] sm:$0xff]  }
 0x44b   : > { %2748 = vmatprep.subr.bf16.mxu0 %v1693_v26 }
 0x44d   : > { %5571 = vmatpush3.bf16.msra.mxu1 %v5892_v50  ;;  %v5911_v50 = vld [vmem:[#allocation20 + $0x34] ss:$8 sps:$4 sm:$0xff]  }
 0x44e   : > { %2749 = vmatpush1.bf16.msra.mxu0 %v1692_v13  ;;  %5572 = vmatprep.subr.bf16.mxu1 %v6553_v5 }
 0x44f   : > { %2750 = vmatprep.subr.bf16.mxu0 %v1695_v62 }
 0x451   : > { %5573 = vmatpush3.bf16.msra.mxu1 %v5893_v9  ;;  %v5909_v9 = vld [vmem:[#allocation20 + $0x30] ss:$8 sps:$4 sm:$0xff]  }
 0x452   : > { %2751 = vmatpush1.bf16.msra.mxu0 %v1694_v16  ;;  %5574 = vmatprep.subr.bf16.mxu1 %v6553_v5  ;;  %v2783_v16 = vld [vmem:[#allocation9] sm:$0x3] }
 0x453   : > { %2752 = vmatprep.subr.bf16.mxu0 %v1697_v55  ;;  %v7348_v55 = vsub.s32 1, %v7119_v37 }
 0x455   : > { %5575 = vmatpush3.bf16.msra.mxu1 %v5894_v11  ;;  %v2792_v20 = vrot.slane %v2783_v16, %v7348_v55  ;;  %v5914_v11 = vld [vmem:[#allocation20 + $0x44] ss:$8 sps:$4 sm:$0xff]  }
 0x456   : > { %2753 = vmatpush1.bf16.msra.mxu0 %v1696_v19  ;;  %5576 = vmatprep.subr.bf16.mxu1 %v6553_v5  ;;  %v2788_v19 = vrot.slane %v2783_v16, %v7345_v14  ;;  %v5923_v16 = vld [vmem:[#allocation20 + $0x74] ss:$8 sps:$4 sm:$0xff]  }
 0x457   : > { %2754 = vmatprep.subr.bf16.mxu0 %v1699_v18 }
 0x459   : > { %5577 = vmatpush3.bf16.msra.mxu1 %v5895_v17  ;;  %v5912_v17 = vld [vmem:[#allocation20 + $0x40] ss:$8 sps:$4 sm:$0xff]  }
 0x45a   : > { %2755 = vmatpush1.bf16.msra.mxu0 %v1698_v21  ;;  %5578 = vmatprep.subr.bf16.mxu1 %v6553_v5 }
 0x45b   : > { %2756 = vmatprep.subr.bf16.mxu0 %v1701_v23  ;;  %v2802_v23 = vrot.slane %v2797_v10, %v7345_v14 }
 0x45d   : > { %5579 = vmatpush3.bf16.msra.mxu1 %v5896_v35 }
 0x45e   : > { %2757 = vmatpush1.bf16.msra.mxu0 %v1700_v24  ;;  %5580 = vmatprep.subr.bf16.mxu1 %v6553_v5 }
 0x45f   : > { %2758 = vmatprep.subr.bf16.mxu0 %v1703_v30  ;;  %v2806_v30 = vrot.slane %v2797_v10, %v7348_v55  ;;  %v5921_v10 = vld [vmem:[#allocation20 + $0x70] ss:$8 sps:$4 sm:$0xff]  }
 0x462   : > { %2759 = vmatpush1.bf16.msra.mxu0 %v1702_v28 }
 0x463   : > { %2760 = vmatprep.subr.bf16.mxu0 %v1705_v29 }
 0x466   : > { %2761 = vmatpush1.bf16.msra.mxu0 %v1704_v33 }
 0x467   : > { %2762 = vmatprep.subr.bf16.mxu0 %v1707_v34 }
 0x46a   : > { %2763 = vmatpush1.bf16.msra.mxu0 %v1706_v36 }
 0x46b   : > { %2764 = vmatprep.subr.bf16.mxu0 %v1709_v40 }
 0x46e   : > { %2765 = vmatpush1.bf16.msra.mxu0 %v1708_v38  ;;  %v5897_v38 = vld [vmem:[%s8045_s7 + $0x38] sm:$0xff]  }
 0x46f   : > { %2766 = vmatprep.subr.bf16.mxu0 %v1711_v39  ;;  %5581 = vmatpush3.bf16.msra.mxu1 %v5897_v38  ;;  %v3105_v39 = vld [vmem:[#allocation6] sm:$0x3] }
 0x470   : > { %5586 = vmatprep.subr.bf16.mxu1 %v6553_v5  ;;  %3107 = vrot.lane.b32.xlu0 %v3105_v39, %s6555_s13 }
 0x472   : > { %2767 = vmatpush1.bf16.msra.mxu0 %v1710_v53  ;;  %v5437_v53 = vld [vmem:[#allocation14] ss:$0 sm:$0xff] }
 0x473   : > { %2768 = vmatprep.subr.bf16.mxu0 %v1713_v47 }
 0x476   : > { %2769 = vmatpush1.bf16.msra.mxu0 %v1712_v42 }
 0x477   : > { %2770 = vmatprep.subr.bf16.mxu0 %v1715_v45 }
 0x47a   : > { %2771 = vmatpush1.bf16.msra.mxu0 %v1714_v48 }
 0x47b   : > { %2772 = vmatprep.subr.bf16.mxu0 %v1717_v52 }
 0x47e   : > { %2773 = vmatpush1.bf16.msra.mxu0 %v1716_v3  ;;  %v5898_v3 = vld [vmem:[#allocation17] sm:$0xff]  }
 0x47f   : > { %5510 = vmatprep.subr.bf16.mxu0 %v5874_v58 }
 0x481   : > { %2775 = vmatmul.mubr.bf16.vlgmr.msra.gmra.mrb[0].mxu0 %v1949_v63  ;;  %v5454_v63 = vld [vmem:[#allocation15] ss:$0 sm:$0xff] }
 0x482   : > { %5511 = vmatpush3.bf16.msra.mxu0 %v5875_v54 }
 0x483   : > { %5512 = vmatprep.subr.bf16.mxu0 %v5876_v44 }
 0x486   : > { %5513 = vmatpush3.bf16.msra.mxu0 %v5877_v56 }
 0x487   : > { %5514 = vmatprep.subr.bf16.mxu0 %v5878_v57 }
 0x48a   : > { %5515 = vmatpush3.bf16.msra.mxu0 %v5879_v8 }
 0x48b   : > { %5516 = vmatprep.subr.bf16.mxu0 %v5880_v59  ;;  %v5899_v59 = vld [vmem:[#allocation17 + $0x8] sm:$0xff]  }
 0x48e   : > { %5517 = vmatpush3.bf16.msra.mxu0 %v5881_v60 }
 0x48f   : > { %5518 = vmatprep.subr.bf16.mxu0 %v5882_v25 }
 0x492   : > { %5519 = vmatpush3.bf16.msra.mxu0 %v5883_v0 }
 0x493   : > { %5520 = vmatprep.subr.bf16.mxu0 %v5884_v61  ;;  %v5902_v61 = vld [vmem:[#allocation20 + $0x4] ss:$8 sps:$4 sm:$0xff]  }
 0x496   : > { %5521 = vmatpush3.bf16.msra.mxu0 %v5885_v1 }
 0x497   : > { %5522 = vmatprep.subr.bf16.mxu0 %v5886_v2 }
 0x49a   : > { %5523 = vmatpush3.bf16.msra.mxu0 %v5887_v15  ;;  %v5900_v15 = vld [vmem:[#allocation20] ss:$8 sps:$4 sm:$0xff]  }
 0x49b   : > { %5524 = vmatprep.subr.bf16.mxu0 %v5888_v7 }
 0x49e   : > { %5525 = vmatpush3.bf16.msra.mxu0 %v5889_v51  ;;  %v5905_v51 = vld [vmem:[#allocation20 + $0x14] ss:$8 sps:$4 sm:$0xff]  }
 0x4e2   : > { %v3108_v60 = vpop.permute.xlu0 %3107 }
 0x513   : > { %v2366_v26 = vpop.f32.mrb[0].mxu1 }
 0x514   : > { %v2368_v12 = vpop.f32.mrb[1].mxu1 }
 0x515   : > { %v2370_v13 = vpop.f32.mrb[2].mxu1 }
 0x516   : > { %v2371_v62 = vpop.f32.mrb[3].mxu1  ;;  %v5920_v13 = vld [vmem:[#allocation20 + $0x64] ss:$8 sps:$4 sm:$0xff]  }
 0x517   : > { %v5918_v62 = vld [vmem:[#allocation20 + $0x60] ss:$8 sps:$4 sm:$0xff]  }
 0x554   : > { %v2776_v18 = vpop.f32.mrb[0].mxu0 }
 0x555   : > { %v5594_v21 = vadd.f32 %v2776_v18, %v2366_v26  ;;  %v2778_v27 = vpop.f32.mrb[1].mxu0  ;;  %v5917_v26 = vld [vmem:[#allocation20 + $0x54] ss:$8 sps:$4 sm:$0xff]  }
 0x556   : > { %v5595_v24 = vadd.f32 %v2778_v27, %v2368_v12  ;;  %v2780_v22 = vpop.f32.mrb[2].mxu0  ;;  %v5915_v12 = vld [vmem:[#allocation20 + $0x50] ss:$8 sps:$4 sm:$0xff]   ;;  %v5463_v27 = vld [vmem:[#allocation18] ss:$0 sm:$0xff] }
 0x557   : > { %v2795_v28 = vmul.f32 %v5594_v21, %v2788_v19  ;;  %v2781_v29 = vpop.f32.mrb[3].mxu0  ;;  %v6557_v19 = vmov 0  }
 0x558   : > { %v2796_v31 = vmul.f32 %v5595_v24, %v2792_v20 }
 0x559   : > { %v2809_v33 = vadd.f32 %v2802_v23, %v2795_v28 }
 0x55a   : > { %v2810_v37 = vadd.f32 %v2806_v30, %v2796_v31 }
 0x55b   : > { %v2811_v34 = vmax.f32 %v2809_v33, 0.0 }
 0x55c   : > { %v2812_v32 = vmax.f32 %v2810_v37, 0.0  ;;  %v3215_v37 = vld [vmem:[#allocation21] sm:$0x3] }
 0x55d   : > { %v2813_v40 = vpack.c.bf16 %v2811_v34, %v2811_v34  ;;  %v3220_v34 = vrot.slane %v3215_v37, %v7345_v14 }
 0x55e   : > { %v2814_v36 = vpack.c.bf16 %v2812_v32, %v2812_v32  ;;  %v3224_v32 = vrot.slane %v3215_v37, %v7348_v55 }
 0x560   : > { %2982 = vmatprep.mubr.bf16.mxu0 %v2814_v36 }
 0x561   : > { %2983 = vmatmul.mubr.bf16.vlgmr.msra.gmra.mrb[4].mxu0 %v2813_v40 }
 0x634   : > { %v5526_v43 = vpop.f32.mrb[4].mxu0 }
 0x635   : > { %v5527_v47 = vpop.f32.mrb[5].mxu0 }
 0x636   : > { %v5528_v41 = vadd.f32 %v5527_v47, %v5526_v43  ;;  %v5529_v42 = vpop.f32.mrb[6].mxu0 }
 0x637   : > { %v5530_v45 = vpop.f32.mrb[7].mxu0 }
 0x638   : > { %v2985_v46 = vadd.f32 %v5528_v41, %v5437_v53 }
 0x63a   : > { %v2990_v48 = vmax.f32 %v2985_v46, 0.0 }
 0x63c   : > { %v2991_v52 = vpack.c.bf16 %v2990_v48, %v2990_v48 }
 0x63e   : > { %5583 = vmatmul.mubr.bf16.vlgmr.msra.gmra.mrb[4].mxu1 %v2991_v52 }
 0x63f   : > { %5590 = vmatprep.mubr.msk.bf16.mxu1 %vm6554_vm0, %v6553_v5  ;;  %5587 = vmatpush3.bf16.msra.mxu1 %v5898_v3 }
 0x640   : > { %5588 = vmatprep.subr.bf16.mxu1 %v6553_v5  ;;  %v5908_v5 = vld [vmem:[#allocation20 + $0x24] ss:$8 sps:$4 sm:$0xff]  }
 0x643   : > { %5589 = vmatpush3.bf16.msra.mxu1 %v5899_v59 }
 0x644   : > { %3307 = vmatprep.subr.bf16.mxu1 %v5902_v61 }
 0x711   : > { %v3097_v58 = vpop.f32.mrb[4].mxu1 }
 0x712   : > { %v3098_v54 = vadd.f32 %v5454_v63, %v3097_v58  ;;  %v5584_v44 = vpop.f32.mrb[5].mxu1 }
 0x713   : > { %v3100_v56 = vpop.f32.mrb[6].mxu1 }
 0x714   : > { %v3103_v57 = vmul.f32 1.442695, %v3098_v54  ;;  %v5585_v8 = vpop.f32.mrb[7].mxu1 }
 0x716   : > { %5924 = vpow2.f32 %v3103_v57 }
 0x720   : > { %v5925_v25 = vpop.eup %5924 }
 0x721   : > { %v3110_v0 = vmul.f32 %v5925_v25, %v3108_v60  ;;  %3117 = vrot.lane.b32.xlu1 %v5925_v25, %s6555_s13 }
 0x723   : > { %3112 = vrot.lane.b32.xlu0 %v3110_v0, %s6556_s30 }
 0x793   : > { %v3118_v18 = vpop.permute.xlu1 %3117 }
 0x794   : > { %v3125_v20 = vsel %vm3124_vm2, %v3098_v54, %v3118_v18 }
 0x795   : > { %v3113_v1 = vpop.permute.xlu0 %3112 }
 0x796   : > { %v3115_v2 = vadd.f32 %v3113_v1, %v3098_v54 }
 0x798   : > { %v3129_v7 = vpack.c.bf16 %v3115_v2, %v3115_v2  ;;  %3121 = vrot.lane.b32.xlu1 %v3115_v2, %s6556_s30 }
 0x79a   : > { %5591 = vmatmul.mubr.msk.bf16.vlgmr.msra.gmra.mrb[8].mxu1 %vm3153_vm1, %v3129_v7 }
 0x79b   : > { %3308 = vmatpush1.bf16.msra.mxu1 %v5900_v15  ;;  %3339 = vmatprep.mubr.bf16.mxu1 %v6557_v19 }
 0x79c   : > { %3309 = vmatprep.subr.bf16.mxu1 %v5905_v51 }
 0x79f   : > { %3310 = vmatpush1.bf16.msra.mxu1 %v5903_v4 }
 0x7a0   : > { %3311 = vmatprep.subr.bf16.mxu1 %v5908_v5 }
 0x7a3   : > { %3312 = vmatpush1.bf16.msra.mxu1 %v5906_v6 }
 0x7a4   : > { %3313 = vmatprep.subr.bf16.mxu1 %v5911_v50 }
 0x7a7   : > { %3314 = vmatpush1.bf16.msra.mxu1 %v5909_v9 }
 0x7a8   : > { %3315 = vmatprep.subr.bf16.mxu1 %v5914_v11 }
 0x7ab   : > { %3316 = vmatpush1.bf16.msra.mxu1 %v5912_v17 }
 0x7ac   : > { %3317 = vmatprep.subr.bf16.mxu1 %v5917_v26 }
 0x7af   : > { %3318 = vmatpush1.bf16.msra.mxu1 %v5915_v12 }
 0x7b0   : > { %3319 = vmatprep.subr.bf16.mxu1 %v5920_v13 }
 0x7b3   : > { %3320 = vmatpush1.bf16.msra.mxu1 %v5918_v62 }
 0x7b4   : > { %3321 = vmatprep.subr.bf16.mxu1 %v5923_v16 }
 0x7b7   : > { %3322 = vmatpush1.bf16.msra.mxu1 %v5921_v10 }
 0x80a   : > { %v3122_v21 = vpop.permute.xlu1 %3121 }
 0x80b   : > { %v3127_v23 = vsel %vm3126_vm3, %v3125_v20, %v3122_v21 }
 0x80c   : > { %3128 = vst [vmem:[#allocation26] sm:$0x3] %v3127_v23 }
 0x86d   : > { %v3191_v24 = vpop.f32.mrb[8].mxu1 }
 0x86e   : > { %v3192_v30 = vadd.f32 %v5463_v27, %v3191_v24  ;;  %v5592_v22 = vpop.f32.mrb[9].mxu1 }
 0x86f   : > { %v3194_v28 = vpop.f32.mrb[10].mxu1 }
 0x870   : > { %v3197_v29 = vmax.f32 %v3192_v30, 0.0  ;;  %v5593_v31 = vpop.f32.mrb[11].mxu1 }
 0x872   : > { %v3198_v33 = vpack.c.bf16 %v3197_v29, %v3197_v29 }
 0x874   : > { %3340 = vmatmul.mubr.bf16.vlgmr.msra.gmra.mrb[12].mxu1 %v3198_v33 }
 0x947   : > { %v3341_v36 = vpop.f32.mrb[12].mxu1 }
 0x948   : > { %v3342_v40 = vadd.f32 %v3341_v36, %v3220_v34  ;;  %v3343_v35 = vpop.f32.mrb[13].mxu1 }
 0x949   : > { %v3344_v38 = vadd.f32 %v3343_v35, %v3224_v32  ;;  %v3345_v39 = vpop.f32.mrb[14].mxu1 }
 0x94a   : > { %v3348_v43 = vmax.f32 %v3342_v40, 0.0  ;;  %v3346_v53 = vpop.f32.mrb[15].mxu1 }
 0x94b   : > { %v3349_v47 = vmax.f32 %v3344_v38, 0.0 }
 0x94d   : > { %v5483_v41 = vpack.c.bf16 %v3349_v47, %v3348_v43 }
 0x94f   : > { %v3361_v42 = vrot.slane %v5483_v41, %v7126_v49 }
 0x951   : > { %5484 = vst.sshfl [vmem:[#allocation2] sm:$0x5 pattern:$0x73625140] %v3361_v42 }
 0x952 PF: > { %v3373_v14 = vld [vmem:[%s7104_s23 + $0x8] sm:$0xff]  ;;  %v3375_v55 = vld [vmem:[%s7104_s23 + $0x18] sm:$0xff]  ;;  %v3372_v45 = vld [vmem:[%s7104_s23] sm:$0xff]  ;;  %v3984_v11 = vlaneseq  ;;  %v6558_v16 = vmov 1966171168   ;;  %s6559_s4 = smov [#allocation26]  }
 0x953   : > { %v3573_v46 = vunpack.c.l.s8.bf16 %v3373_v14  ;;  %v3598_v48 = vunpack.c.h.s8.bf16 %v3373_v14  ;;  %v3575_v52 = vunpack.c.l.s8.bf16 %v3375_v55  ;;  %v3600_v3 = vunpack.c.h.s8.bf16 %v3375_v55  ;;  %v3374_v63 = vld [vmem:[%s7104_s23 + $0x10] sm:$0xff]  ;;  %v3400_v44 = vld [vmem:[%s7104_s23 + $0xe0] sm:$0xff]  ;;  %v3397_v60 = vld [vmem:[%s7104_s23 + $0xc8] sm:$0xff]  ;;  %s5154_s6 = sshll.u32 %s6559_s4, 4  ;;  %s5155_s6 = int_to_ptr.vmem [resolvable:$true] %s5154_s6 }
 0x954   : > { %v3572_v58 = vunpack.c.l.s8.bf16 %v3372_v45  ;;  %v3574_v49 = vunpack.c.l.s8.bf16 %v3374_v63  ;;  %v3398_v54 = vld [vmem:[%s7104_s23 + $0xd0] sm:$0xff]  ;;  %v3597_v56 = vunpack.c.h.s8.bf16 %v3372_v45  ;;  %v3599_v57 = vunpack.c.h.s8.bf16 %v3374_v63  ;;  %v3399_v25 = vld [vmem:[%s7104_s23 + $0xd8] sm:$0xff]  ;;  %v3425_v7 = vld [vmem:[%s7104_s23 + $0x1a8] sm:$0xff]  ;;  %s6402_s8 = scalar_lea.vmem %s5155_s6, 32  ;;  %p6409_p4 = scmp.lt.s32.totalorder %s5155_s6, %s5155_s6 }
 0x955   : > { %3997 = vmatprep.subr.bf16.mxu0 %v3573_v46  ;;  %4038 = vmatprep.subr.bf16.mxu1 %v3575_v52  ;;  %v3623_v8 = vunpack.c.l.s8.bf16 %v3398_v54  ;;  %v3625_v59 = vunpack.c.l.s8.bf16 %v3400_v44  ;;  %v3622_v0 = vunpack.c.l.s8.bf16 %v3397_v60  ;;  %v3624_v61 = vunpack.c.l.s8.bf16 %v3399_v25  ;;  %v3423_v15 = vld [vmem:[%s7104_s23 + $0x198] sm:$0xff]  ;;  %v3422_v50 = vld [vmem:[%s7104_s23 + $0x190] sm:$0xff]  ;;  %v3424_v9 = vld [vmem:[%s7104_s23 + $0x1a0] sm:$0xff]  ;;  %p6403_p11 = scmp.ne.s32.totalorder %s5155_s6, %s6402_s8  ;;  %p6410_p2 = scmp.lt.s32.totalorder %s6402_s8, %s6402_s8 }
 0x956   : > { %3998 = vmatpush1.bf16.msra.mxu0 %v3572_v58  ;;  %4039 = vmatpush1.bf16.msra.mxu1 %v3574_v49  ;;  %v3648_v1 = vunpack.c.h.s8.bf16 %v3398_v54  ;;  %v3650_v2 = vunpack.c.h.s8.bf16 %v3400_v44  ;;  %v3647_v51 = vunpack.c.h.s8.bf16 %v3397_v60  ;;  %v3649_v4 = vunpack.c.h.s8.bf16 %v3399_v25  ;;  %v3448_v18 = vld [vmem:[%s7104_s23 + $0x260] sm:$0xff]  ;;  %v3450_v20 = vld [vmem:[%s7104_s23 + $0x270] sm:$0xff]  ;;  %v3447_v28 = vld [vmem:[%s7104_s23 + $0x258] sm:$0xff] }
 0x957   : > { %3999 = vmatprep.subr.bf16.mxu0 %v3598_v48  ;;  %4040 = vmatprep.subr.bf16.mxu1 %v3600_v3  ;;  %v3673_v5 = vunpack.c.l.s8.bf16 %v3423_v15  ;;  %v3675_v6 = vunpack.c.l.s8.bf16 %v3425_v7  ;;  %v3672_v17 = vunpack.c.l.s8.bf16 %v3422_v50  ;;  %v3674_v26 = vunpack.c.l.s8.bf16 %v3424_v9  ;;  %v3449_v29 = vld [vmem:[%s7104_s23 + $0x268] sm:$0xff]  ;;  %v3475_v35 = vld [vmem:[%s7104_s23 + $0x338] sm:$0xff]  ;;  %v3472_v47 = vld [vmem:[%s7104_s23 + $0x320] sm:$0xff]  ;;  %p6411_p5 = por %p6410_p2, %p6409_p4 }
 0x958   : > { %v7380_v12 = vld.sshfl [vmem:[#allocation2] sm:$0x11 pattern:$0x75316420]  ;;  %v3698_v13 = vunpack.c.h.s8.bf16 %v3423_v15  ;;  %v3700_v62 = vunpack.c.h.s8.bf16 %v3425_v7  ;;  %v3982_v10 = vunpack.c.l.s4 %v6558_v16  ;;  %v7382_v19 = vshrl.u32 %v3984_v11, 7  ;;  %v3473_v40 = vld [vmem:[%s7104_s23 + $0x328] sm:$0xff] }
 0x959   : > { %v3980_v21 = vcombine.high %v7380_v12, %v7380_v12  ;;  %v3697_v27 = vunpack.c.h.s8.bf16 %v3422_v50  ;;  %v3699_v24 = vunpack.c.h.s8.bf16 %v3424_v9  ;;  %v3723_v30 = vunpack.c.l.s8.bf16 %v3448_v18  ;;  %v3474_v41 = vld [vmem:[%s7104_s23 + $0x330] sm:$0xff]  ;;  %v3500_v48 = vld [vmem:[%s7104_s23 + $0x400] sm:$0xff]  ;;  %v3497_v49 = vld [vmem:[%s7104_s23 + $0x3e8] sm:$0xff] }
 0x95a   : > { %4000 = vmatpush1.bf16.msra.mxu0 %v3597_v56  ;;  %4041 = vmatpush1.bf16.msra.mxu1 %v3599_v57  ;;  %v3983_v23 = vunpack.c.0.s8 %v3982_v10  ;;  %v3725_v22 = vunpack.c.l.s8.bf16 %v3450_v20  ;;  %v3722_v37 = vunpack.c.l.s8.bf16 %v3447_v28  ;;  %v3724_v34 = vunpack.c.l.s8.bf16 %v3449_v29  ;;  %v3498_v46 = vld [vmem:[%s7104_s23 + $0x3f0] sm:$0xff]  ;;  %v3499_v54 = vld [vmem:[%s7104_s23 + $0x3f8] sm:$0xff]  ;;  %v3525_v60 = vld [vmem:[%s7104_s23 + $0x4c8] sm:$0xff] }
 0x95b   : > { %4001 = vmatprep.subr.bf16.mxu0 %v3623_v8  ;;  %4042 = vmatprep.subr.bf16.mxu1 %v3625_v59  ;;  %v3748_v32 = vunpack.c.h.s8.bf16 %v3448_v18  ;;  %v3750_v36 = vunpack.c.h.s8.bf16 %v3450_v20  ;;  %v3747_v38 = vunpack.c.h.s8.bf16 %v3447_v28  ;;  %v3749_v39 = vunpack.c.h.s8.bf16 %v3449_v29  ;;  %v3523_v59 = vld [vmem:[%s7104_s23 + $0x4b8] sm:$0xff]  ;;  %v3524_v15 = vld [vmem:[%s7104_s23 + $0x4c0] sm:$0xff]  ;;  %v3550_v50 = vld [vmem:[%s7104_s23 + $0x590] sm:$0xff] }
 0x95c   : > { %v7391_v31 = vsub.s32 %v3983_v23, %v7382_v19  ;;  %v3773_v43 = vunpack.c.l.s8.bf16 %v3473_v40  ;;  %v3775_v53 = vunpack.c.l.s8.bf16 %v3475_v35  ;;  %v3772_v42 = vunpack.c.l.s8.bf16 %v3472_v47  ;;  %v3379_v23 = vld [vmem:[%s7104_s23 + $0x38] sm:$0xff]  ;;  %v3376_v28 = vld [vmem:[%s7104_s23 + $0x20] sm:$0xff]  ;;  %v3378_v29 = vld [vmem:[%s7104_s23 + $0x30] sm:$0xff] }
 0x95d   : > { %v3774_v14 = vunpack.c.l.s8.bf16 %v3474_v41  ;;  %v3798_v55 = vunpack.c.h.s8.bf16 %v3473_v40  ;;  %v3800_v45 = vunpack.c.h.s8.bf16 %v3475_v35  ;;  %v3797_v52 = vunpack.c.h.s8.bf16 %v3472_v47  ;;  %v3402_v35 = vld [vmem:[%s7104_s23 + $0xf0] sm:$0xff]  ;;  %v3401_v47 = vld [vmem:[%s7104_s23 + $0xe8] sm:$0xff] }
 0x95e   : > { %4002 = vmatpush1.bf16.msra.mxu0 %v3622_v0  ;;  %4043 = vmatpush1.bf16.msra.mxu1 %v3624_v61  ;;  %v7394_v33 = vrot.slane %v3980_v21, %v7391_v31  ;;  %v3799_v3 = vunpack.c.h.s8.bf16 %v3474_v41  ;;  %v3823_v63 = vunpack.c.l.s8.bf16 %v3498_v46  ;;  %v3825_v58 = vunpack.c.l.s8.bf16 %v3500_v48  ;;  %v3377_v21 = vld [vmem:[%s7104_s23 + $0x28] sm:$0xff]  ;;  %v3403_v41 = vld [vmem:[%s7104_s23 + $0xf8] sm:$0xff] }
 0x95f   : > { %4003 = vmatprep.subr.bf16.mxu0 %v3648_v1  ;;  %4044 = vmatprep.subr.bf16.mxu1 %v3650_v2  ;;  %v3822_v44 = vunpack.c.l.s8.bf16 %v3497_v49  ;;  %v3824_v56 = vunpack.c.l.s8.bf16 %v3499_v54  ;;  %v3848_v57 = vunpack.c.h.s8.bf16 %v3498_v46  ;;  %v3850_v8 = vunpack.c.h.s8.bf16 %v3500_v48  ;;  %v3522_v2 = vld [vmem:[%s7104_s23 + $0x4b0] sm:$0xff]  ;;  %v3427_v46 = vld [vmem:[%s7104_s23 + $0x1b8] sm:$0xff]  ;;  %v3429_v48 = vld [vmem:[%s7104_s23 + $0x1c8] sm:$0xff] }
 0x960   : > { %4029 = vmatprep.mubr.bf16.mxu0 %v7394_v33  ;;  %4070 = vmatprep.mubr.bf16.mxu1 %v7394_v33  ;;  %v3847_v25 = vunpack.c.h.s8.bf16 %v3497_v49  ;;  %v3849_v0 = vunpack.c.h.s8.bf16 %v3499_v54  ;;  %v3873_v61 = vunpack.c.l.s8.bf16 %v3523_v59  ;;  %v3875_v1 = vunpack.c.l.s8.bf16 %v3525_v60  ;;  %v3426_v49 = vld [vmem:[%s7104_s23 + $0x1b0] sm:$0xff]  ;;  %v3428_v54 = vld [vmem:[%s7104_s23 + $0x1c0] sm:$0xff] }
 0x961   : > { %v3872_v7 = vunpack.c.l.s8.bf16 %v3522_v2  ;;  %v3897_v9 = vunpack.c.h.s8.bf16 %v3522_v2  ;;  %v3899_v11 = vunpack.c.h.s8.bf16 %v3524_v15  ;;  %v3950_v20 = vunpack.c.h.s8.bf16 %v3550_v50  ;;  %v3451_v2 = vld [vmem:[%s7104_s23 + $0x278] sm:$0xff] }
 0x962   : > { %4004 = vmatpush1.bf16.msra.mxu0 %v3647_v51  ;;  %4045 = vmatpush1.bf16.msra.mxu1 %v3649_v4  ;;  %v3874_v51 = vunpack.c.l.s8.bf16 %v3524_v15  ;;  %v3898_v4 = vunpack.c.h.s8.bf16 %v3523_v59  ;;  %v3604_v40 = vunpack.c.h.s8.bf16 %v3379_v23  ;;  %v3452_v59 = vld [vmem:[%s7104_s23 + $0x280] sm:$0xff]  ;;  %v3453_v15 = vld [vmem:[%s7104_s23 + $0x288] sm:$0xff]  ;;  %vm4847_vm4 = vcmp.ge.s32.totalorder %v7382_v19, 1 }
 0x963   : > { %4005 = vmatprep.subr.bf16.mxu0 %v3673_v5  ;;  %4046 = vmatprep.subr.bf16.mxu1 %v3675_v6  ;;  %v3900_v5 = vunpack.c.h.s8.bf16 %v3525_v60  ;;  %v3548_v6 = vld [vmem:[%s7104_s23 + $0x580] sm:$0xff]  ;;  %v3454_v60 = vld [vmem:[%s7104_s23 + $0x290] sm:$0xff] }
 0x964   : > { %v3948_v18 = vunpack.c.h.s8.bf16 %v3548_v6 }
 0x966   : > { %4006 = vmatpush1.bf16.msra.mxu0 %v3672_v17  ;;  %4047 = vmatpush1.bf16.msra.mxu1 %v3674_v26  ;;  %v3923_v17 = vunpack.c.l.s8.bf16 %v3548_v6  ;;  %v3925_v26 = vunpack.c.l.s8.bf16 %v3550_v50  ;;  %v3477_v6 = vld [vmem:[%s7104_s23 + $0x348] sm:$0xff]  ;;  %v3479_v50 = vld [vmem:[%s7104_s23 + $0x358] sm:$0xff] }
 0x967   : > { %4007 = vmatprep.subr.bf16.mxu0 %v3698_v13  ;;  %4048 = vmatprep.subr.bf16.mxu1 %v3700_v62  ;;  %v3547_v13 = vld [vmem:[%s7104_s23 + $0x578] sm:$0xff]  ;;  %v3549_v62 = vld [vmem:[%s7104_s23 + $0x588] sm:$0xff] }
 0x968   : > { %v3922_v16 = vunpack.c.l.s8.bf16 %v3547_v13  ;;  %v3924_v10 = vunpack.c.l.s8.bf16 %v3549_v62 }
 0x96a   : > { %4008 = vmatpush1.bf16.msra.mxu0 %v3697_v27  ;;  %4049 = vmatpush1.bf16.msra.mxu1 %v3699_v24  ;;  %v3947_v27 = vunpack.c.h.s8.bf16 %v3547_v13  ;;  %v3949_v24 = vunpack.c.h.s8.bf16 %v3549_v62  ;;  %v3476_v13 = vld [vmem:[%s7104_s23 + $0x340] sm:$0xff]  ;;  %v3478_v62 = vld [vmem:[%s7104_s23 + $0x350] sm:$0xff] }
 0x96b   : > { %4009 = vmatprep.subr.bf16.mxu0 %v3723_v30  ;;  %4050 = vmatprep.subr.bf16.mxu1 %v3725_v22  ;;  %v3577_v30 = vunpack.c.l.s8.bf16 %v3377_v21  ;;  %v3579_v22 = vunpack.c.l.s8.bf16 %v3379_v23  ;;  %v3504_v23 = vld [vmem:[%s7104_s23 + $0x420] sm:$0xff] }
 0x96e   : > { %4010 = vmatpush1.bf16.msra.mxu0 %v3722_v37  ;;  %4051 = vmatpush1.bf16.msra.mxu1 %v3724_v34  ;;  %v7420_v37 = vrot.slane %v7380_v12, %v7391_v31  ;;  %v3576_v34 = vunpack.c.l.s8.bf16 %v3376_v28  ;;  %v3601_v12 = vunpack.c.h.s8.bf16 %v3376_v28  ;;  %v3501_v28 = vld [vmem:[%s7104_s23 + $0x408] sm:$0xff] }
 0x96f   : > { %4011 = vmatprep.subr.bf16.mxu0 %v3748_v32  ;;  %4052 = vmatprep.subr.bf16.mxu1 %v3750_v36  ;;  %v3578_v32 = vunpack.c.l.s8.bf16 %v3378_v29  ;;  %v3602_v36 = vunpack.c.h.s8.bf16 %v3377_v21  ;;  %v3502_v21 = vld [vmem:[%s7104_s23 + $0x410] sm:$0xff] }
 0x972   : > { %4012 = vmatpush1.bf16.msra.mxu0 %v3747_v38  ;;  %4053 = vmatpush1.bf16.msra.mxu1 %v3749_v39  ;;  %v3404_v38 = vld [vmem:[%s7104_s23 + $0x100] sm:$0xff]  ;;  %v3603_v39 = vunpack.c.h.s8.bf16 %v3378_v29  ;;  %v3503_v29 = vld [vmem:[%s7104_s23 + $0x418] sm:$0xff] }
 0x973   : > { %4013 = vmatprep.subr.bf16.mxu0 %v3773_v43  ;;  %4054 = vmatprep.subr.bf16.mxu1 %v3775_v53  ;;  %v3627_v43 = vunpack.c.l.s8.bf16 %v3402_v35  ;;  %v3629_v53 = vunpack.c.l.s8.bf16 %v3404_v38 }
 0x976   : > { %4014 = vmatpush1.bf16.msra.mxu0 %v3772_v42  ;;  %4055 = vmatpush1.bf16.msra.mxu1 %v3774_v14  ;;  %v3626_v42 = vunpack.c.l.s8.bf16 %v3401_v47  ;;  %v3628_v14 = vunpack.c.l.s8.bf16 %v3403_v41 }
 0x977   : > { %4015 = vmatprep.subr.bf16.mxu0 %v3798_v55  ;;  %4056 = vmatprep.subr.bf16.mxu1 %v3800_v45  ;;  %v3652_v55 = vunpack.c.h.s8.bf16 %v3402_v35  ;;  %v3654_v45 = vunpack.c.h.s8.bf16 %v3404_v38  ;;  %v3527_v35 = vld [vmem:[%s7104_s23 + $0x4d8] sm:$0xff]  ;;  %v3529_v38 = vld [vmem:[%s7104_s23 + $0x4e8] sm:$0xff] }
 0x97a   : > { %4016 = vmatpush1.bf16.msra.mxu0 %v3797_v52  ;;  %4057 = vmatpush1.bf16.msra.mxu1 %v3799_v3  ;;  %v3651_v52 = vunpack.c.h.s8.bf16 %v3401_v47  ;;  %v3653_v3 = vunpack.c.h.s8.bf16 %v3403_v41  ;;  %v3526_v47 = vld [vmem:[%s7104_s23 + $0x4d0] sm:$0xff]  ;;  %v3528_v41 = vld [vmem:[%s7104_s23 + $0x4e0] sm:$0xff] }
 0x97b   : > { %4017 = vmatprep.subr.bf16.mxu0 %v3823_v63  ;;  %4058 = vmatprep.subr.bf16.mxu1 %v3825_v58  ;;  %v3677_v63 = vunpack.c.l.s8.bf16 %v3427_v46  ;;  %v3679_v58 = vunpack.c.l.s8.bf16 %v3429_v48 }
 0x97e   : > { %4018 = vmatpush1.bf16.msra.mxu0 %v3822_v44  ;;  %4059 = vmatpush1.bf16.msra.mxu1 %v3824_v56  ;;  %v3676_v44 = vunpack.c.l.s8.bf16 %v3426_v49  ;;  %v3678_v56 = vunpack.c.l.s8.bf16 %v3428_v54 }
 0x97f   : > { %4019 = vmatprep.subr.bf16.mxu0 %v3848_v57  ;;  %4060 = vmatprep.subr.bf16.mxu1 %v3850_v8  ;;  %v3702_v57 = vunpack.c.h.s8.bf16 %v3427_v46  ;;  %v3704_v8 = vunpack.c.h.s8.bf16 %v3429_v48  ;;  %v3552_v46 = vld [vmem:[%s7104_s23 + $0x5a0] sm:$0xff]  ;;  %v3554_v48 = vld [vmem:[%s7104_s23 + $0x5b0] sm:$0xff] }
 0x982   : > { %4020 = vmatpush1.bf16.msra.mxu0 %v3847_v25  ;;  %4061 = vmatpush1.bf16.msra.mxu1 %v3849_v0  ;;  %v3701_v25 = vunpack.c.h.s8.bf16 %v3426_v49  ;;  %v3703_v0 = vunpack.c.h.s8.bf16 %v3428_v54  ;;  %v3551_v49 = vld [vmem:[%s7104_s23 + $0x598] sm:$0xff]  ;;  %v3553_v54 = vld [vmem:[%s7104_s23 + $0x5a8] sm:$0xff] }
 0x983   : > { %4021 = vmatprep.subr.bf16.mxu0 %v3873_v61  ;;  %4062 = vmatprep.subr.bf16.mxu1 %v3875_v1  ;;  %v3727_v61 = vunpack.c.l.s8.bf16 %v3452_v59  ;;  %v3729_v1 = vunpack.c.l.s8.bf16 %v3454_v60 }
 0x986   : > { %4022 = vmatpush1.bf16.msra.mxu0 %v3872_v7  ;;  %4063 = vmatpush1.bf16.msra.mxu1 %v3874_v51  ;;  %v3726_v7 = vunpack.c.l.s8.bf16 %v3451_v2  ;;  %v3728_v51 = vunpack.c.l.s8.bf16 %v3453_v15 }
 0x987   : > { %4023 = vmatprep.subr.bf16.mxu0 %v3898_v4  ;;  %4064 = vmatprep.subr.bf16.mxu1 %v3900_v5  ;;  %v3752_v4 = vunpack.c.h.s8.bf16 %v3452_v59  ;;  %v3754_v5 = vunpack.c.h.s8.bf16 %v3454_v60  ;;  %v3381_v59 = vld [vmem:[%s7104_s23 + $0x48] sm:$0xff]  ;;  %v3383_v60 = vld [vmem:[%s7104_s23 + $0x58] sm:$0xff] }
 0x98a   : > { %4024 = vmatpush1.bf16.msra.mxu0 %v3897_v9  ;;  %4065 = vmatpush1.bf16.msra.mxu1 %v3899_v11  ;;  %v3751_v9 = vunpack.c.h.s8.bf16 %v3451_v2  ;;  %v3753_v11 = vunpack.c.h.s8.bf16 %v3453_v15  ;;  %v3380_v2 = vld [vmem:[%s7104_s23 + $0x40] sm:$0xff]  ;;  %v3382_v15 = vld [vmem:[%s7104_s23 + $0x50] sm:$0xff] }
 0x98b   : > { %4025 = vmatprep.subr.bf16.mxu0 %v3923_v17  ;;  %4066 = vmatprep.subr.bf16.mxu1 %v3925_v26  ;;  %v3777_v17 = vunpack.c.l.s8.bf16 %v3477_v6  ;;  %v3779_v26 = vunpack.c.l.s8.bf16 %v3479_v50 }
 0x98e   : > { %4026 = vmatpush1.bf16.msra.mxu0 %v3922_v16  ;;  %4067 = vmatpush1.bf16.msra.mxu1 %v3924_v10  ;;  %v3776_v16 = vunpack.c.l.s8.bf16 %v3476_v13  ;;  %v3778_v10 = vunpack.c.l.s8.bf16 %v3478_v62 }
 0x98f   : > { %4027 = vmatprep.subr.bf16.mxu0 %v3948_v18  ;;  %4068 = vmatprep.subr.bf16.mxu1 %v3950_v20  ;;  %v3802_v18 = vunpack.c.h.s8.bf16 %v3477_v6  ;;  %v3804_v20 = vunpack.c.h.s8.bf16 %v3479_v50  ;;  %v3406_v6 = vld [vmem:[%s7104_s23 + $0x110] sm:$0xff]  ;;  %v3408_v50 = vld [vmem:[%s7104_s23 + $0x120] sm:$0xff] }
 0x992   : > { %4028 = vmatpush1.bf16.msra.mxu0 %v3947_v27  ;;  %4069 = vmatpush1.bf16.msra.mxu1 %v3949_v24  ;;  %v3801_v27 = vunpack.c.h.s8.bf16 %v3476_v13  ;;  %v3803_v24 = vunpack.c.h.s8.bf16 %v3478_v62  ;;  %v3405_v13 = vld [vmem:[%s7104_s23 + $0x108] sm:$0xff]  ;;  %v3407_v62 = vld [vmem:[%s7104_s23 + $0x118] sm:$0xff] }
 0x993   : > { %4079 = vmatprep.subr.bf16.mxu0 %v3577_v30  ;;  %4120 = vmatprep.subr.bf16.mxu1 %v3579_v22  ;;  %v3827_v30 = vunpack.c.l.s8.bf16 %v3502_v21  ;;  %v3829_v22 = vunpack.c.l.s8.bf16 %v3504_v23 }
 0x995   : > { %4030 = vmatmul.mubr.bf16.vlgmr.msra.gmra.mrb[0].mxu0 %v7420_v37  ;;  %4071 = vmatmul.mubr.bf16.vlgmr.msra.gmra.mrb[0].mxu1 %v7420_v37 }
 0x996   : > { %4080 = vmatpush1.bf16.msra.mxu0 %v3576_v34  ;;  %4121 = vmatpush1.bf16.msra.mxu1 %v3578_v32  ;;  %v3826_v34 = vunpack.c.l.s8.bf16 %v3501_v28  ;;  %v3828_v32 = vunpack.c.l.s8.bf16 %v3503_v29 }
 0x997   : > { %4081 = vmatprep.subr.bf16.mxu0 %v3602_v36  ;;  %4122 = vmatprep.subr.bf16.mxu1 %v3604_v40  ;;  %v3852_v36 = vunpack.c.h.s8.bf16 %v3502_v21  ;;  %v3854_v40 = vunpack.c.h.s8.bf16 %v3504_v23  ;;  %v3431_v21 = vld [vmem:[%s7104_s23 + $0x1d8] sm:$0xff]  ;;  %v3433_v23 = vld [vmem:[%s7104_s23 + $0x1e8] sm:$0xff] }
 0x998   : > { %4111 = vmatprep.mubr.bf16.mxu0 %v7394_v33  ;;  %4152 = vmatprep.mubr.bf16.mxu1 %v7394_v33 }
 0x99a   : > { %4082 = vmatpush1.bf16.msra.mxu0 %v3601_v12  ;;  %4123 = vmatpush1.bf16.msra.mxu1 %v3603_v39  ;;  %v3851_v12 = vunpack.c.h.s8.bf16 %v3501_v28  ;;  %v3853_v39 = vunpack.c.h.s8.bf16 %v3503_v29  ;;  %v3430_v28 = vld [vmem:[%s7104_s23 + $0x1d0] sm:$0xff]  ;;  %v3432_v29 = vld [vmem:[%s7104_s23 + $0x1e0] sm:$0xff] }
 0x99b   : > { %4083 = vmatprep.subr.bf16.mxu0 %v3627_v43  ;;  %4124 = vmatprep.subr.bf16.mxu1 %v3629_v53  ;;  %v3877_v43 = vunpack.c.l.s8.bf16 %v3527_v35  ;;  %v3879_v53 = vunpack.c.l.s8.bf16 %v3529_v38 }
 0x99e   : > { %4084 = vmatpush1.bf16.msra.mxu0 %v3626_v42  ;;  %4125 = vmatpush1.bf16.msra.mxu1 %v3628_v14  ;;  %v3876_v42 = vunpack.c.l.s8.bf16 %v3526_v47  ;;  %v3878_v14 = vunpack.c.l.s8.bf16 %v3528_v41 }
 0x99f   : > { %4085 = vmatprep.subr.bf16.mxu0 %v3652_v55  ;;  %4126 = vmatprep.subr.bf16.mxu1 %v3654_v45  ;;  %v3902_v55 = vunpack.c.h.s8.bf16 %v3527_v35  ;;  %v3904_v45 = vunpack.c.h.s8.bf16 %v3529_v38  ;;  %v3456_v35 = vld [vmem:[%s7104_s23 + $0x2a0] sm:$0xff]  ;;  %v3458_v38 = vld [vmem:[%s7104_s23 + $0x2b0] sm:$0xff] }
 0x9a2   : > { %4086 = vmatpush1.bf16.msra.mxu0 %v3651_v52  ;;  %4127 = vmatpush1.bf16.msra.mxu1 %v3653_v3  ;;  %v3901_v52 = vunpack.c.h.s8.bf16 %v3526_v47  ;;  %v3903_v3 = vunpack.c.h.s8.bf16 %v3528_v41  ;;  %v3455_v47 = vld [vmem:[%s7104_s23 + $0x298] sm:$0xff]  ;;  %v3457_v41 = vld [vmem:[%s7104_s23 + $0x2a8] sm:$0xff] }
 0x9a3   : > { %4087 = vmatprep.subr.bf16.mxu0 %v3677_v63  ;;  %4128 = vmatprep.subr.bf16.mxu1 %v3679_v58  ;;  %v3927_v63 = vunpack.c.l.s8.bf16 %v3552_v46  ;;  %v3929_v58 = vunpack.c.l.s8.bf16 %v3554_v48 }
 0x9a6   : > { %4088 = vmatpush1.bf16.msra.mxu0 %v3676_v44  ;;  %4129 = vmatpush1.bf16.msra.mxu1 %v3678_v56  ;;  %v3926_v44 = vunpack.c.l.s8.bf16 %v3551_v49  ;;  %v3928_v56 = vunpack.c.l.s8.bf16 %v3553_v54 }
 0x9a7   : > { %4089 = vmatprep.subr.bf16.mxu0 %v3702_v57  ;;  %4130 = vmatprep.subr.bf16.mxu1 %v3704_v8  ;;  %v3952_v57 = vunpack.c.h.s8.bf16 %v3552_v46  ;;  %v3954_v8 = vunpack.c.h.s8.bf16 %v3554_v48  ;;  %v3481_v46 = vld [vmem:[%s7104_s23 + $0x368] sm:$0xff]  ;;  %v3483_v48 = vld [vmem:[%s7104_s23 + $0x378] sm:$0xff] }
 0x9aa   : > { %4090 = vmatpush1.bf16.msra.mxu0 %v3701_v25  ;;  %4131 = vmatpush1.bf16.msra.mxu1 %v3703_v0  ;;  %v3951_v25 = vunpack.c.h.s8.bf16 %v3551_v49  ;;  %v3953_v0 = vunpack.c.h.s8.bf16 %v3553_v54  ;;  %v3480_v49 = vld [vmem:[%s7104_s23 + $0x360] sm:$0xff]  ;;  %v3482_v54 = vld [vmem:[%s7104_s23 + $0x370] sm:$0xff] }
 0x9ab   : > { %4091 = vmatprep.subr.bf16.mxu0 %v3727_v61  ;;  %4132 = vmatprep.subr.bf16.mxu1 %v3729_v1  ;;  %v3581_v61 = vunpack.c.l.s8.bf16 %v3381_v59  ;;  %v3583_v1 = vunpack.c.l.s8.bf16 %v3383_v60 }
 0x9ae   : > { %4092 = vmatpush1.bf16.msra.mxu0 %v3726_v7  ;;  %4133 = vmatpush1.bf16.msra.mxu1 %v3728_v51  ;;  %v3580_v7 = vunpack.c.l.s8.bf16 %v3380_v2  ;;  %v3582_v51 = vunpack.c.l.s8.bf16 %v3382_v15 }
 0x9af   : > { %4093 = vmatprep.subr.bf16.mxu0 %v3752_v4  ;;  %4134 = vmatprep.subr.bf16.mxu1 %v3754_v5  ;;  %v3606_v4 = vunpack.c.h.s8.bf16 %v3381_v59  ;;  %v3608_v5 = vunpack.c.h.s8.bf16 %v3383_v60  ;;  %v3506_v59 = vld [vmem:[%s7104_s23 + $0x430] sm:$0xff]  ;;  %v3508_v60 = vld [vmem:[%s7104_s23 + $0x440] sm:$0xff] }
 0x9b2   : > { %4094 = vmatpush1.bf16.msra.mxu0 %v3751_v9  ;;  %4135 = vmatpush1.bf16.msra.mxu1 %v3753_v11  ;;  %v3605_v9 = vunpack.c.h.s8.bf16 %v3380_v2  ;;  %v3607_v11 = vunpack.c.h.s8.bf16 %v3382_v15  ;;  %v3505_v2 = vld [vmem:[%s7104_s23 + $0x428] sm:$0xff]  ;;  %v3507_v15 = vld [vmem:[%s7104_s23 + $0x438] sm:$0xff] }
 0x9b3   : > { %4095 = vmatprep.subr.bf16.mxu0 %v3777_v17  ;;  %4136 = vmatprep.subr.bf16.mxu1 %v3779_v26  ;;  %v3631_v17 = vunpack.c.l.s8.bf16 %v3406_v6  ;;  %v3633_v26 = vunpack.c.l.s8.bf16 %v3408_v50 }
 0x9b6   : > { %4096 = vmatpush1.bf16.msra.mxu0 %v3776_v16  ;;  %4137 = vmatpush1.bf16.msra.mxu1 %v3778_v10  ;;  %v3630_v16 = vunpack.c.l.s8.bf16 %v3405_v13  ;;  %v3632_v10 = vunpack.c.l.s8.bf16 %v3407_v62 }
 0x9b7   : > { %4097 = vmatprep.subr.bf16.mxu0 %v3802_v18  ;;  %4138 = vmatprep.subr.bf16.mxu1 %v3804_v20  ;;  %v3656_v18 = vunpack.c.h.s8.bf16 %v3406_v6  ;;  %v3658_v20 = vunpack.c.h.s8.bf16 %v3408_v50  ;;  %v3531_v6 = vld [vmem:[%s7104_s23 + $0x4f8] sm:$0xff]  ;;  %v3533_v50 = vld [vmem:[%s7104_s23 + $0x508] sm:$0xff] }
 0x9ba   : > { %4098 = vmatpush1.bf16.msra.mxu0 %v3801_v27  ;;  %4139 = vmatpush1.bf16.msra.mxu1 %v3803_v24  ;;  %v3655_v27 = vunpack.c.h.s8.bf16 %v3405_v13  ;;  %v3657_v24 = vunpack.c.h.s8.bf16 %v3407_v62  ;;  %v3530_v13 = vld [vmem:[%s7104_s23 + $0x4f0] sm:$0xff]  ;;  %v3532_v62 = vld [vmem:[%s7104_s23 + $0x500] sm:$0xff] }
 0x9bb   : > { %4099 = vmatprep.subr.bf16.mxu0 %v3827_v30  ;;  %4140 = vmatprep.subr.bf16.mxu1 %v3829_v22  ;;  %v3681_v30 = vunpack.c.l.s8.bf16 %v3431_v21  ;;  %v3683_v22 = vunpack.c.l.s8.bf16 %v3433_v23 }
 0x9be   : > { %4100 = vmatpush1.bf16.msra.mxu0 %v3826_v34  ;;  %4141 = vmatpush1.bf16.msra.mxu1 %v3828_v32  ;;  %v3680_v34 = vunpack.c.l.s8.bf16 %v3430_v28  ;;  %v3682_v32 = vunpack.c.l.s8.bf16 %v3432_v29 }
 0x9bf   : > { %4101 = vmatprep.subr.bf16.mxu0 %v3852_v36  ;;  %4142 = vmatprep.subr.bf16.mxu1 %v3854_v40  ;;  %v3706_v36 = vunpack.c.h.s8.bf16 %v3431_v21  ;;  %v3708_v40 = vunpack.c.h.s8.bf16 %v3433_v23  ;;  %v3556_v21 = vld [vmem:[%s7104_s23 + $0x5c0] sm:$0xff]  ;;  %v3558_v23 = vld [vmem:[%s7104_s23 + $0x5d0] sm:$0xff] }
 0x9c2   : > { %4102 = vmatpush1.bf16.msra.mxu0 %v3851_v12  ;;  %4143 = vmatpush1.bf16.msra.mxu1 %v3853_v39  ;;  %v3705_v12 = vunpack.c.h.s8.bf16 %v3430_v28  ;;  %v3707_v39 = vunpack.c.h.s8.bf16 %v3432_v29  ;;  %v3555_v28 = vld [vmem:[%s7104_s23 + $0x5b8] sm:$0xff]  ;;  %v3557_v29 = vld [vmem:[%s7104_s23 + $0x5c8] sm:$0xff] }
 0x9c3   : > { %4103 = vmatprep.subr.bf16.mxu0 %v3877_v43  ;;  %4144 = vmatprep.subr.bf16.mxu1 %v3879_v53  ;;  %v3731_v43 = vunpack.c.l.s8.bf16 %v3456_v35  ;;  %v3733_v53 = vunpack.c.l.s8.bf16 %v3458_v38 }
 0x9c6   : > { %4104 = vmatpush1.bf16.msra.mxu0 %v3876_v42  ;;  %4145 = vmatpush1.bf16.msra.mxu1 %v3878_v14  ;;  %v3730_v42 = vunpack.c.l.s8.bf16 %v3455_v47  ;;  %v3732_v14 = vunpack.c.l.s8.bf16 %v3457_v41 }
 0x9c7   : > { %4105 = vmatprep.subr.bf16.mxu0 %v3902_v55  ;;  %4146 = vmatprep.subr.bf16.mxu1 %v3904_v45  ;;  %v3756_v55 = vunpack.c.h.s8.bf16 %v3456_v35  ;;  %v3758_v45 = vunpack.c.h.s8.bf16 %v3458_v38  ;;  %v3385_v35 = vld [vmem:[%s7104_s23 + $0x68] sm:$0xff]  ;;  %v3387_v38 = vld [vmem:[%s7104_s23 + $0x78] sm:$0xff] }
 0x9ca   : > { %4106 = vmatpush1.bf16.msra.mxu0 %v3901_v52  ;;  %4147 = vmatpush1.bf16.msra.mxu1 %v3903_v3  ;;  %v3755_v52 = vunpack.c.h.s8.bf16 %v3455_v47  ;;  %v3757_v3 = vunpack.c.h.s8.bf16 %v3457_v41  ;;  %v3384_v47 = vld [vmem:[%s7104_s23 + $0x60] sm:$0xff]  ;;  %v3386_v41 = vld [vmem:[%s7104_s23 + $0x70] sm:$0xff] }
 0x9cb   : > { %4107 = vmatprep.subr.bf16.mxu0 %v3927_v63  ;;  %4148 = vmatprep.subr.bf16.mxu1 %v3929_v58  ;;  %v3781_v63 = vunpack.c.l.s8.bf16 %v3481_v46  ;;  %v3783_v58 = vunpack.c.l.s8.bf16 %v3483_v48 }
 0x9ce   : > { %4108 = vmatpush1.bf16.msra.mxu0 %v3926_v44  ;;  %4149 = vmatpush1.bf16.msra.mxu1 %v3928_v56  ;;  %v3780_v44 = vunpack.c.l.s8.bf16 %v3480_v49  ;;  %v3782_v56 = vunpack.c.l.s8.bf16 %v3482_v54 }
 0x9cf   : > { %4109 = vmatprep.subr.bf16.mxu0 %v3952_v57  ;;  %4150 = vmatprep.subr.bf16.mxu1 %v3954_v8  ;;  %v3806_v57 = vunpack.c.h.s8.bf16 %v3481_v46  ;;  %v3808_v8 = vunpack.c.h.s8.bf16 %v3483_v48  ;;  %v3410_v46 = vld [vmem:[%s7104_s23 + $0x130] sm:$0xff]  ;;  %v3412_v48 = vld [vmem:[%s7104_s23 + $0x140] sm:$0xff] }
 0x9d2   : > { %4110 = vmatpush1.bf16.msra.mxu0 %v3951_v25  ;;  %4151 = vmatpush1.bf16.msra.mxu1 %v3953_v0  ;;  %v3805_v25 = vunpack.c.h.s8.bf16 %v3480_v49  ;;  %v3807_v0 = vunpack.c.h.s8.bf16 %v3482_v54  ;;  %v3409_v49 = vld [vmem:[%s7104_s23 + $0x128] sm:$0xff]  ;;  %v3411_v54 = vld [vmem:[%s7104_s23 + $0x138] sm:$0xff] }
 0x9d3   : > { %4161 = vmatprep.subr.bf16.mxu0 %v3581_v61  ;;  %4202 = vmatprep.subr.bf16.mxu1 %v3583_v1  ;;  %v3831_v61 = vunpack.c.l.s8.bf16 %v3506_v59  ;;  %v3833_v1 = vunpack.c.l.s8.bf16 %v3508_v60 }
 0x9d5   : > { %4112 = vmatmul.mubr.bf16.vlgmr.msra.gmra.mrb[4].mxu0 %v7420_v37  ;;  %4153 = vmatmul.mubr.bf16.vlgmr.msra.gmra.mrb[4].mxu1 %v7420_v37 }
 0x9d6   : > { %4162 = vmatpush1.bf16.msra.mxu0 %v3580_v7  ;;  %4203 = vmatpush1.bf16.msra.mxu1 %v3582_v51  ;;  %v3830_v7 = vunpack.c.l.s8.bf16 %v3505_v2  ;;  %v3832_v51 = vunpack.c.l.s8.bf16 %v3507_v15 }
 0x9d7   : > { %4163 = vmatprep.subr.bf16.mxu0 %v3606_v4  ;;  %4204 = vmatprep.subr.bf16.mxu1 %v3608_v5  ;;  %v3856_v4 = vunpack.c.h.s8.bf16 %v3506_v59  ;;  %v3858_v5 = vunpack.c.h.s8.bf16 %v3508_v60  ;;  %v3435_v59 = vld [vmem:[%s7104_s23 + $0x1f8] sm:$0xff]  ;;  %v3437_v60 = vld [vmem:[%s7104_s23 + $0x208] sm:$0xff] }
 0x9d8   : > { %4193 = vmatprep.mubr.bf16.mxu0 %v7394_v33  ;;  %4234 = vmatprep.mubr.bf16.mxu1 %v7394_v33 }
 0x9da   : > { %4164 = vmatpush1.bf16.msra.mxu0 %v3605_v9  ;;  %4205 = vmatpush1.bf16.msra.mxu1 %v3607_v11  ;;  %v3855_v9 = vunpack.c.h.s8.bf16 %v3505_v2  ;;  %v3857_v11 = vunpack.c.h.s8.bf16 %v3507_v15  ;;  %v3434_v2 = vld [vmem:[%s7104_s23 + $0x1f0] sm:$0xff]  ;;  %v3436_v15 = vld [vmem:[%s7104_s23 + $0x200] sm:$0xff] }
 0x9db   : > { %4165 = vmatprep.subr.bf16.mxu0 %v3631_v17  ;;  %4206 = vmatprep.subr.bf16.mxu1 %v3633_v26  ;;  %v3881_v17 = vunpack.c.l.s8.bf16 %v3531_v6  ;;  %v3883_v26 = vunpack.c.l.s8.bf16 %v3533_v50 }
 0x9de   : > { %4166 = vmatpush1.bf16.msra.mxu0 %v3630_v16  ;;  %4207 = vmatpush1.bf16.msra.mxu1 %v3632_v10  ;;  %v3880_v16 = vunpack.c.l.s8.bf16 %v3530_v13  ;;  %v3882_v10 = vunpack.c.l.s8.bf16 %v3532_v62 }
 0x9df   : > { %4167 = vmatprep.subr.bf16.mxu0 %v3656_v18  ;;  %4208 = vmatprep.subr.bf16.mxu1 %v3658_v20  ;;  %v3906_v18 = vunpack.c.h.s8.bf16 %v3531_v6  ;;  %v3908_v20 = vunpack.c.h.s8.bf16 %v3533_v50  ;;  %v3460_v6 = vld [vmem:[%s7104_s23 + $0x2c0] sm:$0xff]  ;;  %v3462_v50 = vld [vmem:[%s7104_s23 + $0x2d0] sm:$0xff] }
 0x9e2   : > { %4168 = vmatpush1.bf16.msra.mxu0 %v3655_v27  ;;  %4209 = vmatpush1.bf16.msra.mxu1 %v3657_v24  ;;  %v3905_v27 = vunpack.c.h.s8.bf16 %v3530_v13  ;;  %v3907_v24 = vunpack.c.h.s8.bf16 %v3532_v62  ;;  %v3459_v13 = vld [vmem:[%s7104_s23 + $0x2b8] sm:$0xff]  ;;  %v3461_v62 = vld [vmem:[%s7104_s23 + $0x2c8] sm:$0xff] }
 0x9e3   : > { %4169 = vmatprep.subr.bf16.mxu0 %v3681_v30  ;;  %4210 = vmatprep.subr.bf16.mxu1 %v3683_v22  ;;  %v3931_v30 = vunpack.c.l.s8.bf16 %v3556_v21  ;;  %v3933_v22 = vunpack.c.l.s8.bf16 %v3558_v23 }
 0x9e6   : > { %4170 = vmatpush1.bf16.msra.mxu0 %v3680_v34  ;;  %4211 = vmatpush1.bf16.msra.mxu1 %v3682_v32  ;;  %v3930_v34 = vunpack.c.l.s8.bf16 %v3555_v28  ;;  %v3932_v32 = vunpack.c.l.s8.bf16 %v3557_v29 }
 0x9e7   : > { %4171 = vmatprep.subr.bf16.mxu0 %v3706_v36  ;;  %4212 = vmatprep.subr.bf16.mxu1 %v3708_v40  ;;  %v3956_v36 = vunpack.c.h.s8.bf16 %v3556_v21  ;;  %v3958_v40 = vunpack.c.h.s8.bf16 %v3558_v23  ;;  %v3485_v21 = vld [vmem:[%s7104_s23 + $0x388] sm:$0xff]  ;;  %v3487_v23 = vld [vmem:[%s7104_s23 + $0x398] sm:$0xff] }
 0x9ea   : > { %4172 = vmatpush1.bf16.msra.mxu0 %v3705_v12  ;;  %4213 = vmatpush1.bf16.msra.mxu1 %v3707_v39  ;;  %v3955_v12 = vunpack.c.h.s8.bf16 %v3555_v28  ;;  %v3957_v39 = vunpack.c.h.s8.bf16 %v3557_v29  ;;  %v3484_v28 = vld [vmem:[%s7104_s23 + $0x380] sm:$0xff]  ;;  %v3486_v29 = vld [vmem:[%s7104_s23 + $0x390] sm:$0xff] }
 0x9eb   : > { %4173 = vmatprep.subr.bf16.mxu0 %v3731_v43  ;;  %4214 = vmatprep.subr.bf16.mxu1 %v3733_v53  ;;  %v3585_v43 = vunpack.c.l.s8.bf16 %v3385_v35  ;;  %v3587_v53 = vunpack.c.l.s8.bf16 %v3387_v38 }
 0x9ee   : > { %4174 = vmatpush1.bf16.msra.mxu0 %v3730_v42  ;;  %4215 = vmatpush1.bf16.msra.mxu1 %v3732_v14  ;;  %v3584_v42 = vunpack.c.l.s8.bf16 %v3384_v47  ;;  %v3586_v14 = vunpack.c.l.s8.bf16 %v3386_v41 }
 0x9ef   : > { %4175 = vmatprep.subr.bf16.mxu0 %v3756_v55  ;;  %4216 = vmatprep.subr.bf16.mxu1 %v3758_v45  ;;  %v3610_v55 = vunpack.c.h.s8.bf16 %v3385_v35  ;;  %v3612_v45 = vunpack.c.h.s8.bf16 %v3387_v38  ;;  %v3510_v35 = vld [vmem:[%s7104_s23 + $0x450] sm:$0xff]  ;;  %v3512_v38 = vld [vmem:[%s7104_s23 + $0x460] sm:$0xff] }
 0x9f2   : > { %4176 = vmatpush1.bf16.msra.mxu0 %v3755_v52  ;;  %4217 = vmatpush1.bf16.msra.mxu1 %v3757_v3  ;;  %v3609_v52 = vunpack.c.h.s8.bf16 %v3384_v47  ;;  %v3611_v3 = vunpack.c.h.s8.bf16 %v3386_v41  ;;  %v3509_v47 = vld [vmem:[%s7104_s23 + $0x448] sm:$0xff]  ;;  %v3511_v41 = vld [vmem:[%s7104_s23 + $0x458] sm:$0xff] }
 0x9f3   : > { %4177 = vmatprep.subr.bf16.mxu0 %v3781_v63  ;;  %4218 = vmatprep.subr.bf16.mxu1 %v3783_v58  ;;  %v3635_v63 = vunpack.c.l.s8.bf16 %v3410_v46  ;;  %v3637_v58 = vunpack.c.l.s8.bf16 %v3412_v48 }
 0x9f6   : > { %4178 = vmatpush1.bf16.msra.mxu0 %v3780_v44  ;;  %4219 = vmatpush1.bf16.msra.mxu1 %v3782_v56  ;;  %v3634_v44 = vunpack.c.l.s8.bf16 %v3409_v49  ;;  %v3636_v56 = vunpack.c.l.s8.bf16 %v3411_v54 }
 0x9f7   : > { %4179 = vmatprep.subr.bf16.mxu0 %v3806_v57  ;;  %4220 = vmatprep.subr.bf16.mxu1 %v3808_v8  ;;  %v3660_v57 = vunpack.c.h.s8.bf16 %v3410_v46  ;;  %v3662_v8 = vunpack.c.h.s8.bf16 %v3412_v48  ;;  %v3535_v46 = vld [vmem:[%s7104_s23 + $0x518] sm:$0xff]  ;;  %v3537_v48 = vld [vmem:[%s7104_s23 + $0x528] sm:$0xff] }
 0x9fa   : > { %4180 = vmatpush1.bf16.msra.mxu0 %v3805_v25  ;;  %4221 = vmatpush1.bf16.msra.mxu1 %v3807_v0  ;;  %v3659_v25 = vunpack.c.h.s8.bf16 %v3409_v49  ;;  %v3661_v0 = vunpack.c.h.s8.bf16 %v3411_v54  ;;  %v3534_v49 = vld [vmem:[%s7104_s23 + $0x510] sm:$0xff]  ;;  %v3536_v54 = vld [vmem:[%s7104_s23 + $0x520] sm:$0xff] }
 0x9fb   : > { %4181 = vmatprep.subr.bf16.mxu0 %v3831_v61  ;;  %4222 = vmatprep.subr.bf16.mxu1 %v3833_v1  ;;  %v3685_v61 = vunpack.c.l.s8.bf16 %v3435_v59  ;;  %v3687_v1 = vunpack.c.l.s8.bf16 %v3437_v60 }
 0x9fe   : > { %4182 = vmatpush1.bf16.msra.mxu0 %v3830_v7  ;;  %4223 = vmatpush1.bf16.msra.mxu1 %v3832_v51  ;;  %v3684_v7 = vunpack.c.l.s8.bf16 %v3434_v2  ;;  %v3686_v51 = vunpack.c.l.s8.bf16 %v3436_v15 }
 0x9ff   : > { %4183 = vmatprep.subr.bf16.mxu0 %v3856_v4  ;;  %4224 = vmatprep.subr.bf16.mxu1 %v3858_v5  ;;  %v3710_v4 = vunpack.c.h.s8.bf16 %v3435_v59  ;;  %v3712_v5 = vunpack.c.h.s8.bf16 %v3437_v60  ;;  %v3560_v59 = vld [vmem:[%s7104_s23 + $0x5e0] sm:$0xff]  ;;  %v3562_v60 = vld [vmem:[%s7104_s23 + $0x5f0] sm:$0xff] }
 0xa02   : > { %4184 = vmatpush1.bf16.msra.mxu0 %v3855_v9  ;;  %4225 = vmatpush1.bf16.msra.mxu1 %v3857_v11  ;;  %v3709_v9 = vunpack.c.h.s8.bf16 %v3434_v2  ;;  %v3711_v11 = vunpack.c.h.s8.bf16 %v3436_v15  ;;  %v3559_v2 = vld [vmem:[%s7104_s23 + $0x5d8] sm:$0xff]  ;;  %v3561_v15 = vld [vmem:[%s7104_s23 + $0x5e8] sm:$0xff] }
 0xa03   : > { %4185 = vmatprep.subr.bf16.mxu0 %v3881_v17  ;;  %4226 = vmatprep.subr.bf16.mxu1 %v3883_v26  ;;  %v3735_v17 = vunpack.c.l.s8.bf16 %v3460_v6  ;;  %v3737_v26 = vunpack.c.l.s8.bf16 %v3462_v50 }
 0xa06   : > { %4186 = vmatpush1.bf16.msra.mxu0 %v3880_v16  ;;  %4227 = vmatpush1.bf16.msra.mxu1 %v3882_v10  ;;  %v3734_v16 = vunpack.c.l.s8.bf16 %v3459_v13  ;;  %v3736_v10 = vunpack.c.l.s8.bf16 %v3461_v62 }
 0xa07   : > { %4187 = vmatprep.subr.bf16.mxu0 %v3906_v18  ;;  %4228 = vmatprep.subr.bf16.mxu1 %v3908_v20  ;;  %v3760_v18 = vunpack.c.h.s8.bf16 %v3460_v6  ;;  %v3762_v20 = vunpack.c.h.s8.bf16 %v3462_v50  ;;  %v3389_v6 = vld [vmem:[%s7104_s23 + $0x88] sm:$0xff]  ;;  %v3391_v50 = vld [vmem:[%s7104_s23 + $0x98] sm:$0xff] }
 0xa0a   : > { %4188 = vmatpush1.bf16.msra.mxu0 %v3905_v27  ;;  %4229 = vmatpush1.bf16.msra.mxu1 %v3907_v24  ;;  %v3759_v27 = vunpack.c.h.s8.bf16 %v3459_v13  ;;  %v3761_v24 = vunpack.c.h.s8.bf16 %v3461_v62  ;;  %v3388_v13 = vld [vmem:[%s7104_s23 + $0x80] sm:$0xff]  ;;  %v3390_v62 = vld [vmem:[%s7104_s23 + $0x90] sm:$0xff] }
 0xa0b   : > { %4189 = vmatprep.subr.bf16.mxu0 %v3931_v30  ;;  %4230 = vmatprep.subr.bf16.mxu1 %v3933_v22  ;;  %v3785_v30 = vunpack.c.l.s8.bf16 %v3485_v21  ;;  %v3787_v22 = vunpack.c.l.s8.bf16 %v3487_v23 }
 0xa0e   : > { %4190 = vmatpush1.bf16.msra.mxu0 %v3930_v34  ;;  %4231 = vmatpush1.bf16.msra.mxu1 %v3932_v32  ;;  %v3784_v34 = vunpack.c.l.s8.bf16 %v3484_v28  ;;  %v3786_v32 = vunpack.c.l.s8.bf16 %v3486_v29 }
 0xa0f   : > { %4191 = vmatprep.subr.bf16.mxu0 %v3956_v36  ;;  %4232 = vmatprep.subr.bf16.mxu1 %v3958_v40  ;;  %v3810_v36 = vunpack.c.h.s8.bf16 %v3485_v21  ;;  %v3812_v40 = vunpack.c.h.s8.bf16 %v3487_v23  ;;  %v3414_v21 = vld [vmem:[%s7104_s23 + $0x150] sm:$0xff]  ;;  %v3416_v23 = vld [vmem:[%s7104_s23 + $0x160] sm:$0xff] }
 0xa12   : > { %4192 = vmatpush1.bf16.msra.mxu0 %v3955_v12  ;;  %4233 = vmatpush1.bf16.msra.mxu1 %v3957_v39  ;;  %v3809_v12 = vunpack.c.h.s8.bf16 %v3484_v28  ;;  %v3811_v39 = vunpack.c.h.s8.bf16 %v3486_v29  ;;  %v3413_v28 = vld [vmem:[%s7104_s23 + $0x148] sm:$0xff]  ;;  %v3415_v29 = vld [vmem:[%s7104_s23 + $0x158] sm:$0xff] }
 0xa13   : > { %4243 = vmatprep.subr.bf16.mxu0 %v3585_v43  ;;  %4284 = vmatprep.subr.bf16.mxu1 %v3587_v53  ;;  %v3835_v43 = vunpack.c.l.s8.bf16 %v3510_v35  ;;  %v3837_v53 = vunpack.c.l.s8.bf16 %v3512_v38 }
 0xa15   : > { %4194 = vmatmul.mubr.bf16.vlgmr.msra.gmra.mrb[8].mxu0 %v7420_v37  ;;  %4235 = vmatmul.mubr.bf16.vlgmr.msra.gmra.mrb[8].mxu1 %v7420_v37 }
 0xa16   : > { %4244 = vmatpush1.bf16.msra.mxu0 %v3584_v42  ;;  %4285 = vmatpush1.bf16.msra.mxu1 %v3586_v14  ;;  %v3834_v42 = vunpack.c.l.s8.bf16 %v3509_v47  ;;  %v3836_v14 = vunpack.c.l.s8.bf16 %v3511_v41 }
 0xa17   : > { %4245 = vmatprep.subr.bf16.mxu0 %v3610_v55  ;;  %4286 = vmatprep.subr.bf16.mxu1 %v3612_v45  ;;  %v3860_v55 = vunpack.c.h.s8.bf16 %v3510_v35  ;;  %v3862_v45 = vunpack.c.h.s8.bf16 %v3512_v38  ;;  %v3439_v35 = vld [vmem:[%s7104_s23 + $0x218] sm:$0xff]  ;;  %v3441_v38 = vld [vmem:[%s7104_s23 + $0x228] sm:$0xff] }
 0xa18   : > { %4275 = vmatprep.mubr.bf16.mxu0 %v7394_v33  ;;  %4316 = vmatprep.mubr.bf16.mxu1 %v7394_v33 }
 0xa1a   : > { %4246 = vmatpush1.bf16.msra.mxu0 %v3609_v52  ;;  %4287 = vmatpush1.bf16.msra.mxu1 %v3611_v3  ;;  %v3859_v52 = vunpack.c.h.s8.bf16 %v3509_v47  ;;  %v3861_v3 = vunpack.c.h.s8.bf16 %v3511_v41  ;;  %v3438_v47 = vld [vmem:[%s7104_s23 + $0x210] sm:$0xff]  ;;  %v3440_v41 = vld [vmem:[%s7104_s23 + $0x220] sm:$0xff] }
 0xa1b   : > { %4247 = vmatprep.subr.bf16.mxu0 %v3635_v63  ;;  %4288 = vmatprep.subr.bf16.mxu1 %v3637_v58  ;;  %v3885_v63 = vunpack.c.l.s8.bf16 %v3535_v46  ;;  %v3887_v58 = vunpack.c.l.s8.bf16 %v3537_v48 }
 0xa1e   : > { %4248 = vmatpush1.bf16.msra.mxu0 %v3634_v44  ;;  %4289 = vmatpush1.bf16.msra.mxu1 %v3636_v56  ;;  %v3884_v44 = vunpack.c.l.s8.bf16 %v3534_v49  ;;  %v3886_v56 = vunpack.c.l.s8.bf16 %v3536_v54 }
 0xa1f   : > { %4249 = vmatprep.subr.bf16.mxu0 %v3660_v57  ;;  %4290 = vmatprep.subr.bf16.mxu1 %v3662_v8  ;;  %v3910_v57 = vunpack.c.h.s8.bf16 %v3535_v46  ;;  %v3912_v8 = vunpack.c.h.s8.bf16 %v3537_v48  ;;  %v7549_v46 = vld [vmem:[%s7111_s1] sm:$0xff]  ;;  %v7552_v48 = vsub.s32 1, %v7382_v19 }
 0xa22   : > { %4250 = vmatpush1.bf16.msra.mxu0 %v3659_v25  ;;  %4291 = vmatpush1.bf16.msra.mxu1 %v3661_v0  ;;  %v3909_v25 = vunpack.c.h.s8.bf16 %v3534_v49  ;;  %v3911_v0 = vunpack.c.h.s8.bf16 %v3536_v54  ;;  %v3464_v49 = vld [vmem:[%s7104_s23 + $0x2e0] sm:$0xff]  ;;  %v3466_v54 = vld [vmem:[%s7104_s23 + $0x2f0] sm:$0xff] }
 0xa23   : > { %4251 = vmatprep.subr.bf16.mxu0 %v3685_v61  ;;  %4292 = vmatprep.subr.bf16.mxu1 %v3687_v1  ;;  %v3935_v61 = vunpack.c.l.s8.bf16 %v3560_v59  ;;  %v3937_v1 = vunpack.c.l.s8.bf16 %v3562_v60 }
 0xa26   : > { %4252 = vmatpush1.bf16.msra.mxu0 %v3684_v7  ;;  %4293 = vmatpush1.bf16.msra.mxu1 %v3686_v51  ;;  %v3934_v7 = vunpack.c.l.s8.bf16 %v3559_v2  ;;  %v3936_v51 = vunpack.c.l.s8.bf16 %v3561_v15 }
 0xa27   : > { %4253 = vmatprep.subr.bf16.mxu0 %v3710_v4  ;;  %4294 = vmatprep.subr.bf16.mxu1 %v3712_v5  ;;  %v3960_v4 = vunpack.c.h.s8.bf16 %v3560_v59  ;;  %v3962_v5 = vunpack.c.h.s8.bf16 %v3562_v60  ;;  %v3713_v59 = vunpack.c.h.s8.bf16 %v3438_v47  ;;  %v3715_v60 = vunpack.c.h.s8.bf16 %v3440_v41 }
 0xa2a   : > { %4254 = vmatpush1.bf16.msra.mxu0 %v3709_v9  ;;  %4295 = vmatpush1.bf16.msra.mxu1 %v3711_v11  ;;  %v3959_v9 = vunpack.c.h.s8.bf16 %v3559_v2  ;;  %v3961_v11 = vunpack.c.h.s8.bf16 %v3561_v15  ;;  %v3463_v2 = vld [vmem:[%s7104_s23 + $0x2d8] sm:$0xff]  ;;  %v3465_v15 = vld [vmem:[%s7104_s23 + $0x2e8] sm:$0xff] }
 0xa2b   : > { %4255 = vmatprep.subr.bf16.mxu0 %v3735_v17  ;;  %4296 = vmatprep.subr.bf16.mxu1 %v3737_v26  ;;  %v3589_v17 = vunpack.c.l.s8.bf16 %v3389_v6  ;;  %v3591_v26 = vunpack.c.l.s8.bf16 %v3391_v50 }
 0xa2e   : > { %4256 = vmatpush1.bf16.msra.mxu0 %v3734_v16  ;;  %4297 = vmatpush1.bf16.msra.mxu1 %v3736_v10  ;;  %v3588_v16 = vunpack.c.l.s8.bf16 %v3388_v13  ;;  %v3590_v10 = vunpack.c.l.s8.bf16 %v3390_v62 }
 0xa2f   : > { %4257 = vmatprep.subr.bf16.mxu0 %v3760_v18  ;;  %4298 = vmatprep.subr.bf16.mxu1 %v3762_v20  ;;  %v3614_v18 = vunpack.c.h.s8.bf16 %v3389_v6  ;;  %v3616_v20 = vunpack.c.h.s8.bf16 %v3391_v50 }
 0xa32   : > { %4258 = vmatpush1.bf16.msra.mxu0 %v3759_v27  ;;  %4299 = vmatpush1.bf16.msra.mxu1 %v3761_v24  ;;  %v3613_v27 = vunpack.c.h.s8.bf16 %v3388_v13  ;;  %v3615_v24 = vunpack.c.h.s8.bf16 %v3390_v62  ;;  %v3738_v62 = vunpack.c.l.s8.bf16 %v3463_v2 }
 0xa33   : > { %4259 = vmatprep.subr.bf16.mxu0 %v3785_v30  ;;  %4300 = vmatprep.subr.bf16.mxu1 %v3787_v22  ;;  %v3639_v30 = vunpack.c.l.s8.bf16 %v3414_v21  ;;  %v3641_v22 = vunpack.c.l.s8.bf16 %v3416_v23 }
 0xa36   : > { %4260 = vmatpush1.bf16.msra.mxu0 %v3784_v34  ;;  %4301 = vmatpush1.bf16.msra.mxu1 %v3786_v32  ;;  %v3638_v34 = vunpack.c.l.s8.bf16 %v3413_v28  ;;  %v3640_v32 = vunpack.c.l.s8.bf16 %v3415_v29 }
 0xa37   : > { %4261 = vmatprep.subr.bf16.mxu0 %v3810_v36  ;;  %4302 = vmatprep.subr.bf16.mxu1 %v3812_v40  ;;  %v3664_v36 = vunpack.c.h.s8.bf16 %v3414_v21  ;;  %v3666_v40 = vunpack.c.h.s8.bf16 %v3416_v23  ;;  %v3764_v23 = vunpack.c.h.s8.bf16 %v3464_v49 }
 0xa3a   : > { %4262 = vmatpush1.bf16.msra.mxu0 %v3809_v12  ;;  %4303 = vmatpush1.bf16.msra.mxu1 %v3811_v39  ;;  %v3663_v12 = vunpack.c.h.s8.bf16 %v3413_v28  ;;  %v3665_v39 = vunpack.c.h.s8.bf16 %v3415_v29  ;;  %v3489_v28 = vld [vmem:[%s7104_s23 + $0x3a8] sm:$0xff]  ;;  %v3491_v29 = vld [vmem:[%s7104_s23 + $0x3b8] sm:$0xff] }
 0xa3b   : > { %4263 = vmatprep.subr.bf16.mxu0 %v3835_v43  ;;  %4304 = vmatprep.subr.bf16.mxu1 %v3837_v53  ;;  %v3689_v43 = vunpack.c.l.s8.bf16 %v3439_v35  ;;  %v3691_v53 = vunpack.c.l.s8.bf16 %v3441_v38 }
 0xa3e   : > { %4264 = vmatpush1.bf16.msra.mxu0 %v3834_v42  ;;  %4305 = vmatpush1.bf16.msra.mxu1 %v3836_v14  ;;  %v7543_v42 = vsub.s32 0, %v7382_v19  ;;  %v7546_v14 = vsub.s32 2, %v7382_v19 }
 0xa3f   : > { %4265 = vmatprep.subr.bf16.mxu0 %v3860_v55  ;;  %4306 = vmatprep.subr.bf16.mxu1 %v3862_v45  ;;  %v3688_v55 = vunpack.c.l.s8.bf16 %v3438_v47  ;;  %v3690_v45 = vunpack.c.l.s8.bf16 %v3440_v41 }
 0xa42   : > { %4266 = vmatpush1.bf16.msra.mxu0 %v3859_v52  ;;  %4307 = vmatpush1.bf16.msra.mxu1 %v3861_v3  ;;  %v7555_v52 = vsub.s32 3, %v7382_v19  ;;  %v3714_v3 = vunpack.c.h.s8.bf16 %v3439_v35  ;;  %v3763_v35 = vunpack.c.h.s8.bf16 %v3463_v2 }
 0xa43   : > { %4267 = vmatprep.subr.bf16.mxu0 %v3885_v63  ;;  %4308 = vmatprep.subr.bf16.mxu1 %v3887_v58  ;;  %v3716_v63 = vunpack.c.h.s8.bf16 %v3441_v38  ;;  %v7558_v58 = vld [vmem:[%s7113_s16] sm:$0xff]  ;;  %v3765_v38 = vunpack.c.h.s8.bf16 %v3465_v15 }
 0xa46   : > { %4268 = vmatpush1.bf16.msra.mxu0 %v3884_v44  ;;  %4309 = vmatpush1.bf16.msra.mxu1 %v3886_v56  ;;  %v4540_v44 = vrot.slane %v7549_v46, %v7543_v42  ;;  %v4548_v56 = vrot.slane %v7549_v46, %v7546_v14 }
 0xa47   : > { %4269 = vmatprep.subr.bf16.mxu0 %v3910_v57  ;;  %4310 = vmatprep.subr.bf16.mxu1 %v3912_v8  ;;  %v4544_v57 = vrot.slane %v7549_v46, %v7552_v48  ;;  %v4552_v8 = vrot.slane %v7549_v46, %v7555_v52 }
 0xa4a   : > { %4270 = vmatpush1.bf16.msra.mxu0 %v3909_v25  ;;  %4311 = vmatpush1.bf16.msra.mxu1 %v3911_v0  ;;  %v4698_v25 = vrot.slane %v7558_v58, %v7543_v42  ;;  %v4706_v0 = vrot.slane %v7558_v58, %v7546_v14 }
 0xa4b   : > { %4271 = vmatprep.subr.bf16.mxu0 %v3935_v61  ;;  %4312 = vmatprep.subr.bf16.mxu1 %v3937_v1  ;;  %v3739_v61 = vunpack.c.l.s8.bf16 %v3464_v49  ;;  %v3741_v1 = vunpack.c.l.s8.bf16 %v3466_v54 }
 0xa4e   : > { %4272 = vmatpush1.bf16.msra.mxu0 %v3934_v7  ;;  %4313 = vmatpush1.bf16.msra.mxu1 %v3936_v51 }
 0xa4f   : > { %4273 = vmatprep.subr.bf16.mxu0 %v3960_v4  ;;  %4314 = vmatprep.subr.bf16.mxu1 %v3962_v5  ;;  %v4702_v4 = vrot.slane %v7558_v58, %v7552_v48  ;;  %v4710_v5 = vrot.slane %v7558_v58, %v7555_v52 }
 0xa52   : > { %4274 = vmatpush1.bf16.msra.mxu0 %v3959_v9  ;;  %4315 = vmatpush1.bf16.msra.mxu1 %v3961_v11 }
 0xa53   : > { %4325 = vmatprep.subr.bf16.mxu0 %v3589_v17  ;;  %4366 = vmatprep.subr.bf16.mxu1 %v3591_v26 }
 0xa55   : > { %4276 = vmatmul.mubr.bf16.vlgmr.msra.gmra.mrb[12].mxu0 %v7420_v37  ;;  %4317 = vmatmul.mubr.bf16.vlgmr.msra.gmra.mrb[12].mxu1 %v7420_v37 }
 0xa56   : > { %4326 = vmatpush1.bf16.msra.mxu0 %v3588_v16  ;;  %4367 = vmatpush1.bf16.msra.mxu1 %v3590_v10  ;;  %v3740_v16 = vunpack.c.l.s8.bf16 %v3465_v15 }
 0xa57   : > { %4327 = vmatprep.subr.bf16.mxu0 %v3614_v18  ;;  %4368 = vmatprep.subr.bf16.mxu1 %v3616_v20 }
 0xa58   : > { %4357 = vmatprep.mubr.bf16.mxu0 %v7394_v33  ;;  %4398 = vmatprep.mubr.bf16.mxu1 %v7394_v33 }
 0xa5a   : > { %4328 = vmatpush1.bf16.msra.mxu0 %v3613_v27  ;;  %4369 = vmatpush1.bf16.msra.mxu1 %v3615_v24  ;;  %v3766_v27 = vunpack.c.h.s8.bf16 %v3466_v54 }
 0xa5b   : > { %4329 = vmatprep.subr.bf16.mxu0 %v3639_v30  ;;  %4370 = vmatprep.subr.bf16.mxu1 %v3641_v22 }
 0xa5e   : > { %4330 = vmatpush1.bf16.msra.mxu0 %v3638_v34  ;;  %4371 = vmatpush1.bf16.msra.mxu1 %v3640_v32 }
 0xa5f   : > { %4331 = vmatprep.subr.bf16.mxu0 %v3664_v36  ;;  %4372 = vmatprep.subr.bf16.mxu1 %v3666_v40 }
 0xa62   : > { %4332 = vmatpush1.bf16.msra.mxu0 %v3663_v12  ;;  %4373 = vmatpush1.bf16.msra.mxu1 %v3665_v39  ;;  %v3789_v12 = vunpack.c.l.s8.bf16 %v3489_v28  ;;  %v3791_v39 = vunpack.c.l.s8.bf16 %v3491_v29 }
 0xa63   : > { %4333 = vmatprep.subr.bf16.mxu0 %v3689_v43  ;;  %4374 = vmatprep.subr.bf16.mxu1 %v3691_v53  ;;  %v3488_v43 = vld [vmem:[%s7104_s23 + $0x3a0] sm:$0xff]  ;;  %v3490_v53 = vld [vmem:[%s7104_s23 + $0x3b0] sm:$0xff] }
 0xa64   : > { %v3788_v47 = vunpack.c.l.s8.bf16 %v3488_v43  ;;  %v3790_v41 = vunpack.c.l.s8.bf16 %v3490_v53  ;;  %v3813_v49 = vunpack.c.h.s8.bf16 %v3488_v43  ;;  %v3815_v54 = vunpack.c.h.s8.bf16 %v3490_v53  ;;  %v3393_v53 = vld [vmem:[%s7104_s23 + $0xa8] sm:$0xff] }
 0xa66   : > { %4334 = vmatpush1.bf16.msra.mxu0 %v3688_v55  ;;  %4375 = vmatpush1.bf16.msra.mxu1 %v3690_v45  ;;  %v3814_v55 = vunpack.c.h.s8.bf16 %v3489_v28  ;;  %v3816_v45 = vunpack.c.h.s8.bf16 %v3491_v29  ;;  %v3566_v28 = vld [vmem:[%s7104_s23 + $0x610] sm:$0xff] }
 0xa67   : > { %4335 = vmatprep.subr.bf16.mxu0 %v3714_v3  ;;  %4376 = vmatprep.subr.bf16.mxu1 %v3716_v63  ;;  %v3514_v3 = vld [vmem:[%s7104_s23 + $0x470] sm:$0xff]  ;;  %v3516_v63 = vld [vmem:[%s7104_s23 + $0x480] sm:$0xff]  ;;  %v3966_v43 = vunpack.c.h.s8.bf16 %v3566_v28 }
 0xa68   : > { %v4031_v7 = vpop.f32.mrb[0].mxu0  ;;  %v4072_v51 = vpop.f32.mrb[0].mxu1  ;;  %v3864_v15 = vunpack.c.h.s8.bf16 %v3514_v3 }
 0xa69   : > { %v4662_v6 = vmul.f32 %v4540_v44, %v4031_v7  ;;  %v4664_v50 = vmul.f32 %v4548_v56, %v4072_v51  ;;  %v4033_v9 = vpop.f32.mrb[1].mxu0  ;;  %v4074_v11 = vpop.f32.mrb[1].mxu1  ;;  %v3839_v44 = vunpack.c.l.s8.bf16 %v3514_v3  ;;  %v3841_v56 = vunpack.c.l.s8.bf16 %v3516_v63 }
 0xa6a   : > { %v4663_v17 = vmul.f32 %v4544_v57, %v4033_v9  ;;  %v4665_v26 = vmul.f32 %v4552_v8, %v4074_v11  ;;  %v4035_v13 = vpop.f32.mrb[2].mxu0  ;;  %4336 = vmatpush1.bf16.msra.mxu0 %v3713_v59  ;;  %4377 = vmatpush1.bf16.msra.mxu1 %v3715_v60  ;;  %v4076_v10 = vpop.f32.mrb[2].mxu1  ;;  %v3513_v57 = vld [vmem:[%s7104_s23 + $0x468] sm:$0xff]  ;;  %v3515_v8 = vld [vmem:[%s7104_s23 + $0x478] sm:$0xff]  ;;  %v3866_v7 = vunpack.c.h.s8.bf16 %v3516_v63  ;;  %v3392_v63 = vld [vmem:[%s7104_s23 + $0xa0] sm:$0xff] }
 0xa6b   : > { %v4820_v18 = vadd.f32 %v4698_v25, %v4662_v6  ;;  %v4822_v20 = vadd.f32 %v4706_v0, %v4664_v50  ;;  %v4036_v21 = vpop.f32.mrb[3].mxu0  ;;  %4337 = vmatprep.subr.bf16.mxu0 %v3739_v61  ;;  %4378 = vmatprep.subr.bf16.mxu1 %v3741_v1  ;;  %v4077_v24 = vpop.f32.mrb[3].mxu1  ;;  %v3838_v0 = vunpack.c.l.s8.bf16 %v3513_v57  ;;  %v3840_v61 = vunpack.c.l.s8.bf16 %v3515_v8  ;;  %v3541_v6 = vld [vmem:[%s7104_s23 + $0x548] sm:$0xff]  ;;  %v3538_v10 = vld [vmem:[%s7104_s23 + $0x530] sm:$0xff] }
 0xa6c   : > { %v4821_v30 = vadd.f32 %v4702_v4, %v4663_v17  ;;  %v4823_v22 = vadd.f32 %v4710_v5, %v4665_v26  ;;  %v3539_v5 = vld [vmem:[%s7104_s23 + $0x538] sm:$0xff]  ;;  %v3863_v17 = vunpack.c.h.s8.bf16 %v3513_v57  ;;  %v3865_v26 = vunpack.c.h.s8.bf16 %v3515_v8  ;;  %v3418_v8 = vld [vmem:[%s7104_s23 + $0x170] sm:$0xff] }
 0xa6d   : > { %v4848_v34 = vmul.f32 1.442695, %v4820_v18  ;;  %v4852_v32 = vmul.f32 1.442695, %v4822_v20  ;;  %v3914_v24 = vunpack.c.h.s8.bf16 %v3539_v5  ;;  %v3913_v29 = vunpack.c.h.s8.bf16 %v3538_v10 }
 0xa6e   : > { %v4850_v36 = vmul.f32 1.442695, %v4821_v30  ;;  %v4854_v40 = vmul.f32 1.442695, %v4823_v22  ;;  %4338 = vmatpush1.bf16.msra.mxu0 %v3738_v62  ;;  %4379 = vmatpush1.bf16.msra.mxu1 %v3740_v16  ;;  %v3889_v62 = vunpack.c.l.s8.bf16 %v3539_v5  ;;  %v3891_v16 = vunpack.c.l.s8.bf16 %v3541_v6  ;;  %v3443_v5 = vld [vmem:[%s7104_s23 + $0x238] sm:$0xff] }
 0xa6f   : > { %5926 = vpow2.f32 %v4848_v34  ;;  %4339 = vmatprep.subr.bf16.mxu0 %v3764_v23  ;;  %4380 = vmatprep.subr.bf16.mxu1 %v3766_v27  ;;  %v3888_v23 = vunpack.c.l.s8.bf16 %v3538_v10  ;;  %v7633_v10 = vsub.s32 6, %v7382_v19 }
 0xa70   : > { %5928 = vpow2.f32 %v4852_v32 }
 0xa71   : > { %5930 = vpow2.f32 %v4850_v36  ;;  %v3941_v36 = vunpack.c.l.s8.bf16 %v3566_v28  ;;  %v3468_v28 = vld [vmem:[%s7104_s23 + $0x300] sm:$0xff] }
 0xa72   : > { %5932 = vpow2.f32 %v4854_v40  ;;  %4340 = vmatpush1.bf16.msra.mxu0 %v3763_v35  ;;  %4381 = vmatpush1.bf16.msra.mxu1 %v3765_v38  ;;  %v3563_v40 = vld [vmem:[%s7104_s23 + $0x5f8] sm:$0xff]  ;;  %v3565_v35 = vld [vmem:[%s7104_s23 + $0x608] sm:$0xff] }
 0xa73   : > { %4341 = vmatprep.subr.bf16.mxu0 %v3789_v12  ;;  %4382 = vmatprep.subr.bf16.mxu1 %v3791_v39  ;;  %v3938_v38 = vunpack.c.l.s8.bf16 %v3563_v40  ;;  %v3940_v12 = vunpack.c.l.s8.bf16 %v3565_v35 }
 0xa76   : > { %4342 = vmatpush1.bf16.msra.mxu0 %v3788_v47  ;;  %4383 = vmatpush1.bf16.msra.mxu1 %v3790_v41  ;;  %v3395_v47 = vld [vmem:[%s7104_s23 + $0xb8] sm:$0xff]  ;;  %v3963_v41 = vunpack.c.h.s8.bf16 %v3563_v40 }
 0xa77   : > { %4343 = vmatprep.subr.bf16.mxu0 %v3814_v55  ;;  %4384 = vmatprep.subr.bf16.mxu1 %v3816_v45  ;;  %v3965_v55 = vunpack.c.h.s8.bf16 %v3565_v35  ;;  %v3593_v45 = vunpack.c.l.s8.bf16 %v3393_v53  ;;  %v3595_v3 = vunpack.c.l.s8.bf16 %v3395_v47  ;;  %v3620_v57 = vunpack.c.h.s8.bf16 %v3395_v47  ;;  %v3467_v47 = vld [vmem:[%s7104_s23 + $0x2f8] sm:$0xff] }
 0xa79   : > { %v5927_v59 = vpop.eup %5926 }
 0xa7a   : > { %v5929_v60 = vpop.eup %5928  ;;  %v4898_v25 = vsel %vm4847_vm4, %v5927_v59, %v4820_v18  ;;  %4344 = vmatpush1.bf16.msra.mxu0 %v3813_v49  ;;  %4385 = vmatpush1.bf16.msra.mxu1 %v3815_v54  ;;  %v3540_v18 = vld [vmem:[%s7104_s23 + $0x540] sm:$0xff]  ;;  %v3394_v49 = vld [vmem:[%s7104_s23 + $0xb0] sm:$0xff]  ;;  %v3592_v54 = vunpack.c.l.s8.bf16 %v3392_v63 }
 0xa7b   : > { %v5931_v1 = vpop.eup %5930  ;;  %v4900_v2 = vsel %vm4847_vm4, %v5929_v60, %v4822_v20  ;;  %4345 = vmatprep.subr.bf16.mxu0 %v3839_v44  ;;  %4386 = vmatprep.subr.bf16.mxu1 %v3841_v56  ;;  %v3890_v27 = vunpack.c.l.s8.bf16 %v3540_v18  ;;  %v3915_v34 = vunpack.c.h.s8.bf16 %v3540_v18  ;;  %v3594_v44 = vunpack.c.l.s8.bf16 %v3394_v49  ;;  %v3420_v59 = vld [vmem:[%s7104_s23 + $0x180] sm:$0xff] }
 0xa7c   : > { %v5933_v51 = vpop.eup %5932  ;;  %v4899_v4 = vsel %vm4847_vm4, %v5931_v1, %v4821_v30  ;;  %v3916_v30 = vunpack.c.h.s8.bf16 %v3541_v6  ;;  %v3618_v56 = vunpack.c.h.s8.bf16 %v3393_v53  ;;  %v3617_v60 = vunpack.c.h.s8.bf16 %v3392_v63  ;;  %v3417_v1 = vld [vmem:[%s7104_s23 + $0x168] sm:$0xff] }
 0xa7d   : > { %v5488_v50 = vpack.c.bf16 %v4899_v4, %v4898_v25  ;;  %v4901_v9 = vsel %vm4847_vm4, %v5933_v51, %v4823_v22  ;;  %v3564_v22 = vld [vmem:[%s7104_s23 + $0x600] sm:$0xff]  ;;  %v3619_v25 = vunpack.c.h.s8.bf16 %v3394_v49  ;;  %v3668_v51 = vunpack.c.h.s8.bf16 %v3418_v8  ;;  %v3445_v6 = vld [vmem:[%s7104_s23 + $0x248] sm:$0xff] }
 0xa7e   : > { %v5489_v11 = vpack.c.bf16 %v4901_v9, %v4900_v2  ;;  %4346 = vmatpush1.bf16.msra.mxu0 %v3838_v0  ;;  %4387 = vmatpush1.bf16.msra.mxu1 %v3840_v61  ;;  %v3939_v32 = vunpack.c.l.s8.bf16 %v3564_v22  ;;  %v3964_v39 = vunpack.c.h.s8.bf16 %v3564_v22  ;;  %v3643_v0 = vunpack.c.l.s8.bf16 %v3418_v8  ;;  %v3419_v2 = vld [vmem:[%s7104_s23 + $0x178] sm:$0xff] }
 0xa7f   : > { %v7600_v13 = vrot.slane %v5488_v50, %v7391_v31  ;;  %4347 = vmatprep.subr.bf16.mxu0 %v3864_v15  ;;  %4388 = vmatprep.subr.bf16.mxu1 %v3866_v7  ;;  %v3645_v61 = vunpack.c.l.s8.bf16 %v3420_v59  ;;  %v3642_v15 = vunpack.c.l.s8.bf16 %v3417_v1  ;;  %v3644_v7 = vunpack.c.l.s8.bf16 %v3419_v2 }
 0xa80   : > { %v7605_v20 = vrot.slane %v5489_v11, %v7391_v31  ;;  %v3670_v4 = vunpack.c.h.s8.bf16 %v3420_v59  ;;  %v3667_v50 = vunpack.c.h.s8.bf16 %v3417_v1  ;;  %v3669_v9 = vunpack.c.h.s8.bf16 %v3419_v2 }
 0xa81   : > { %v3693_v11 = vunpack.c.l.s8.bf16 %v3443_v5  ;;  %v3720_v22 = vunpack.c.h.s8.bf16 %v3445_v6  ;;  %v3742_v59 = vunpack.c.l.s8.bf16 %v3467_v47 }
 0xa82   : > { %v5005_v21 = vcombine.low %v7600_v13, %v7605_v20  ;;  %4348 = vmatpush1.bf16.msra.mxu0 %v3863_v17  ;;  %4389 = vmatpush1.bf16.msra.mxu1 %v3865_v26  ;;  %v3695_v17 = vunpack.c.l.s8.bf16 %v3445_v6  ;;  %v3442_v26 = vld [vmem:[%s7104_s23 + $0x230] sm:$0xff] }
 0xa83   : > { %4349 = vmatprep.subr.bf16.mxu0 %v3889_v62  ;;  %4390 = vmatprep.subr.bf16.mxu1 %v3891_v16  ;;  %v3444_v62 = vld [vmem:[%s7104_s23 + $0x240] sm:$0xff]  ;;  %v7630_v16 = vsub.s32 4, %v7382_v19  ;;  %v3692_v18 = vunpack.c.l.s8.bf16 %v3442_v26  ;;  %v3717_v35 = vunpack.c.h.s8.bf16 %v3442_v26 }
 0xa86   : > { %4350 = vmatpush1.bf16.msra.mxu0 %v3888_v23  ;;  %4391 = vmatpush1.bf16.msra.mxu1 %v3890_v27  ;;  %v3694_v23 = vunpack.c.l.s8.bf16 %v3444_v62  ;;  %v7636_v27 = vsub.s32 5, %v7382_v19 }
 0xa87   : > { %4351 = vmatprep.subr.bf16.mxu0 %v3914_v24  ;;  %4392 = vmatprep.subr.bf16.mxu1 %v3916_v30  ;;  %v7639_v24 = vsub.s32 7, %v7382_v19  ;;  %v3718_v30 = vunpack.c.h.s8.bf16 %v3443_v5  ;;  %v3495_v5 = vld [vmem:[%s7104_s23 + $0x3d8] sm:$0xff] }
 0xa89   : > { %v4568_v40 = vrot.slane %v7549_v46, %v7639_v24 }
 0xa8a   : > { %4352 = vmatpush1.bf16.msra.mxu0 %v3913_v29  ;;  %4393 = vmatpush1.bf16.msra.mxu1 %v3915_v34  ;;  %v3470_v29 = vld [vmem:[%s7104_s23 + $0x310] sm:$0xff]  ;;  %v4556_v34 = vrot.slane %v7549_v46, %v7630_v16 }
 0xa8b   : > { %4353 = vmatprep.subr.bf16.mxu0 %v3939_v32  ;;  %4394 = vmatprep.subr.bf16.mxu1 %v3941_v36  ;;  %v4564_v32 = vrot.slane %v7549_v46, %v7633_v10  ;;  %v4560_v36 = vrot.slane %v7549_v46, %v7636_v27  ;;  %v3745_v53 = vunpack.c.l.s8.bf16 %v3470_v29  ;;  %v4726_v46 = vrot.slane %v7558_v58, %v7639_v24 }
 0xa8c   : > { %v3770_v2 = vunpack.c.h.s8.bf16 %v3470_v29 }
 0xa8e   : > { %4354 = vmatpush1.bf16.msra.mxu0 %v3938_v38  ;;  %4395 = vmatpush1.bf16.msra.mxu1 %v3940_v12  ;;  %v3719_v38 = vunpack.c.h.s8.bf16 %v3444_v62  ;;  %v4714_v12 = vrot.slane %v7558_v58, %v7630_v16 }
 0xa8f   : > { %4355 = vmatprep.subr.bf16.mxu0 %v3964_v39  ;;  %4396 = vmatprep.subr.bf16.mxu1 %v3966_v43  ;;  %v4722_v39 = vrot.slane %v7558_v58, %v7633_v10  ;;  %v3743_v43 = vunpack.c.l.s8.bf16 %v3468_v28 }
 0xa92   : > { %4356 = vmatpush1.bf16.msra.mxu0 %v3963_v41  ;;  %4397 = vmatpush1.bf16.msra.mxu1 %v3965_v55  ;;  %v3469_v41 = vld [vmem:[%s7104_s23 + $0x308] sm:$0xff] }
 0xa93   : > { %4407 = vmatprep.subr.bf16.mxu0 %v3593_v45  ;;  %4448 = vmatprep.subr.bf16.mxu1 %v3595_v3  ;;  %v4718_v3 = vrot.slane %v7558_v58, %v7636_v27  ;;  %v3768_v58 = vunpack.c.h.s8.bf16 %v3468_v28  ;;  %v3769_v26 = vunpack.c.h.s8.bf16 %v3469_v41 }
 0xa95   : > { %4358 = vmatmul.mubr.bf16.vlgmr.msra.gmra.mrb[16].mxu0 %v7420_v37  ;;  %4399 = vmatmul.mubr.bf16.vlgmr.msra.gmra.mrb[16].mxu1 %v7420_v37 }
 0xa96   : > { %4408 = vmatpush1.bf16.msra.mxu0 %v3592_v54  ;;  %4449 = vmatpush1.bf16.msra.mxu1 %v3594_v44 }
 0xa97   : > { %4409 = vmatprep.subr.bf16.mxu0 %v3618_v56  ;;  %4450 = vmatprep.subr.bf16.mxu1 %v3620_v57 }
 0xa98   : > { %4439 = vmatprep.mubr.bf16.mxu0 %v7394_v33  ;;  %4480 = vmatprep.mubr.bf16.mxu1 %v7394_v33 }
 0xa9a   : > { %4410 = vmatpush1.bf16.msra.mxu0 %v3617_v60  ;;  %4451 = vmatpush1.bf16.msra.mxu1 %v3619_v25  ;;  %v3744_v60 = vunpack.c.l.s8.bf16 %v3469_v41 }
 0xa9b   : > { %4411 = vmatprep.subr.bf16.mxu0 %v3643_v0  ;;  %4452 = vmatprep.subr.bf16.mxu1 %v3645_v61 }
 0xa9e   : > { %4412 = vmatpush1.bf16.msra.mxu0 %v3642_v15  ;;  %4453 = vmatpush1.bf16.msra.mxu1 %v3644_v7 }
 0xa9f   : > { %4413 = vmatprep.subr.bf16.mxu0 %v3668_v51  ;;  %4454 = vmatprep.subr.bf16.mxu1 %v3670_v4  ;;  %v3493_v4 = vld [vmem:[%s7104_s23 + $0x3c8] sm:$0xff] }
 0xaa0   : > { %v3793_v62 = vunpack.c.l.s8.bf16 %v3493_v4  ;;  %v3818_v29 = vunpack.c.h.s8.bf16 %v3493_v4 }
 0xaa2   : > { %4414 = vmatpush1.bf16.msra.mxu0 %v3667_v50  ;;  %4455 = vmatpush1.bf16.msra.mxu1 %v3669_v9 }
 0xaa3   : > { %4415 = vmatprep.subr.bf16.mxu0 %v3693_v11  ;;  %4456 = vmatprep.subr.bf16.mxu1 %v3695_v17  ;;  %v3767_v17 = vunpack.c.h.s8.bf16 %v3467_v47 }
 0xaa6   : > { %4416 = vmatpush1.bf16.msra.mxu0 %v3692_v18  ;;  %4457 = vmatpush1.bf16.msra.mxu1 %v3694_v23  ;;  %v3795_v18 = vunpack.c.l.s8.bf16 %v3495_v5  ;;  %v3492_v23 = vld [vmem:[%s7104_s23 + $0x3c0] sm:$0xff] }
 0xaa7   : > { %4417 = vmatprep.subr.bf16.mxu0 %v3718_v30  ;;  %4458 = vmatprep.subr.bf16.mxu1 %v3720_v22  ;;  %v3494_v30 = vld [vmem:[%s7104_s23 + $0x3d0] sm:$0xff]  ;;  %v3792_v22 = vunpack.c.l.s8.bf16 %v3492_v23 }
 0xaa8   : > { %v4113_v55 = vpop.f32.mrb[4].mxu0  ;;  %v4154_v45 = vpop.f32.mrb[4].mxu1  ;;  %v3794_v28 = vunpack.c.l.s8.bf16 %v3494_v30 }
 0xaa9   : > { %v4666_v63 = vmul.f32 %v4556_v34, %v4113_v55  ;;  %v4668_v49 = vmul.f32 %v4564_v32, %v4154_v45  ;;  %v4115_v54 = vpop.f32.mrb[5].mxu0  ;;  %v4156_v44 = vpop.f32.mrb[5].mxu1  ;;  %v3820_v34 = vunpack.c.h.s8.bf16 %v3495_v5  ;;  %v3518_v32 = vld [vmem:[%s7104_s23 + $0x490] sm:$0xff] }
 0xaaa   : > { %v4667_v56 = vmul.f32 %v4560_v36, %v4115_v54  ;;  %v4669_v57 = vmul.f32 %v4568_v40, %v4156_v44  ;;  %v4117_v8 = vpop.f32.mrb[6].mxu0  ;;  %4418 = vmatpush1.bf16.msra.mxu0 %v3717_v35  ;;  %4459 = vmatpush1.bf16.msra.mxu1 %v3719_v38  ;;  %v4158_v25 = vpop.f32.mrb[6].mxu1  ;;  %v3520_v36 = vld [vmem:[%s7104_s23 + $0x4a0] sm:$0xff]  ;;  %v3817_v40 = vunpack.c.h.s8.bf16 %v3492_v23  ;;  %v3819_v35 = vunpack.c.h.s8.bf16 %v3494_v30 }
 0xaab   : > { %v4824_v0 = vadd.f32 %v4714_v12, %v4666_v63  ;;  %v4826_v61 = vadd.f32 %v4722_v39, %v4668_v49  ;;  %v4118_v1 = vpop.f32.mrb[7].mxu0  ;;  %4419 = vmatprep.subr.bf16.mxu0 %v3743_v43  ;;  %4460 = vmatprep.subr.bf16.mxu1 %v3745_v53  ;;  %v4159_v15 = vpop.f32.mrb[7].mxu1  ;;  %v3843_v38 = vunpack.c.l.s8.bf16 %v3518_v32  ;;  %v3845_v12 = vunpack.c.l.s8.bf16 %v3520_v36  ;;  %v3517_v39 = vld [vmem:[%s7104_s23 + $0x488] sm:$0xff]  ;;  %v3519_v43 = vld [vmem:[%s7104_s23 + $0x498] sm:$0xff] }
 0xaac   : > { %v4825_v7 = vadd.f32 %v4718_v3, %v4667_v56  ;;  %v4827_v51 = vadd.f32 %v4726_v46, %v4669_v57  ;;  %v3842_v55 = vunpack.c.l.s8.bf16 %v3517_v39  ;;  %v3844_v45 = vunpack.c.l.s8.bf16 %v3519_v43  ;;  %v3543_v56 = vld [vmem:[%s7104_s23 + $0x558] sm:$0xff]  ;;  %v3545_v57 = vld [vmem:[%s7104_s23 + $0x568] sm:$0xff]  ;;  %v3544_v15 = vld [vmem:[%s7104_s23 + $0x560] sm:$0xff] }
 0xaad   : > { %v4856_v6 = vmul.f32 1.442695, %v4824_v0  ;;  %v4860_v50 = vmul.f32 1.442695, %v4826_v61  ;;  %v3868_v63 = vunpack.c.h.s8.bf16 %v3518_v32  ;;  %v3870_v49 = vunpack.c.h.s8.bf16 %v3520_v36  ;;  %v3496_v32 = vld [vmem:[%s7104_s23 + $0x3e0] sm:$0xff] }
 0xaae   : > { %v4858_v9 = vmul.f32 1.442695, %v4825_v7  ;;  %v4862_v11 = vmul.f32 1.442695, %v4827_v51  ;;  %4420 = vmatpush1.bf16.msra.mxu0 %v3742_v59  ;;  %4461 = vmatpush1.bf16.msra.mxu1 %v3744_v60  ;;  %v3867_v25 = vunpack.c.h.s8.bf16 %v3517_v39  ;;  %v3893_v1 = vunpack.c.l.s8.bf16 %v3543_v56 }
 0xaaf   : > { %5934 = vpow2.f32 %v4856_v6  ;;  %4421 = vmatprep.subr.bf16.mxu0 %v3768_v58  ;;  %4462 = vmatprep.subr.bf16.mxu1 %v3770_v2  ;;  %v3895_v58 = vunpack.c.l.s8.bf16 %v3545_v57  ;;  %v3542_v2 = vld [vmem:[%s7104_s23 + $0x550] sm:$0xff]  ;;  %v3894_v5 = vunpack.c.l.s8.bf16 %v3544_v15  ;;  %v3918_v6 = vunpack.c.h.s8.bf16 %v3543_v56 }
 0xab0   : > { %5936 = vpow2.f32 %v4860_v50  ;;  %v3920_v50 = vunpack.c.h.s8.bf16 %v3545_v57  ;;  %v3821_v39 = vunpack.c.h.s8.bf16 %v3496_v32  ;;  %v7706_v56 = vld [vmem:[%s7113_s16 + $0x8] sm:$0xff] }
 0xab1   : > { %5938 = vpow2.f32 %v4858_v9  ;;  %v5013_v9 = vrot.slane %v5005_v21, %v7391_v31  ;;  %v3571_v57 = vld [vmem:[%s7104_s23 + $0x638] sm:$0xff] }
 0xab2   : > { %5940 = vpow2.f32 %v4862_v11  ;;  %4422 = vmatpush1.bf16.msra.mxu0 %v3767_v17  ;;  %4463 = vmatpush1.bf16.msra.mxu1 %v3769_v26  ;;  %v3568_v17 = vld [vmem:[%s7104_s23 + $0x620] sm:$0xff]  ;;  %v3570_v26 = vld [vmem:[%s7104_s23 + $0x630] sm:$0xff] }
 0xab3   : > { %4423 = vmatprep.subr.bf16.mxu0 %v3793_v62  ;;  %4464 = vmatprep.subr.bf16.mxu1 %v3795_v18  ;;  %v3917_v62 = vunpack.c.h.s8.bf16 %v3542_v2  ;;  %v3919_v18 = vunpack.c.h.s8.bf16 %v3544_v15  ;;  %v3943_v30 = vunpack.c.l.s8.bf16 %v3568_v17  ;;  %v3968_v21 = vunpack.c.h.s8.bf16 %v3568_v17 }
 0xab6   : > { %4424 = vmatpush1.bf16.msra.mxu0 %v3792_v22  ;;  %4465 = vmatpush1.bf16.msra.mxu1 %v3794_v28  ;;  %v3945_v22 = vunpack.c.l.s8.bf16 %v3570_v26  ;;  %v3567_v28 = vld [vmem:[%s7104_s23 + $0x618] sm:$0xff] }
 0xab7   : > { %4425 = vmatprep.subr.bf16.mxu0 %v3818_v29  ;;  %4466 = vmatprep.subr.bf16.mxu1 %v3820_v34  ;;  %v3569_v29 = vld [vmem:[%s7104_s23 + $0x628] sm:$0xff]  ;;  %v3942_v13 = vunpack.c.l.s8.bf16 %v3567_v28  ;;  %v3970_v34 = vunpack.c.h.s8.bf16 %v3570_v26  ;;  %v3967_v36 = vunpack.c.h.s8.bf16 %v3567_v28  ;;  %v3971_v28 = vunpack.c.h.s8.bf16 %v3571_v57 }
 0xab8   : > { %v3944_v20 = vunpack.c.l.s8.bf16 %v3569_v29 }
 0xab9   : > { %v5935_v53 = vpop.eup %5934 }
 0xaba   : > { %v5937_v47 = vpop.eup %5936  ;;  %v4902_v41 = vsel %vm4847_vm4, %v5935_v53, %v4824_v0  ;;  %4426 = vmatpush1.bf16.msra.mxu0 %v3817_v40  ;;  %4467 = vmatpush1.bf16.msra.mxu1 %v3819_v35  ;;  %v3869_v0 = vunpack.c.h.s8.bf16 %v3519_v43  ;;  %v3969_v40 = vunpack.c.h.s8.bf16 %v3569_v29  ;;  %v3796_v35 = vunpack.c.l.s8.bf16 %v3496_v32  ;;  %v3521_v43 = vld [vmem:[%s7104_s23 + $0x4a8] sm:$0xff] }
 0xabb   : > { %v5939_v3 = vpop.eup %5938  ;;  %v4904_v46 = vsel %vm4847_vm4, %v5937_v47, %v4826_v61  ;;  %4427 = vmatprep.subr.bf16.mxu0 %v3843_v38  ;;  %4468 = vmatprep.subr.bf16.mxu1 %v3845_v12  ;;  %v3396_v38 = vld [vmem:[%s7104_s23 + $0xc0] sm:$0xff]  ;;  %v3846_v47 = vunpack.c.l.s8.bf16 %v3521_v43 }
 0xabc   : > { %v5941_v54 = vpop.eup %5940  ;;  %v4903_v44 = vsel %vm4847_vm4, %v5939_v3, %v4825_v7  ;;  %v3596_v12 = vunpack.c.l.s8.bf16 %v3396_v38  ;;  %v3621_v53 = vunpack.c.h.s8.bf16 %v3396_v38  ;;  %v3546_v3 = vld [vmem:[%s7104_s23 + $0x570] sm:$0xff] }
 0xabd   : > { %v5490_v8 = vpack.c.bf16 %v4903_v44, %v4902_v41  ;;  %v4905_v59 = vsel %vm4847_vm4, %v5941_v54, %v4827_v51  ;;  %v3892_v51 = vunpack.c.l.s8.bf16 %v3542_v2  ;;  %v3421_v41 = vld [vmem:[%s7104_s23 + $0x188] sm:$0xff]  ;;  %v3921_v44 = vunpack.c.h.s8.bf16 %v3546_v3  ;;  %v3471_v2 = vld [vmem:[%s7104_s23 + $0x318] sm:$0xff] }
 0xabe   : > { %v5491_v60 = vpack.c.bf16 %v4905_v59, %v4904_v46  ;;  %4428 = vmatpush1.bf16.msra.mxu0 %v3842_v55  ;;  %4469 = vmatpush1.bf16.msra.mxu1 %v3844_v45  ;;  %v3646_v55 = vunpack.c.l.s8.bf16 %v3421_v41  ;;  %v3871_v45 = vunpack.c.h.s8.bf16 %v3521_v43  ;;  %v3671_v46 = vunpack.c.h.s8.bf16 %v3421_v41 }
 0xabf   : > { %v4997_v61 = vrot.slane %v5490_v8, %v7391_v31  ;;  %4429 = vmatprep.subr.bf16.mxu0 %v3868_v63  ;;  %4470 = vmatprep.subr.bf16.mxu1 %v3870_v49  ;;  %v3896_v63 = vunpack.c.l.s8.bf16 %v3546_v3  ;;  %v3446_v49 = vld [vmem:[%s7104_s23 + $0x250] sm:$0xff]  ;;  %s8046_s23 = sld [smem:[#allocation41_spill]] }
 0xac0   : > { %v5004_v7 = vrot.slane %v5491_v60, %v7391_v31  ;;  %v3696_v54 = vunpack.c.l.s8.bf16 %v3446_v49 }
 0xac2   : > { %v5006_v4 = vcombine.low %v4997_v61, %v5004_v7  ;;  %4430 = vmatpush1.bf16.msra.mxu0 %v3867_v25  ;;  %4471 = vmatpush1.bf16.msra.mxu1 %v3869_v0  ;;  %v3721_v0 = vunpack.c.h.s8.bf16 %v3446_v49  ;;  %v4730_v61 = vrot.slane %v7706_v56, %v7543_v42 }
 0xac3   : > { %4431 = vmatprep.subr.bf16.mxu0 %v3893_v1  ;;  %4472 = vmatprep.subr.bf16.mxu1 %v3895_v58  ;;  %v4738_v1 = vrot.slane %v7706_v56, %v7546_v14  ;;  %v3946_v58 = vunpack.c.l.s8.bf16 %v3571_v57  ;;  %v4746_v57 = vrot.slane %v7706_v56, %v7630_v16 }
 0xac4   : > { %v5020_v11 = vrot.slane %v5006_v4, %v7391_v31  ;;  %v4734_v4 = vrot.slane %v7706_v56, %v7552_v48 }
 0xac5   : > { %p8047_p12 = scmp.eq.s32.totalorder %s8046_s23, 2 }
 0xac6   : > { %4432 = vmatpush1.bf16.msra.mxu0 %v3892_v51  ;;  %4473 = vmatpush1.bf16.msra.mxu1 %v3894_v5  ;;  %v5021_v23 = vcombine.low %v5013_v9, %v5020_v11  ;;  %v4742_v51 = vrot.slane %v7706_v56, %v7555_v52 }
 0xac7   : > { %4433 = vmatprep.subr.bf16.mxu0 %v3918_v6  ;;  %4474 = vmatprep.subr.bf16.mxu1 %v3920_v50  ;;  %p6404_p10 = pnand %p6403_p11, %p8047_p12 }
 0xac8   : > { %5138 = vst [vmem:[%s7115_s3] sm:$0xff] %v5021_v23 }
 0xac9   : > { %p6405_p1 = pneg %p6404_p10 }
 0xaca   : > { %4434 = vmatpush1.bf16.msra.mxu0 %v3917_v62  ;;  %4475 = vmatpush1.bf16.msra.mxu1 %v3919_v18  ;;  %v3746_v62 = vunpack.c.l.s8.bf16 %v3471_v2 }
 0xacb   : > { %4435 = vmatprep.subr.bf16.mxu0 %v3943_v30  ;;  %4476 = vmatprep.subr.bf16.mxu1 %v3945_v22  ;;  %p6412_p0 = pnand %p6411_p5, %p6405_p1 }
 0xace   : > { %4436 = vmatpush1.bf16.msra.mxu0 %v3942_v13  ;;  %4477 = vmatpush1.bf16.msra.mxu1 %v3944_v20 }
 0xacf   : > { %4437 = vmatprep.subr.bf16.mxu0 %v3968_v21  ;;  %4478 = vmatprep.subr.bf16.mxu1 %v3970_v34 }
 0xad2   : > { %4438 = vmatpush1.bf16.msra.mxu0 %v3967_v36  ;;  %4479 = vmatpush1.bf16.msra.mxu1 %v3969_v40  ;;  %v3771_v40 = vunpack.c.h.s8.bf16 %v3471_v2 }
 0xad3   : > { %5544 = vmatprep.subr.bf16.mxu0 %v3796_v35 }
 0xad5   : > { %4440 = vmatmul.mubr.bf16.vlgmr.msra.gmra.mrb[20].mxu0 %v7420_v37  ;;  %4481 = vmatmul.mubr.bf16.vlgmr.msra.gmra.mrb[20].mxu1 %v7420_v37 }
 0xad6   : > { %5545 = vmatpush3.bf16.msra.mxu0 %v3596_v12  ;;  %4521 = vmatprep.mubr.bf16.mxu0 %v7394_v33  ;;  %v7703_v33 = vld [vmem:[%s7111_s1 + $0x8] sm:$0xff] }
 0xad7   : > { %5546 = vmatprep.subr.bf16.mxu0 %v3821_v39  ;;  %v4572_v8 = vrot.slane %v7703_v33, %v7543_v42  ;;  %v4580_v59 = vrot.slane %v7703_v33, %v7546_v14  ;;  %v4576_v60 = vrot.slane %v7703_v33, %v7552_v48  ;;  %v4584_v25 = vrot.slane %v7703_v33, %v7555_v52 }
 0xad8   : > { %v4596_v49 = vrot.slane %v7703_v33, %v7633_v10 }
 0xada   : > { %5547 = vmatpush3.bf16.msra.mxu0 %v3621_v53 }
 0xadb   : > { %5548 = vmatprep.subr.bf16.mxu0 %v3846_v47 }
 0xade   : > { %5549 = vmatpush3.bf16.msra.mxu0 %v3646_v55 }
 0xadf   : > { %5550 = vmatprep.subr.bf16.mxu0 %v3871_v45 }
 0xae2   : > { %5551 = vmatpush3.bf16.msra.mxu0 %v3671_v46 }
 0xae3   : > { %5552 = vmatprep.subr.bf16.mxu0 %v3896_v63  ;;  %v4588_v63 = vrot.slane %v7703_v33, %v7630_v16 }
 0xae6   : > { %5553 = vmatpush3.bf16.msra.mxu0 %v3696_v54  ;;  %v4592_v54 = vrot.slane %v7703_v33, %v7636_v27 }
 0xae7   : > { %5554 = vmatprep.subr.bf16.mxu0 %v3921_v44  ;;  %v4600_v44 = vrot.slane %v7703_v33, %v7639_v24 }
 0xae8   : > { %v4195_v15 = vpop.f32.mrb[8].mxu0  ;;  %v4236_v7 = vpop.f32.mrb[8].mxu1 }
 0xae9   : > { %v4670_v5 = vmul.f32 %v4572_v8, %v4195_v15  ;;  %v4672_v6 = vmul.f32 %v4580_v59, %v4236_v7  ;;  %v4197_v50 = vpop.f32.mrb[9].mxu0  ;;  %v4238_v9 = vpop.f32.mrb[9].mxu1  ;;  %v4754_v8 = vrot.slane %v7706_v56, %v7633_v10 }
 0xaea   : > { %v4671_v11 = vmul.f32 %v4576_v60, %v4197_v50  ;;  %v4673_v17 = vmul.f32 %v4584_v25, %v4238_v9  ;;  %v4199_v26 = vpop.f32.mrb[10].mxu0  ;;  %5555 = vmatpush3.bf16.msra.mxu0 %v3721_v0  ;;  %v4240_v18 = vpop.f32.mrb[10].mxu1  ;;  %v4750_v25 = vrot.slane %v7706_v56, %v7636_v27  ;;  %v4758_v0 = vrot.slane %v7706_v56, %v7639_v24 }
 0xaeb   : > { %v4828_v23 = vadd.f32 %v4730_v61, %v4670_v5  ;;  %v4830_v30 = vadd.f32 %v4738_v1, %v4672_v6  ;;  %v4200_v22 = vpop.f32.mrb[11].mxu0  ;;  %5556 = vmatprep.subr.bf16.mxu0 %v3946_v58  ;;  %v4241_v29 = vpop.f32.mrb[11].mxu1 }
 0xaec   : > { %v4829_v13 = vadd.f32 %v4734_v4, %v4671_v11  ;;  %v4831_v20 = vadd.f32 %v4742_v51, %v4673_v17 }
 0xaed   : > { %v4864_v21 = vmul.f32 1.442695, %v4828_v23  ;;  %v4868_v34 = vmul.f32 1.442695, %v4830_v30 }
 0xaee   : > { %v4866_v32 = vmul.f32 1.442695, %v4829_v13  ;;  %v4870_v36 = vmul.f32 1.442695, %v4831_v20  ;;  %5557 = vmatpush3.bf16.msra.mxu0 %v3746_v62 }
 0xaef   : > { %5942 = vpow2.f32 %v4864_v21  ;;  %5558 = vmatprep.subr.bf16.mxu0 %v3971_v28 }
 0xaf0   : > { %5944 = vpow2.f32 %v4868_v34 }
 0xaf1   : > { %5946 = vpow2.f32 %v4866_v32 }
 0xaf2   : > { %5948 = vpow2.f32 %v4870_v36  ;;  %5559 = vmatpush3.bf16.msra.mxu0 %v3771_v40 }
 0xaf5   : > { %4522 = vmatmul.mubr.bf16.vlgmr.msra.gmra.mrb[24].mxu0 %v7420_v37 }
 0xaf9   : > { %v5943_v35 = vpop.eup %5942 }
 0xafa   : > { %v5945_v38 = vpop.eup %5944  ;;  %v4906_v12 = vsel %vm4847_vm4, %v5943_v35, %v4828_v23 }
 0xafb   : > { %v5947_v39 = vpop.eup %5946  ;;  %v4908_v43 = vsel %vm4847_vm4, %v5945_v38, %v4830_v30 }
 0xafc   : > { %v5949_v53 = vpop.eup %5948  ;;  %v4907_v47 = vsel %vm4847_vm4, %v5947_v39, %v4829_v13  ;;  %v7767_v39 = vld [vmem:[%s7111_s1 + $0x10] sm:$0xff] }
 0xafd   : > { %v5492_v41 = vpack.c.bf16 %v4907_v47, %v4906_v12  ;;  %v4909_v55 = vsel %vm4847_vm4, %v5949_v53, %v4831_v20  ;;  %v4604_v53 = vrot.slane %v7767_v39, %v7543_v42  ;;  %v4612_v47 = vrot.slane %v7767_v39, %v7546_v14 }
 0xafe   : > { %v5493_v45 = vpack.c.bf16 %v4909_v55, %v4908_v43  ;;  %v7770_v43 = vld [vmem:[%s7113_s16 + $0x10] sm:$0xff] }
 0xaff   : > { %v5032_v37 = vrot.slane %v5492_v41, %v7391_v31 }
 0xb00   : > { %v5039_v3 = vrot.slane %v5493_v45, %v7391_v31 }
 0xb02   : > { %v5054_v46 = vcombine.low %v5032_v37, %v5039_v3 }
 0xb04   : > { %v5062_v35 = vrot.slane %v5054_v46, %v7391_v31 }
 0xb28   : > { %v4277_v59 = vpop.f32.mrb[12].mxu0  ;;  %v4318_v60 = vpop.f32.mrb[12].mxu1 }
 0xb29   : > { %v4674_v61 = vmul.f32 %v4588_v63, %v4277_v59  ;;  %v4676_v1 = vmul.f32 %v4596_v49, %v4318_v60  ;;  %v4279_v58 = vpop.f32.mrb[13].mxu0  ;;  %v4320_v2 = vpop.f32.mrb[13].mxu1 }
 0xb2a   : > { %v4675_v15 = vmul.f32 %v4592_v54, %v4279_v58  ;;  %v4677_v33 = vmul.f32 %v4600_v44, %v4320_v2  ;;  %v4281_v7 = vpop.f32.mrb[14].mxu0  ;;  %v4322_v4 = vpop.f32.mrb[14].mxu1 }
 0xb2b   : > { %v4832_v51 = vadd.f32 %v4746_v57, %v4674_v61  ;;  %v4834_v5 = vadd.f32 %v4754_v8, %v4676_v1  ;;  %v4282_v6 = vpop.f32.mrb[15].mxu0  ;;  %v4323_v50 = vpop.f32.mrb[15].mxu1 }
 0xb2c   : > { %v4833_v9 = vadd.f32 %v4750_v25, %v4675_v15  ;;  %v4835_v11 = vadd.f32 %v4758_v0, %v4677_v33 }
 0xb2d   : > { %v4872_v17 = vmul.f32 1.442695, %v4832_v51  ;;  %v4876_v26 = vmul.f32 1.442695, %v4834_v5 }
 0xb2e   : > { %v4874_v62 = vmul.f32 1.442695, %v4833_v9  ;;  %v4878_v18 = vmul.f32 1.442695, %v4835_v11 }
 0xb2f   : > { %5950 = vpow2.f32 %v4872_v17 }
 0xb30   : > { %5952 = vpow2.f32 %v4876_v26 }
 0xb31   : > { %5954 = vpow2.f32 %v4874_v62 }
 0xb32   : > { %5956 = vpow2.f32 %v4878_v18 }
 0xb39   : > { %v5951_v56 = vpop.eup %5950 }
 0xb3a   : > { %v5953_v23 = vpop.eup %5952  ;;  %v4910_v30 = vsel %vm4847_vm4, %v5951_v56, %v4832_v51 }
 0xb3b   : > { %v5955_v22 = vpop.eup %5954  ;;  %v4912_v28 = vsel %vm4847_vm4, %v5953_v23, %v4834_v5 }
 0xb3c   : > { %v5957_v29 = vpop.eup %5956  ;;  %v4911_v13 = vsel %vm4847_vm4, %v5955_v22, %v4833_v9 }
 0xb3d   : > { %v5494_v20 = vpack.c.bf16 %v4911_v13, %v4910_v30  ;;  %v4913_v21 = vsel %vm4847_vm4, %v5957_v29, %v4835_v11 }
 0xb3e   : > { %v5495_v34 = vpack.c.bf16 %v4913_v21, %v4912_v28 }
 0xb3f   : > { %v5046_v32 = vrot.slane %v5494_v20, %v7391_v31 }
 0xb40   : > { %v5053_v36 = vrot.slane %v5495_v34, %v7391_v31 }
 0xb42   : > { %v5055_v40 = vcombine.low %v5046_v32, %v5053_v36 }
 0xb44   : > { %v5069_v38 = vrot.slane %v5055_v40, %v7391_v31 }
 0xb46   : > { %v5070_v12 = vcombine.low %v5062_v35, %v5069_v38 }
 0xb48   : > { %5139 = vst [vmem:[%s7115_s3 + $0x8] sm:$0xff] %v5070_v12 }
 0xb49   : > { %6415 = shalt.err (!%p6412_p0)
}
 0xb4a   : > { %s8048_s11 = sld [smem:[#allocation63_spill]]  ;;  %p8049_p3 = pmov %p8047_p12 }
 0xb50   : > { %s6416_s12 = scalar_lea.hbm %s8048_s11, 32 }
 0xb51   : > { %p6417_p6 = scmp.ne.s32.totalorder %s8048_s11, %s6416_s12  ;;  %p6422_p9 = scmp.lt.u32.totalorder %s6416_s12, %s8048_s11 }
 0xb53   : > { %p6418_p13 = pnand %p6417_p6, %p8049_p3 }
 0xb55   : > { %p6419_p8 = pneg %p6418_p13 }
 0xb57   : > { %p6424_p7 = pnand %p6422_p9, %p6419_p8 }
 0xb59   : > { %6427 = shalt.err (!%p6424_p7)
}
 0xb5a   : > { %p8050_p11 = pmov %p8049_p3  ;;  %v4608_v41 = vrot.slane %v7767_v39, %v7552_v48  ;;  %v4616_v55 = vrot.slane %v7767_v39, %v7555_v52  ;;  %v4762_v45 = vrot.slane %v7770_v43, %v7543_v42  ;;  %v4770_v37 = vrot.slane %v7770_v43, %v7546_v14  ;;  %s8051_s21 = sld [smem:[#allocation46_spill]] }
 0xb5b   : > { %v4766_v63 = vrot.slane %v7770_v43, %v7552_v48  ;;  %v4774_v49 = vrot.slane %v7770_v43, %v7555_v52  ;;  %v4620_v23 = vrot.slane %v7767_v39, %v7630_v16  ;;  %v4628_v30 = vrot.slane %v7767_v39, %v7633_v10  ;;  %s5509_s17 = smul.u32 400, %s8046_s23  ;;  %s5168_s25 = sshll.u32 %s7115_s3, 4  ;;  %s7857_s25 = int_to_ptr.vmem [resolvable:$true] %s5168_s25 }
 0xb5c   : > { %5724 = dma.vmem_to_hbm [thread:$0]  (%p8050_p11), %s5155_s6, 32, %s8048_s11, [#allocation5]   ;;  %v4624_v22 = vrot.slane %v7767_v39, %v7636_v27  ;;  %v4632_v28 = vrot.slane %v7767_v39, %v7639_v24  ;;  %v4778_v29 = vrot.slane %v7770_v43, %v7630_v16  ;;  %v4786_v13 = vrot.slane %v7770_v43, %v7633_v10 }
 0xb5d   : > { %v4782_v34 = vrot.slane %v7770_v43, %v7636_v27  ;;  %v4790_v32 = vrot.slane %v7770_v43, %v7639_v24  ;;  %s8052_s30 = sld [smem:[#allocation64_spill]]  ;;  %s6428_s6 = scalar_lea.vmem %s7857_s25, 400 }
 0xb5e   : > { %p6429_p12 = scmp.ne.s32.totalorder %s7857_s25, %s6428_s6  ;;  %s6560_s8 = smov [#allocation27]  }
 0xb5f   : > { %s6432_s10 = sshll.u32 %s6560_s8, 4  ;;  %s6433_s10 = int_to_ptr.vmem [resolvable:$false] %s6432_s10 }
 0xb60   : > { %p8053_p10 = scmp.ne.s32.totalorder %s8051_s21, 0  ;;  %s6434_s18 = scalar_lea.vmem %s6433_s10, 800 }
 0xb61   : > { %p6435_p2 = scmp.lt.s32.totalorder %s7857_s25, %s6433_s10  ;;  %p6436_p5 = scmp.lt.s32.totalorder %s6434_s18, %s6428_s6 }
 0xb62   : > { %p6430_p1 = pnand %p6429_p12, %p8053_p10 }
 0xb63   : > { %s7855_s4 = scalar_lea.hbm %s8052_s30, %s5509_s17  ;;  %p6437_p0 = por %p6436_p5, %p6435_p2 }
 0xb64   : > { %p6431_p4 = pneg %p6430_p1 }
 0xb66   : > { %p6438_p6 = pnand %p6437_p0, %p6431_p4 }
 0xb68   : > { %v4359_v3 = vpop.f32.mrb[16].mxu0  ;;  %v4400_v46 = vpop.f32.mrb[16].mxu1 }
 0xb69   : > { %v4678_v54 = vmul.f32 %v4604_v53, %v4359_v3  ;;  %v4680_v44 = vmul.f32 %v4612_v47, %v4400_v46  ;;  %v4361_v57 = vpop.f32.mrb[17].mxu0  ;;  %v4402_v8 = vpop.f32.mrb[17].mxu1 }
 0xb6a   : > { %v4679_v59 = vmul.f32 %v4608_v41, %v4361_v57  ;;  %v4681_v60 = vmul.f32 %v4616_v55, %v4402_v8  ;;  %v4363_v25 = vpop.f32.mrb[18].mxu0  ;;  %v4404_v0 = vpop.f32.mrb[18].mxu1 }
 0xb6b   : > { %v4836_v42 = vadd.f32 %v4762_v45, %v4678_v54  ;;  %v4838_v61 = vadd.f32 %v4770_v37, %v4680_v44  ;;  %v4364_v1 = vpop.f32.mrb[19].mxu0  ;;  %v4405_v14 = vpop.f32.mrb[19].mxu1 }
 0xb6c   : > { %v4837_v58 = vadd.f32 %v4766_v63, %v4679_v59  ;;  %v4839_v2 = vadd.f32 %v4774_v49, %v4681_v60 }
 0xb6d   : > { %v4880_v15 = vmul.f32 1.442695, %v4836_v42  ;;  %v4884_v33 = vmul.f32 1.442695, %v4838_v61 }
 0xb6e   : > { %v4882_v48 = vmul.f32 1.442695, %v4837_v58  ;;  %v4886_v7 = vmul.f32 1.442695, %v4839_v2 }
 0xb6f   : > { %5958 = vpow2.f32 %v4880_v15 }
 0xb70   : > { %5960 = vpow2.f32 %v4884_v33  ;;  %v5486_v33 = vld [vmem:[%s7111_s1 + $0x18] ss:$0 sm:$0xff] }
 0xb71   : > { %5962 = vpow2.f32 %v4882_v48 }
 0xb72   : > { %5964 = vpow2.f32 %v4886_v7 }
 0xb79   : > { %v5959_v52 = vpop.eup %5958 }
 0xb7a   : > { %v5961_v4 = vpop.eup %5960  ;;  %v4914_v51 = vsel %vm4847_vm4, %v5959_v52, %v4836_v42  ;;  %v5487_v52 = vld [vmem:[%s7113_s16 + $0x18] ss:$0 sm:$0xff]  ;;  %s5143_s16 = scalar_lea.sflag [#allocation28], %s7101_s28 }
 0xb7b   : > { %v5963_v5 = vpop.eup %5962  ;;  %v4916_v6 = vsel %vm4847_vm4, %v5961_v4, %v4838_v61 }
 0xb7c   : > { %v5965_v50 = vpop.eup %5964  ;;  %v4915_v9 = vsel %vm4847_vm4, %v5963_v5, %v4837_v58 }
 0xb7d   : > { %v5496_v11 = vpack.c.bf16 %v4915_v9, %v4914_v51  ;;  %v4917_v17 = vsel %vm4847_vm4, %v5965_v50, %v4839_v2 }
 0xb7e   : > { %v5497_v26 = vpack.c.bf16 %v4917_v17, %v4916_v6 }
 0xb7f   : > { %v5081_v62 = vrot.slane %v5496_v11, %v7391_v31 }
 0xb80   : > { %v5088_v18 = vrot.slane %v5497_v26, %v7391_v31 }
 0xb82   : > { %v5103_v56 = vcombine.low %v5081_v62, %v5088_v18 }
 0xb84   : > { %v5111_v1 = vrot.slane %v5103_v56, %v7391_v31 }
 0xba8   : > { %v4441_v20 = vpop.f32.mrb[20].mxu0  ;;  %v4482_v21 = vpop.f32.mrb[20].mxu1 }
 0xba9   : > { %v4682_v36 = vmul.f32 %v4620_v23, %v4441_v20  ;;  %v4684_v40 = vmul.f32 %v4628_v30, %v4482_v21  ;;  %v4443_v35 = vpop.f32.mrb[21].mxu0  ;;  %v4484_v38 = vpop.f32.mrb[21].mxu1 }
 0xbaa   : > { %v4683_v12 = vmul.f32 %v4624_v22, %v4443_v35  ;;  %v4685_v39 = vmul.f32 %v4632_v28, %v4484_v38  ;;  %v4445_v53 = vpop.f32.mrb[22].mxu0  ;;  %v4486_v47 = vpop.f32.mrb[22].mxu1 }
 0xbab   : > { %v4840_v16 = vadd.f32 %v4778_v29, %v4682_v36  ;;  %v4842_v41 = vadd.f32 %v4786_v13, %v4684_v40  ;;  %v4446_v55 = vpop.f32.mrb[23].mxu0  ;;  %v4487_v10 = vpop.f32.mrb[23].mxu1 }
 0xbac   : > { %v4841_v45 = vadd.f32 %v4782_v34, %v4683_v12  ;;  %v4843_v37 = vadd.f32 %v4790_v32, %v4685_v39 }
 0xbad   : > { %v4888_v3 = vmul.f32 1.442695, %v4840_v16  ;;  %v4892_v46 = vmul.f32 1.442695, %v4842_v41 }
 0xbae   : > { %v4890_v27 = vmul.f32 1.442695, %v4841_v45  ;;  %v4894_v63 = vmul.f32 1.442695, %v4843_v37 }
 0xbaf   : > { %5966 = vpow2.f32 %v4888_v3 }
 0xbb0   : > { %5968 = vpow2.f32 %v4892_v46 }
 0xbb1   : > { %5970 = vpow2.f32 %v4890_v27 }
 0xbb2   : > { %5972 = vpow2.f32 %v4894_v63 }
 0xbb9   : > { %v5967_v24 = vpop.eup %5966 }
 0xbba   : > { %v5969_v43 = vpop.eup %5968  ;;  %v4918_v49 = vsel %vm4847_vm4, %v5967_v24, %v4840_v16 }
 0xbbb   : > { %v5971_v54 = vpop.eup %5970  ;;  %v4920_v44 = vsel %vm4847_vm4, %v5969_v43, %v4842_v41 }
 0xbbc   : > { %v5973_v57 = vpop.eup %5972  ;;  %v4919_v8 = vsel %vm4847_vm4, %v5971_v54, %v4841_v45 }
 0xbbd   : > { %v5498_v59 = vpack.c.bf16 %v4919_v8, %v4918_v49  ;;  %v4921_v60 = vsel %vm4847_vm4, %v5973_v57, %v4843_v37 }
 0xbbe   : > { %v5499_v25 = vpack.c.bf16 %v4921_v60, %v4920_v44 }
 0xbbf   : > { %v5095_v0 = vrot.slane %v5498_v59, %v7391_v31 }
 0xbc0   : > { %v5102_v42 = vrot.slane %v5499_v25, %v7391_v31 }
 0xbc2   : > { %v5104_v61 = vcombine.low %v5095_v0, %v5102_v42 }
 0xbc4   : > { %v5118_v14 = vrot.slane %v5104_v61, %v7391_v31 }
 0xbc6   : > { %v5119_v58 = vcombine.low %v5111_v1, %v5118_v14 }
 0xbc8   : > { %v5560_v2 = vpop.f32.mrb[24].mxu0  ;;  %5140 = vst [vmem:[%s7115_s3 + $0x10] sm:$0xff] %v5119_v58 }
 0xbc9   : > { %v5561_v15 = vpop.f32.mrb[25].mxu0 }
 0xbca   : > { %v5562_v48 = vadd.f32 %v5561_v15, %v5560_v2  ;;  %v5563_v7 = vpop.f32.mrb[26].mxu0 }
 0xbcb   : > { %v5564_v4 = vpop.f32.mrb[27].mxu0 }
 0xbcc   : > { %v4686_v51 = vmul.f32 %v5562_v48, %v5486_v33 }
 0xbce   : > { %v4844_v5 = vadd.f32 %v5487_v52, %v4686_v51 }
 0xbd0   : > { %v4896_v6 = vmul.f32 1.442695, %v4844_v5 }
 0xbd2   : > { %5974 = vpow2.f32 %v4896_v6 }
 0xbdc   : > { %v5975_v50 = vpop.eup %5974 }
 0xbdd   : > { %v4922_v9 = vsel %vm4847_vm4, %v5975_v50, %v4844_v5 }
 0xbde   : > { %v4947_v11 = vpack.c.bf16 %v4922_v9, %v4922_v9 }
 0xbe0   : > { %v5126_v17 = vrot.slane %v4947_v11, %v7391_v31 }
 0xbe2   : > { %5500 = vst.sshfl [vmem:[%s7115_s3 + $0x18] sm:$0x1 pattern:$0x73625140] %v5126_v17 }
 0xbe3   : > { %6441 = shalt.err (!%p6438_p6)
}
 0xbe4   : > { %s6442_s28 = scalar_lea.hbm %s7855_s4, 400  ;;  %s6446_s24 = scalar_lea.hbm %s8052_s30, 1200 }
 0xbe5   : > { %p6443_p3 = scmp.ne.s32.totalorder %s7855_s4, %s6442_s28  ;;  %p6447_p9 = scmp.lt.u32.totalorder %s7855_s4, %s8052_s30 }
 0xbe6   : > { %p6448_p7 = scmp.lt.u32.totalorder %s6446_s24, %s6442_s28  ;;  %p6450_p12 = scmp.lt.u32.totalorder %s6442_s28, %s7855_s4 }
 0xbe7   : > { %p6444_p13 = pnand %p6443_p3, %p8053_p10 }
 0xbe8   : > { %p6449_p11 = por %p6448_p7, %p6447_p9 }
 0xbe9   : > { %p6445_p8 = pneg %p6444_p13 }
 0xbea   : > { %p6451_p1 = por %p6450_p12, %p6449_p11 }
 0xbec   : > { %p6452_p4 = pnand %p6451_p1, %p6445_p8 }
 0xbee   : > { %6455 = shalt.err (!%p6452_p4)
}
 0xbef   : > { %5725 = dma.vmem_to_hbm [thread:$0]  (%p8053_p10), %s7857_s25, 400, %s7855_s4, %s5143_s16  }
 0xbf0   : > { %p8054_p2 = scmp.eq.s32.totalorder %s8046_s23, 2 }
 0xbf2   : > { %6505 = dma.done.wait (%p8054_p2), [#allocation5], 32   ;;  %p8055_p5 = pmov %p8054_p2 }
 0xbf4   : > { %6507 = vsyncadd (%p8055_p5), [#allocation5], 4294967264 }
 0xbf5 PF: > { %s8056_s0 = sld [smem:[#allocation39_spill]]  ;;  %s8057_s29 = sld [smem:[#allocation47_spill]] }
 0xbf6   : > { %p5807_p0 = scmp.ge.s32.totalorder %s6526_s27, 2 }
 0xbfb   : > { %s5184_s2 = sand.u32 1, %s8056_s0   ;;  %p8058_p6 = scmp.ne.s32.totalorder %s8057_s29, 0 }
 0xbfc   : > { %s5185_s17 = scalar_lea.sflag [#allocation28], %s5184_s2 }
 0xbfd   : > { %p5777_p3 = pnand %p5807_p0, %p8058_p6 }
 0xbff   : > { %6509 = dma.done.wait (!%p5777_p3), %s5185_s17, 400  }
 0xc00   : > { %6511 = vsyncadd (!%p5777_p3), %s5185_s17, 4294966896  ;;  %s8059_s27 = sld [smem:[#allocation43_spill]]  ;;  %s8060_s24 = sld [smem:[#allocation40_spill]] }
 0xc01   : > { %s8061_s21 = sld [smem:[#allocation44_spill]]  ;;  %s8062_s25 = smov %s6522_s26 }
 0xc06   : > { %p36_p10 = scmp.ge.s32.totalorder %s8059_s27, 5  }
 0xc07   : > { %s8063_s26 = smov %s8061_s21 }
 0xc08   :  { %38 = sbr.rel (!%p36_p10) target bundleno = 29 (0x1d), region = 211 }
 0xc0f   :  { %5190 = vsyncpa [#allocation4], 1 }
 0xc10   :  { %5192 = vsyncpa [#allocation4 + $0x1], 1 }
 0xc11   :  { %5193 = vsyncpa [#allocation7], 1 }
 0xc12   :  { %5194 = vsyncpa [#allocation10], 1 }
 0xc13   :  { %5195 = vsyncpa [#allocation13], 1 }
 0xc14   :  { %5196 = vsyncpa [#allocation16], 1 }
 0xc15   :  { %5197 = vsyncpa [#allocation19], 1 }
 0xc16   :  { %5198 = vsyncpa [#allocation22], 1 }
 0xc17   :  { %5199 = vsyncpa [#allocation5], 1 }
 0xc18   :  { %5201 = vsyncpa [#allocation5 + $0x1], 1 }
 0xc19   :  { %5202 = vsyncpa [#allocation28], 1 }
 0xc1a   :  { %5204 = vsyncpa [#allocation28 + $0x1], 1 }

</bundles_post_ra>
